<compile_context>
chip_gen: v5e
topology: v5e:2x2
jax: 0.10.0
libtpu: 0.0.40
codegen_flags: <defaults>
</compile_context>

<pallas_src>
import jax
import jax.numpy as jnp
from jax.experimental import pallas as pl
from jax.experimental.pallas import tpu as pltpu

NEG_SLOPE = 0.33


def _leaky(v):
    # leaky_relu(x) == max(x, slope*x) for 0 < slope < 1: mul+max (2 VALU ops)
    # instead of cmp+mul+select (3).
    return jnp.maximum(v, NEG_SLOPE * v)


def brainnet_kernel(x_ref, xt_ref,
                    w1a_ref, w1bt_ref, b1nd_ref, b1dn_ref,
                    w2a_ref, w2b_ref, b2dh_ref,
                    e2n_w_ref, e2n_b_ref, n2g_w_ref, n2g_b_ref,
                    d1_w_ref, d1_b_ref, d2_w_ref, d2_b_ref, d3_w_ref, d3_b_ref,
                    out_ref):
    f32 = jnp.float32
    bf16 = jnp.bfloat16
    bt, n, d = x_ref.shape                     # batch tile, node_num, in_dim
    p1 = w1a_ref.shape[1] // d                 # planes of first E2E block (32)
    hid = w2b_ref.shape[1]                     # hidden_dim (planes of second E2E block)

    x2 = x_ref[...].reshape(bt * n, d)         # rows [b, i]   (bf16)
    xt2 = xt_ref[...].reshape(bt * d, n)       # rows [b, r]   (bf16)

    def fold(v, rows):
        # (bt*rows, c) -> (bt, rows*c) with out[b, r*c + j] = v[b*rows + r, j]
        # (second-order cost after the big concats were folded into weights; a
        #  relayout-aware reshape/einshape could replace it after bundle inspection).
        c = v.shape[-1]
        v3 = v.reshape(bt, rows, c)
        return jnp.concatenate([v3[:, i, :] for i in range(rows)], axis=1)

    def rep_rows(v, rows):
        # (bt, L) -> (bt*rows, L): each sample's row repeated `rows` times
        L = v.shape[-1]
        return jnp.broadcast_to(v[:, None, :], (bt, rows, L)).reshape(bt * rows, L)

    # ---- E2E block 1: (1,D) / (N,1) convs; lane replication pre-folded into weights ----
    a1w = jnp.dot(x2, w1a_ref[...], preferred_element_type=f32)    # (bt*n, D*P1) == cat([a1]*d)
    b1w = jnp.dot(xt2, w1bt_ref[...], preferred_element_type=f32)  # (bt*d, N*P1) == cat([b1]*n)
    a1 = a1w[:, :p1]                                               # (bt*n, P1)  narrow a-term
    b1 = b1w[:, :p1]                                               # (bt*d, P1)  narrow b-term

    # ---- E2E block 2 inputs: "cat + add" slabs in both layouts, + bias, + leaky ----
    # layout A: rows [b,i], lanes [r*P1+p]
    o1_nd = _leaky(a1w + rep_rows(fold(b1, d), n) + b1nd_ref[...]).astype(bf16)
    # layout B: rows [b,r], lanes [i*P1+p]
    o1_dn = _leaky(rep_rows(fold(a1, n), d) + b1w + b1dn_ref[...]).astype(bf16)

    b2v = jnp.dot(o1_dn, w2b_ref[...], preferred_element_type=f32)      # (bt*d, H)
    if w2a_ref.shape[1] == d * hid:
        # widened weights (v6e/v7x): the matmul directly produces cat([a2]*d)
        a2w = jnp.dot(o1_nd, w2a_ref[...], preferred_element_type=f32)  # (bt*n, D*H)
    else:
        # narrow weights (v5e gate): cheap matmul, replicate on lanes afterwards
        a2 = jnp.dot(o1_nd, w2a_ref[...], preferred_element_type=f32)   # (bt*n, H)
        a2w = jnp.concatenate([a2] * d, axis=1)

    # rows [b,i], lanes [j*H+q]
    o2 = _leaky(a2w + rep_rows(fold(b2v, d), n) + b2dh_ref[...])        # (bt*n, D*H) f32

    # ---- E2N as VPU multiply + lane reduction (replaces the N=1 matmul + 1-lane concats) ----
    e2n = jnp.sum((o2 * e2n_w_ref[...]).reshape(bt, n, d * hid), axis=-1)   # (bt, n)
    e2n = _leaky(e2n + e2n_b_ref[...])

    # ---- N2G + dense head ----
    # TODO(synk): F.dropout(p=0.5) of the PyTorch forward (training mode) is stochastic;
    # implemented as identity (inference behaviour) here.
    n2g = _leaky(jnp.dot(e2n, n2g_w_ref[...], preferred_element_type=f32) + n2g_b_ref[...])
    h1 = _leaky(jnp.dot(n2g, d1_w_ref[...], preferred_element_type=f32) + d1_b_ref[...])
    h2 = _leaky(jnp.dot(h1, d2_w_ref[...], preferred_element_type=f32) + d2_b_ref[...])
    h3 = _leaky(jnp.dot(h2, d3_w_ref[...], preferred_element_type=f32) + d3_b_ref[...])
    out_ref[...] = h3.astype(out_ref.dtype)


def init_params(key, node_num, in_dim, hidden_dim, out_dim, n_classes):
    """Deterministic synthetic parameters in PyTorch layout."""
    ks = jax.random.split(key, 18)

    def w(k, shape, scale=0.1):
        return scale * jax.random.normal(k, shape, jnp.float32)

    p = {}
    p['e2e1_w1'] = w(ks[0], (32, 1, 1, in_dim))
    p['e2e1_b1'] = w(ks[1], (32,))
    p['e2e1_w2'] = w(ks[2], (32, 1, node_num, 1))
    p['e2e1_b2'] = w(ks[3], (32,))
    p['e2e2_w1'] = w(ks[4], (hidden_dim, 32, 1, in_dim))
    p['e2e2_b1'] = w(ks[5], (hidden_dim,))
    p['e2e2_w2'] = w(ks[6], (hidden_dim, 32, node_num, 1))
    p['e2e2_b2'] = w(ks[7], (hidden_dim,))
    p['e2n_w'] = w(ks[8], (1, hidden_dim, 1, in_dim))
    p['e2n_b'] = w(ks[9], (1,))
    p['n2g_w'] = w(ks[10], (out_dim, 1, node_num, 1))
    p['n2g_b'] = w(ks[11], (out_dim,))
    p['d1_w'] = w(ks[12], (128, out_dim))
    p['d1_b'] = w(ks[13], (128,))
    p['d2_w'] = w(ks[14], (30, 128))
    p['d2_b'] = w(ks[15], (30,))
    p['d3_w'] = w(ks[16], (n_classes, 30))
    p['d3_b'] = w(ks[17], (n_classes,))
    return p


def prepare_kernel_params(p, widen_w2a=True):
    """PyTorch-layout weights -> fused-contraction slabs (called once, outside the jit path).

    widen_w2a=True additionally pre-tiles the second E2E (1,D)-conv weight to (D*P1, D*H)
    so the in-kernel lane replication of its output becomes part of the matmul N dimension
    (best on v6e/v7x; on v5e the 16x FLOP inflation can outweigh the lane work it removes).
    Large matmul weight slabs are stored in bf16; biases and tiny head weights stay f32.
    """
    hid, p1, _, d = p['e2e2_w1'].shape
    n = p['e2e1_w2'].shape[2]
    out_dim = p['n2g_w'].shape[0]
    bf16 = jnp.bfloat16
    kp = {}

    w1a = p['e2e1_w1'].reshape(p1, d).T                                  # (D, P1)
    w1bt = p['e2e1_w2'].reshape(p1, n).T                                 # (N, P1)
    kp['w1a_wide'] = jnp.tile(w1a, (1, d)).astype(bf16)                  # (D, D*P1)
    kp['w1bt_wide'] = jnp.tile(w1bt, (1, n)).astype(bf16)                # (N, N*P1)
    b1 = (p['e2e1_b1'] + p['e2e1_b2']).reshape(1, p1)
    kp['b1_nd'] = jnp.tile(b1, (1, d))                                   # (1, D*P1) f32
    kp['b1_dn'] = jnp.tile(b1, (1, n))                                   # (1, N*P1) f32

    w2a = jnp.transpose(p['e2e2_w1'].reshape(hid, p1, d),
                        (2, 1, 0)).reshape(d * p1, hid)                  # (D*P1, H)
    w2b = jnp.transpose(p['e2e2_w2'].reshape(hid, p1, n),
                        (2, 1, 0)).reshape(n * p1, hid)                  # (N*P1, H)
    kp['w2a'] = (jnp.tile(w2a, (1, d)) if widen_w2a else w2a).astype(bf16)
    kp['w2b'] = w2b.astype(bf16)
    b2 = (p['e2e2_b1'] + p['e2e2_b2']).reshape(1, hid)
    kp['b2_dh'] = jnp.tile(b2, (1, d))                                   # (1, D*H) f32

    kp['e2n_w'] = p['e2n_w'].reshape(hid, d).T.reshape(1, d * hid)       # (1, D*H) f32
    kp['e2n_b'] = p['e2n_b'].reshape(1, 1)
    kp['n2g_w'] = p['n2g_w'].reshape(out_dim, n).T                       # (N, OUT) f32
    kp['n2g_b'] = p['n2g_b'].reshape(1, out_dim)
    kp['d1_w'] = p['d1_w'].T
    kp['d1_b'] = p['d1_b'].reshape(1, -1)
    kp['d2_w'] = p['d2_w'].T
    kp['d2_b'] = p['d2_b'].reshape(1, -1)
    kp['d3_w'] = p['d3_w'].T
    kp['d3_b'] = p['d3_b'].reshape(1, -1)
    return kp


def _default_widen_w2a():
    """Widen w2a everywhere except TPU v5 (smaller MXU headroom; see perf notes)."""
    try:
        return 'v5' not in jax.devices()[0].device_kind.lower()
    except Exception:
        return True


def _pick_block_b(b, cap=128):
    """Batch tile: prefer >=2 grid steps (so "parallel" spans both v7x TensorCores)
    with bt % 8 == 0 (output-block legality) and b % bt == 0."""
    for bt in range(min(cap, b // 2), 7, -1):
        if b % bt == 0 and bt % 8 == 0:
            return bt
    if b <= cap:
        return b          # single grid step; block spans the full batch dim (legal)
    return cap            # no clean divisor: the wrapper zero-pads the batch to a multiple


def brain_net_cnn_forward(h, kp, node_num, block_b=128):
    # g and e of the PyTorch forward are unused; only h matters.
    d = h.shape[1]
    x = h.reshape(-1, node_num, d).astype(jnp.bfloat16)       # (B, N, D); in_planes = 1 implicit
    b = x.shape[0]
    xt = jnp.swapaxes(x, 1, 2)                                # (B, D, N)
    bt = _pick_block_b(b, block_b)
    bp = -(-b // bt) * bt                                     # padded batch (multiple of bt)
    if bp != b:
        x = jnp.pad(x, ((0, bp - b), (0, 0), (0, 0)))
        xt = jnp.pad(xt, ((0, bp - b), (0, 0), (0, 0)))
    n_classes = kp['d3_b'].shape[1]

    weights = (kp['w1a_wide'], kp['w1bt_wide'], kp['b1_nd'], kp['b1_dn'],
               kp['w2a'], kp['w2b'], kp['b2_dh'],
               kp['e2n_w'], kp['e2n_b'], kp['n2g_w'], kp['n2g_b'],
               kp['d1_w'], kp['d1_b'], kp['d2_w'], kp['d2_b'],
               kp['d3_w'], kp['d3_b'])

    def const_spec(a):
        return pl.BlockSpec(a.shape, lambda i, _nd=a.ndim: (0,) * _nd)

    in_specs = ([pl.BlockSpec((bt, node_num, d), lambda i: (i, 0, 0)),
                 pl.BlockSpec((bt, d, node_num), lambda i: (i, 0, 0))]
                + [const_spec(a) for a in weights])

    out = pl.pallas_call(
        brainnet_kernel,
        out_shape=jax.ShapeDtypeStruct((bp, n_classes), jnp.float32),
        grid=(bp // bt,),
        in_specs=in_specs,
        out_specs=pl.BlockSpec((bt, n_classes), lambda i: (i, 0)),
        compiler_params=pltpu.CompilerParams(
            dimension_semantics=("parallel",),
            # ~3 f32 slabs of bt*N x 512 plus bf16 copies and the widened (512,512) bf16
            # weights: well under 64 MiB at bt<=128; cap fits every generation's physical
            # VMEM (v7x: 64 MiB/TC, v5e/v6e: 128 MiB) while raising the scoped default.
            vmem_limit_bytes=64 * 1024 * 1024),
    )(x, xt, *weights)
    return out[:b]


def reference_forward(h, p, node_num):
    """Pure-JAX mirror of the PyTorch forward (dropout = identity)."""
    x = h.reshape(-1, 1, node_num, h.shape[1]).astype(jnp.float32)   # NCHW

    def e2e(x, w1, b1, w2, b2):
        a = jnp.einsum('bcnd,pcd->bpn', x, w1[:, :, 0, :]) + b1[None, :, None]
        bb = jnp.einsum('bcnd,pcn->bpd', x, w2[:, :, :, 0]) + b2[None, :, None]
        return a[:, :, :, None] + bb[:, :, None, :]

    out = _leaky(e2e(x, p['e2e1_w1'], p['e2e1_b1'], p['e2e1_w2'], p['e2e1_b2']))
    out = _leaky(e2e(out, p['e2e2_w1'], p['e2e2_b1'], p['e2e2_w2'], p['e2e2_b2']))
    e2n = _leaky(jnp.einsum('bcnd,cd->bn', out, p['e2n_w'][0, :, 0, :]) + p['e2n_b'][0])
    n2g = _leaky(jnp.einsum('bn,on->bo', e2n, p['n2g_w'][:, 0, :, 0]) + p['n2g_b'][None, :])
    h1 = _leaky(jnp.matmul(n2g, p['d1_w'].T) + p['d1_b'])
    h2 = _leaky(jnp.matmul(h1, p['d2_w'].T) + p['d2_b'])
    h3 = _leaky(jnp.matmul(h2, p['d3_w'].T) + p['d3_b'])
    return h3


if __name__ == "__main__":
    B, node_num, in_dim = 2, 16, 16
    hidden_dim, out_dim, n_classes = 32, 32, 4

    key = jax.random.PRNGKey(0)
    k_h, k_p = jax.random.split(key)
    h = jax.random.normal(k_h, (B * node_num, in_dim), jnp.float32)
    params = init_params(k_p, node_num, in_dim, hidden_dim, out_dim, n_classes)

    # Weight re-layout (bf16 cast + lane widening) is done once, outside the per-call path.
    kp = prepare_kernel_params(params, widen_w2a=_default_widen_w2a())
    fwd = jax.jit(lambda hh, kpp: brain_net_cnn_forward(hh, kpp, node_num))

    out = jax.block_until_ready(fwd(h, kp))
    ref = reference_forward(h, params, node_num)

    assert out.shape == (B, n_classes), (out.shape, (B, n_classes))
    # bf16 matmul operands (same truncation XLA applies for default f32 precision on TPU)
    # -> slightly loose tolerance vs. the f32 reference.
    assert jnp.allclose(out, ref, atol=5e-2, rtol=5e-2), (
        float(jnp.max(jnp.abs(out - ref))), out, ref)
    print("KERNEL_OK")
</pallas_src>

<mosaic_0001>
module attributes {stable_mosaic.version = 11 : i64} {
  func.func @brainnet_kernel(%arg0: i32, %arg1: memref<2x16x16xbf16, #tpu.memory_space<vmem>>, %arg2: memref<2x16x16xbf16, #tpu.memory_space<vmem>>, %arg3: memref<16x512xbf16, #tpu.memory_space<vmem>>, %arg4: memref<16x512xbf16, #tpu.memory_space<vmem>>, %arg5: memref<1x512xf32, #tpu.memory_space<vmem>>, %arg6: memref<1x512xf32, #tpu.memory_space<vmem>>, %arg7: memref<512x512xbf16, #tpu.memory_space<vmem>>, %arg8: memref<512x32xbf16, #tpu.memory_space<vmem>>, %arg9: memref<1x512xf32, #tpu.memory_space<vmem>>, %arg10: memref<1x512xf32, #tpu.memory_space<vmem>>, %arg11: memref<1x1xf32, #tpu.memory_space<vmem>>, %arg12: memref<16x32xf32, #tpu.memory_space<vmem>>, %arg13: memref<1x32xf32, #tpu.memory_space<vmem>>, %arg14: memref<32x128xf32, #tpu.memory_space<vmem>>, %arg15: memref<1x128xf32, #tpu.memory_space<vmem>>, %arg16: memref<128x30xf32, #tpu.memory_space<vmem>>, %arg17: memref<1x30xf32, #tpu.memory_space<vmem>>, %arg18: memref<30x4xf32, #tpu.memory_space<vmem>>, %arg19: memref<1x4xf32, #tpu.memory_space<vmem>>, %arg20: memref<2x4xf32, #tpu.memory_space<vmem>>) attributes {dimension_semantics = [#tpu.dimension_semantics<parallel>], iteration_bounds = array<i64: 1>, scalar_prefetch = 0 : i64, scratch_operands = 0 : i64, tpu.core_type = #tpu.core_type<tc>, window_params = [{transform_indices = @transform_0, window_bounds = array<i64: 2, 16, 16>}, {transform_indices = @transform_1, window_bounds = array<i64: 2, 16, 16>}, {pipeline_mode = #tpu.pipeline_mode<synchronous>, transform_indices = @transform_2, window_bounds = array<i64: 16, 512>}, {pipeline_mode = #tpu.pipeline_mode<synchronous>, transform_indices = @transform_3, window_bounds = array<i64: 16, 512>}, {pipeline_mode = #tpu.pipeline_mode<synchronous>, transform_indices = @transform_4, window_bounds = array<i64: 1, 512>}, {pipeline_mode = #tpu.pipeline_mode<synchronous>, transform_indices = @transform_5, window_bounds = array<i64: 1, 512>}, {pipeline_mode = #tpu.pipeline_mode<synchronous>, transform_indices = @transform_6, window_bounds = array<i64: 512, 512>}, {pipeline_mode = #tpu.pipeline_mode<synchronous>, transform_indices = @transform_7, window_bounds = array<i64: 512, 32>}, {pipeline_mode = #tpu.pipeline_mode<synchronous>, transform_indices = @transform_8, window_bounds = array<i64: 1, 512>}, {pipeline_mode = #tpu.pipeline_mode<synchronous>, transform_indices = @transform_9, window_bounds = array<i64: 1, 512>}, {pipeline_mode = #tpu.pipeline_mode<synchronous>, transform_indices = @transform_10, window_bounds = array<i64: 1, 1>}, {pipeline_mode = #tpu.pipeline_mode<synchronous>, transform_indices = @transform_11, window_bounds = array<i64: 16, 32>}, {pipeline_mode = #tpu.pipeline_mode<synchronous>, transform_indices = @transform_12, window_bounds = array<i64: 1, 32>}, {pipeline_mode = #tpu.pipeline_mode<synchronous>, transform_indices = @transform_13, window_bounds = array<i64: 32, 128>}, {pipeline_mode = #tpu.pipeline_mode<synchronous>, transform_indices = @transform_14, window_bounds = array<i64: 1, 128>}, {pipeline_mode = #tpu.pipeline_mode<synchronous>, transform_indices = @transform_15, window_bounds = array<i64: 128, 30>}, {pipeline_mode = #tpu.pipeline_mode<synchronous>, transform_indices = @transform_16, window_bounds = array<i64: 1, 30>}, {pipeline_mode = #tpu.pipeline_mode<synchronous>, transform_indices = @transform_17, window_bounds = array<i64: 30, 4>}, {pipeline_mode = #tpu.pipeline_mode<synchronous>, transform_indices = @transform_18, window_bounds = array<i64: 1, 4>}, {transform_indices = @transform_19, window_bounds = array<i64: 2, 4>}]} {
    %c0 = arith.constant 0 : index
    %c0_0 = arith.constant 0 : index
    %c0_1 = arith.constant 0 : index
    %0 = vector.load %arg1[%c0, %c0_0, %c0_1] : memref<2x16x16xbf16, #tpu.memory_space<vmem>>, vector<2x16x16xbf16>
    %1 = vector.shape_cast %0 : vector<2x16x16xbf16> to vector<32x16xbf16>
    %c0_2 = arith.constant 0 : index
    %c0_3 = arith.constant 0 : index
    %c0_4 = arith.constant 0 : index
    %2 = vector.load %arg2[%c0_2, %c0_3, %c0_4] : memref<2x16x16xbf16, #tpu.memory_space<vmem>>, vector<2x16x16xbf16>
    %3 = vector.shape_cast %2 : vector<2x16x16xbf16> to vector<32x16xbf16>
    %c0_5 = arith.constant 0 : index
    %c0_6 = arith.constant 0 : index
    %4 = vector.load %arg3[%c0_5, %c0_6] : memref<16x512xbf16, #tpu.memory_space<vmem>>, vector<16x512xbf16>
    %cst = arith.constant dense<0.000000e+00> : vector<32x512xf32>
    %5 = tpu.matmul %1, %4, %cst {dimension_numbers = #tpu.dot_dimension_numbers<[1], [0], [0], [1], [0, 0, 1, 1], [], []>} : vector<32x16xbf16>, vector<16x512xbf16>, vector<32x512xf32> -> vector<32x512xf32>
    %c0_7 = arith.constant 0 : index
    %c0_8 = arith.constant 0 : index
    %6 = vector.load %arg4[%c0_7, %c0_8] : memref<16x512xbf16, #tpu.memory_space<vmem>>, vector<16x512xbf16>
    %cst_9 = arith.constant dense<0.000000e+00> : vector<32x512xf32>
    %7 = tpu.matmul %3, %6, %cst_9 {dimension_numbers = #tpu.dot_dimension_numbers<[1], [0], [0], [1], [0, 0, 1, 1], [], []>} : vector<32x16xbf16>, vector<16x512xbf16>, vector<32x512xf32> -> vector<32x512xf32>
    %8 = vector.extract_strided_slice %5 {offsets = [0, 0], sizes = [32, 32], strides = [1, 1]} : vector<32x512xf32> to vector<32x32xf32>
    %9 = vector.extract_strided_slice %7 {offsets = [0, 0], sizes = [32, 32], strides = [1, 1]} : vector<32x512xf32> to vector<32x32xf32>
    %10 = vector.shape_cast %9 : vector<32x32xf32> to vector<2x16x32xf32>
    %11 = vector.extract_strided_slice %10 {offsets = [0, 0, 0], sizes = [2, 1, 32], strides = [1, 1, 1]} : vector<2x16x32xf32> to vector<2x1x32xf32>
    %12 = vector.shape_cast %11 : vector<2x1x32xf32> to vector<2x32xf32>
    %13 = vector.extract_strided_slice %10 {offsets = [0, 1, 0], sizes = [2, 1, 32], strides = [1, 1, 1]} : vector<2x16x32xf32> to vector<2x1x32xf32>
    %14 = vector.shape_cast %13 : vector<2x1x32xf32> to vector<2x32xf32>
    %15 = vector.extract_strided_slice %10 {offsets = [0, 2, 0], sizes = [2, 1, 32], strides = [1, 1, 1]} : vector<2x16x32xf32> to vector<2x1x32xf32>
    %16 = vector.shape_cast %15 : vector<2x1x32xf32> to vector<2x32xf32>
    %17 = vector.extract_strided_slice %10 {offsets = [0, 3, 0], sizes = [2, 1, 32], strides = [1, 1, 1]} : vector<2x16x32xf32> to vector<2x1x32xf32>
    %18 = vector.shape_cast %17 : vector<2x1x32xf32> to vector<2x32xf32>
    %19 = vector.extract_strided_slice %10 {offsets = [0, 4, 0], sizes = [2, 1, 32], strides = [1, 1, 1]} : vector<2x16x32xf32> to vector<2x1x32xf32>
    %20 = vector.shape_cast %19 : vector<2x1x32xf32> to vector<2x32xf32>
    %21 = vector.extract_strided_slice %10 {offsets = [0, 5, 0], sizes = [2, 1, 32], strides = [1, 1, 1]} : vector<2x16x32xf32> to vector<2x1x32xf32>
    %22 = vector.shape_cast %21 : vector<2x1x32xf32> to vector<2x32xf32>
    %23 = vector.extract_strided_slice %10 {offsets = [0, 6, 0], sizes = [2, 1, 32], strides = [1, 1, 1]} : vector<2x16x32xf32> to vector<2x1x32xf32>
    %24 = vector.shape_cast %23 : vector<2x1x32xf32> to vector<2x32xf32>
    %25 = vector.extract_strided_slice %10 {offsets = [0, 7, 0], sizes = [2, 1, 32], strides = [1, 1, 1]} : vector<2x16x32xf32> to vector<2x1x32xf32>
    %26 = vector.shape_cast %25 : vector<2x1x32xf32> to vector<2x32xf32>
    %27 = vector.extract_strided_slice %10 {offsets = [0, 8, 0], sizes = [2, 1, 32], strides = [1, 1, 1]} : vector<2x16x32xf32> to vector<2x1x32xf32>
    %28 = vector.shape_cast %27 : vector<2x1x32xf32> to vector<2x32xf32>
    %29 = vector.extract_strided_slice %10 {offsets = [0, 9, 0], sizes = [2, 1, 32], strides = [1, 1, 1]} : vector<2x16x32xf32> to vector<2x1x32xf32>
    %30 = vector.shape_cast %29 : vector<2x1x32xf32> to vector<2x32xf32>
    %31 = vector.extract_strided_slice %10 {offsets = [0, 10, 0], sizes = [2, 1, 32], strides = [1, 1, 1]} : vector<2x16x32xf32> to vector<2x1x32xf32>
    %32 = vector.shape_cast %31 : vector<2x1x32xf32> to vector<2x32xf32>
    %33 = vector.extract_strided_slice %10 {offsets = [0, 11, 0], sizes = [2, 1, 32], strides = [1, 1, 1]} : vector<2x16x32xf32> to vector<2x1x32xf32>
    %34 = vector.shape_cast %33 : vector<2x1x32xf32> to vector<2x32xf32>
    %35 = vector.extract_strided_slice %10 {offsets = [0, 12, 0], sizes = [2, 1, 32], strides = [1, 1, 1]} : vector<2x16x32xf32> to vector<2x1x32xf32>
    %36 = vector.shape_cast %35 : vector<2x1x32xf32> to vector<2x32xf32>
    %37 = vector.extract_strided_slice %10 {offsets = [0, 13, 0], sizes = [2, 1, 32], strides = [1, 1, 1]} : vector<2x16x32xf32> to vector<2x1x32xf32>
    %38 = vector.shape_cast %37 : vector<2x1x32xf32> to vector<2x32xf32>
    %39 = vector.extract_strided_slice %10 {offsets = [0, 14, 0], sizes = [2, 1, 32], strides = [1, 1, 1]} : vector<2x16x32xf32> to vector<2x1x32xf32>
    %40 = vector.shape_cast %39 : vector<2x1x32xf32> to vector<2x32xf32>
    %41 = vector.extract_strided_slice %10 {offsets = [0, 15, 0], sizes = [2, 1, 32], strides = [1, 1, 1]} : vector<2x16x32xf32> to vector<2x1x32xf32>
    %42 = vector.shape_cast %41 : vector<2x1x32xf32> to vector<2x32xf32>
    %43 = tpu.concatenate %12, %14, %16, %18, %20, %22, %24, %26, %28, %30, %32, %34, %36, %38, %40, %42 in 1 : vector<2x32xf32>, vector<2x32xf32>, vector<2x32xf32>, vector<2x32xf32>, vector<2x32xf32>, vector<2x32xf32>, vector<2x32xf32>, vector<2x32xf32>, vector<2x32xf32>, vector<2x32xf32>, vector<2x32xf32>, vector<2x32xf32>, vector<2x32xf32>, vector<2x32xf32>, vector<2x32xf32>, vector<2x32xf32> -> vector<2x512xf32>
    %44 = vector.shape_cast %43 : vector<2x512xf32> to vector<2x1x512xf32>
    %45 = vector.shape_cast %44 : vector<2x1x512xf32> to vector<2x1x512xf32>
    %46 = vector.broadcast %45 : vector<2x1x512xf32> to vector<2x16x512xf32>
    %47 = vector.shape_cast %46 : vector<2x16x512xf32> to vector<32x512xf32>
    %48 = arith.addf %5, %47 : vector<32x512xf32>
    %c0_10 = arith.constant 0 : index
    %c0_11 = arith.constant 0 : index
    %49 = vector.load %arg5[%c0_10, %c0_11] : memref<1x512xf32, #tpu.memory_space<vmem>>, vector<1x512xf32>
    %50 = vector.broadcast %49 : vector<1x512xf32> to vector<32x512xf32>
    %51 = arith.addf %48, %50 : vector<32x512xf32>
    %cst_12 = arith.constant 3.300000e-01 : f32
    %52 = vector.broadcast %cst_12 : f32 to vector<32x512xf32>
    %53 = arith.mulf %52, %51 : vector<32x512xf32>
    %54 = arith.maximumf %51, %53 : vector<32x512xf32>
    %55 = arith.truncf %54 : vector<32x512xf32> to vector<32x512xbf16>
    %56 = vector.shape_cast %8 : vector<32x32xf32> to vector<2x16x32xf32>
    %57 = vector.extract_strided_slice %56 {offsets = [0, 0, 0], sizes = [2, 1, 32], strides = [1, 1, 1]} : vector<2x16x32xf32> to vector<2x1x32xf32>
    %58 = vector.shape_cast %57 : vector<2x1x32xf32> to vector<2x32xf32>
    %59 = vector.extract_strided_slice %56 {offsets = [0, 1, 0], sizes = [2, 1, 32], strides = [1, 1, 1]} : vector<2x16x32xf32> to vector<2x1x32xf32>
    %60 = vector.shape_cast %59 : vector<2x1x32xf32> to vector<2x32xf32>
    %61 = vector.extract_strided_slice %56 {offsets = [0, 2, 0], sizes = [2, 1, 32], strides = [1, 1, 1]} : vector<2x16x32xf32> to vector<2x1x32xf32>
    %62 = vector.shape_cast %61 : vector<2x1x32xf32> to vector<2x32xf32>
    %63 = vector.extract_strided_slice %56 {offsets = [0, 3, 0], sizes = [2, 1, 32], strides = [1, 1, 1]} : vector<2x16x32xf32> to vector<2x1x32xf32>
    %64 = vector.shape_cast %63 : vector<2x1x32xf32> to vector<2x32xf32>
    %65 = vector.extract_strided_slice %56 {offsets = [0, 4, 0], sizes = [2, 1, 32], strides = [1, 1, 1]} : vector<2x16x32xf32> to vector<2x1x32xf32>
    %66 = vector.shape_cast %65 : vector<2x1x32xf32> to vector<2x32xf32>
    %67 = vector.extract_strided_slice %56 {offsets = [0, 5, 0], sizes = [2, 1, 32], strides = [1, 1, 1]} : vector<2x16x32xf32> to vector<2x1x32xf32>
    %68 = vector.shape_cast %67 : vector<2x1x32xf32> to vector<2x32xf32>
    %69 = vector.extract_strided_slice %56 {offsets = [0, 6, 0], sizes = [2, 1, 32], strides = [1, 1, 1]} : vector<2x16x32xf32> to vector<2x1x32xf32>
    %70 = vector.shape_cast %69 : vector<2x1x32xf32> to vector<2x32xf32>
    %71 = vector.extract_strided_slice %56 {offsets = [0, 7, 0], sizes = [2, 1, 32], strides = [1, 1, 1]} : vector<2x16x32xf32> to vector<2x1x32xf32>
    %72 = vector.shape_cast %71 : vector<2x1x32xf32> to vector<2x32xf32>
    %73 = vector.extract_strided_slice %56 {offsets = [0, 8, 0], sizes = [2, 1, 32], strides = [1, 1, 1]} : vector<2x16x32xf32> to vector<2x1x32xf32>
    %74 = vector.shape_cast %73 : vector<2x1x32xf32> to vector<2x32xf32>
    %75 = vector.extract_strided_slice %56 {offsets = [0, 9, 0], sizes = [2, 1, 32], strides = [1, 1, 1]} : vector<2x16x32xf32> to vector<2x1x32xf32>
    %76 = vector.shape_cast %75 : vector<2x1x32xf32> to vector<2x32xf32>
    %77 = vector.extract_strided_slice %56 {offsets = [0, 10, 0], sizes = [2, 1, 32], strides = [1, 1, 1]} : vector<2x16x32xf32> to vector<2x1x32xf32>
    %78 = vector.shape_cast %77 : vector<2x1x32xf32> to vector<2x32xf32>
    %79 = vector.extract_strided_slice %56 {offsets = [0, 11, 0], sizes = [2, 1, 32], strides = [1, 1, 1]} : vector<2x16x32xf32> to vector<2x1x32xf32>
    %80 = vector.shape_cast %79 : vector<2x1x32xf32> to vector<2x32xf32>
    %81 = vector.extract_strided_slice %56 {offsets = [0, 12, 0], sizes = [2, 1, 32], strides = [1, 1, 1]} : vector<2x16x32xf32> to vector<2x1x32xf32>
    %82 = vector.shape_cast %81 : vector<2x1x32xf32> to vector<2x32xf32>
    %83 = vector.extract_strided_slice %56 {offsets = [0, 13, 0], sizes = [2, 1, 32], strides = [1, 1, 1]} : vector<2x16x32xf32> to vector<2x1x32xf32>
    %84 = vector.shape_cast %83 : vector<2x1x32xf32> to vector<2x32xf32>
    %85 = vector.extract_strided_slice %56 {offsets = [0, 14, 0], sizes = [2, 1, 32], strides = [1, 1, 1]} : vector<2x16x32xf32> to vector<2x1x32xf32>
    %86 = vector.shape_cast %85 : vector<2x1x32xf32> to vector<2x32xf32>
    %87 = vector.extract_strided_slice %56 {offsets = [0, 15, 0], sizes = [2, 1, 32], strides = [1, 1, 1]} : vector<2x16x32xf32> to vector<2x1x32xf32>
    %88 = vector.shape_cast %87 : vector<2x1x32xf32> to vector<2x32xf32>
    %89 = tpu.concatenate %58, %60, %62, %64, %66, %68, %70, %72, %74, %76, %78, %80, %82, %84, %86, %88 in 1 : vector<2x32xf32>, vector<2x32xf32>, vector<2x32xf32>, vector<2x32xf32>, vector<2x32xf32>, vector<2x32xf32>, vector<2x32xf32>, vector<2x32xf32>, vector<2x32xf32>, vector<2x32xf32>, vector<2x32xf32>, vector<2x32xf32>, vector<2x32xf32>, vector<2x32xf32>, vector<2x32xf32>, vector<2x32xf32> -> vector<2x512xf32>
    %90 = vector.shape_cast %89 : vector<2x512xf32> to vector<2x1x512xf32>
    %91 = vector.shape_cast %90 : vector<2x1x512xf32> to vector<2x1x512xf32>
    %92 = vector.broadcast %91 : vector<2x1x512xf32> to vector<2x16x512xf32>
    %93 = vector.shape_cast %92 : vector<2x16x512xf32> to vector<32x512xf32>
    %94 = arith.addf %93, %7 : vector<32x512xf32>
    %c0_13 = arith.constant 0 : index
    %c0_14 = arith.constant 0 : index
    %95 = vector.load %arg6[%c0_13, %c0_14] : memref<1x512xf32, #tpu.memory_space<vmem>>, vector<1x512xf32>
    %96 = vector.broadcast %95 : vector<1x512xf32> to vector<32x512xf32>
    %97 = arith.addf %94, %96 : vector<32x512xf32>
    %cst_15 = arith.constant 3.300000e-01 : f32
    %98 = vector.broadcast %cst_15 : f32 to vector<32x512xf32>
    %99 = arith.mulf %98, %97 : vector<32x512xf32>
    %100 = arith.maximumf %97, %99 : vector<32x512xf32>
    %101 = arith.truncf %100 : vector<32x512xf32> to vector<32x512xbf16>
    %c0_16 = arith.constant 0 : index
    %c0_17 = arith.constant 0 : index
    %102 = vector.load %arg8[%c0_16, %c0_17] : memref<512x32xbf16, #tpu.memory_space<vmem>>, vector<512x32xbf16>
    %cst_18 = arith.constant dense<0.000000e+00> : vector<32x32xf32>
    %103 = tpu.matmul %101, %102, %cst_18 {dimension_numbers = #tpu.dot_dimension_numbers<[1], [0], [0], [1], [0, 0, 1, 1], [], []>} : vector<32x512xbf16>, vector<512x32xbf16>, vector<32x32xf32> -> vector<32x32xf32>
    %c0_19 = arith.constant 0 : index
    %c0_20 = arith.constant 0 : index
    %104 = vector.load %arg7[%c0_19, %c0_20] : memref<512x512xbf16, #tpu.memory_space<vmem>>, vector<512x512xbf16>
    %cst_21 = arith.constant dense<0.000000e+00> : vector<32x512xf32>
    %105 = tpu.matmul %55, %104, %cst_21 {dimension_numbers = #tpu.dot_dimension_numbers<[1], [0], [0], [1], [0, 0, 1, 1], [], []>} : vector<32x512xbf16>, vector<512x512xbf16>, vector<32x512xf32> -> vector<32x512xf32>
    %106 = vector.shape_cast %103 : vector<32x32xf32> to vector<2x16x32xf32>
    %107 = vector.extract_strided_slice %106 {offsets = [0, 0, 0], sizes = [2, 1, 32], strides = [1, 1, 1]} : vector<2x16x32xf32> to vector<2x1x32xf32>
    %108 = vector.shape_cast %107 : vector<2x1x32xf32> to vector<2x32xf32>
    %109 = vector.extract_strided_slice %106 {offsets = [0, 1, 0], sizes = [2, 1, 32], strides = [1, 1, 1]} : vector<2x16x32xf32> to vector<2x1x32xf32>
    %110 = vector.shape_cast %109 : vector<2x1x32xf32> to vector<2x32xf32>
    %111 = vector.extract_strided_slice %106 {offsets = [0, 2, 0], sizes = [2, 1, 32], strides = [1, 1, 1]} : vector<2x16x32xf32> to vector<2x1x32xf32>
    %112 = vector.shape_cast %111 : vector<2x1x32xf32> to vector<2x32xf32>
    %113 = vector.extract_strided_slice %106 {offsets = [0, 3, 0], sizes = [2, 1, 32], strides = [1, 1, 1]} : vector<2x16x32xf32> to vector<2x1x32xf32>
    %114 = vector.shape_cast %113 : vector<2x1x32xf32> to vector<2x32xf32>
    %115 = vector.extract_strided_slice %106 {offsets = [0, 4, 0], sizes = [2, 1, 32], strides = [1, 1, 1]} : vector<2x16x32xf32> to vector<2x1x32xf32>
    %116 = vector.shape_cast %115 : vector<2x1x32xf32> to vector<2x32xf32>
    %117 = vector.extract_strided_slice %106 {offsets = [0, 5, 0], sizes = [2, 1, 32], strides = [1, 1, 1]} : vector<2x16x32xf32> to vector<2x1x32xf32>
    %118 = vector.shape_cast %117 : vector<2x1x32xf32> to vector<2x32xf32>
    %119 = vector.extract_strided_slice %106 {offsets = [0, 6, 0], sizes = [2, 1, 32], strides = [1, 1, 1]} : vector<2x16x32xf32> to vector<2x1x32xf32>
    %120 = vector.shape_cast %119 : vector<2x1x32xf32> to vector<2x32xf32>
    %121 = vector.extract_strided_slice %106 {offsets = [0, 7, 0], sizes = [2, 1, 32], strides = [1, 1, 1]} : vector<2x16x32xf32> to vector<2x1x32xf32>
    %122 = vector.shape_cast %121 : vector<2x1x32xf32> to vector<2x32xf32>
    %123 = vector.extract_strided_slice %106 {offsets = [0, 8, 0], sizes = [2, 1, 32], strides = [1, 1, 1]} : vector<2x16x32xf32> to vector<2x1x32xf32>
    %124 = vector.shape_cast %123 : vector<2x1x32xf32> to vector<2x32xf32>
    %125 = vector.extract_strided_slice %106 {offsets = [0, 9, 0], sizes = [2, 1, 32], strides = [1, 1, 1]} : vector<2x16x32xf32> to vector<2x1x32xf32>
    %126 = vector.shape_cast %125 : vector<2x1x32xf32> to vector<2x32xf32>
    %127 = vector.extract_strided_slice %106 {offsets = [0, 10, 0], sizes = [2, 1, 32], strides = [1, 1, 1]} : vector<2x16x32xf32> to vector<2x1x32xf32>
    %128 = vector.shape_cast %127 : vector<2x1x32xf32> to vector<2x32xf32>
    %129 = vector.extract_strided_slice %106 {offsets = [0, 11, 0], sizes = [2, 1, 32], strides = [1, 1, 1]} : vector<2x16x32xf32> to vector<2x1x32xf32>
    %130 = vector.shape_cast %129 : vector<2x1x32xf32> to vector<2x32xf32>
    %131 = vector.extract_strided_slice %106 {offsets = [0, 12, 0], sizes = [2, 1, 32], strides = [1, 1, 1]} : vector<2x16x32xf32> to vector<2x1x32xf32>
    %132 = vector.shape_cast %131 : vector<2x1x32xf32> to vector<2x32xf32>
    %133 = vector.extract_strided_slice %106 {offsets = [0, 13, 0], sizes = [2, 1, 32], strides = [1, 1, 1]} : vector<2x16x32xf32> to vector<2x1x32xf32>
    %134 = vector.shape_cast %133 : vector<2x1x32xf32> to vector<2x32xf32>
    %135 = vector.extract_strided_slice %106 {offsets = [0, 14, 0], sizes = [2, 1, 32], strides = [1, 1, 1]} : vector<2x16x32xf32> to vector<2x1x32xf32>
    %136 = vector.shape_cast %135 : vector<2x1x32xf32> to vector<2x32xf32>
    %137 = vector.extract_strided_slice %106 {offsets = [0, 15, 0], sizes = [2, 1, 32], strides = [1, 1, 1]} : vector<2x16x32xf32> to vector<2x1x32xf32>
    %138 = vector.shape_cast %137 : vector<2x1x32xf32> to vector<2x32xf32>
    %139 = tpu.concatenate %108, %110, %112, %114, %116, %118, %120, %122, %124, %126, %128, %130, %132, %134, %136, %138 in 1 : vector<2x32xf32>, vector<2x32xf32>, vector<2x32xf32>, vector<2x32xf32>, vector<2x32xf32>, vector<2x32xf32>, vector<2x32xf32>, vector<2x32xf32>, vector<2x32xf32>, vector<2x32xf32>, vector<2x32xf32>, vector<2x32xf32>, vector<2x32xf32>, vector<2x32xf32>, vector<2x32xf32>, vector<2x32xf32> -> vector<2x512xf32>
    %140 = vector.shape_cast %139 : vector<2x512xf32> to vector<2x1x512xf32>
    %141 = vector.shape_cast %140 : vector<2x1x512xf32> to vector<2x1x512xf32>
    %142 = vector.broadcast %141 : vector<2x1x512xf32> to vector<2x16x512xf32>
    %143 = vector.shape_cast %142 : vector<2x16x512xf32> to vector<32x512xf32>
    %144 = arith.addf %105, %143 : vector<32x512xf32>
    %c0_22 = arith.constant 0 : index
    %c0_23 = arith.constant 0 : index
    %145 = vector.load %arg9[%c0_22, %c0_23] : memref<1x512xf32, #tpu.memory_space<vmem>>, vector<1x512xf32>
    %146 = vector.broadcast %145 : vector<1x512xf32> to vector<32x512xf32>
    %147 = arith.addf %144, %146 : vector<32x512xf32>
    %cst_24 = arith.constant 3.300000e-01 : f32
    %148 = vector.broadcast %cst_24 : f32 to vector<32x512xf32>
    %149 = arith.mulf %148, %147 : vector<32x512xf32>
    %150 = arith.maximumf %147, %149 : vector<32x512xf32>
    %c0_25 = arith.constant 0 : index
    %c0_26 = arith.constant 0 : index
    %151 = vector.load %arg10[%c0_25, %c0_26] : memref<1x512xf32, #tpu.memory_space<vmem>>, vector<1x512xf32>
    %152 = vector.broadcast %151 : vector<1x512xf32> to vector<32x512xf32>
    %153 = arith.mulf %150, %152 : vector<32x512xf32>
    %154 = vector.shape_cast %153 : vector<32x512xf32> to vector<2x16x512xf32>
    %cst_27 = arith.constant dense<0.000000e+00> : vector<2x16xf32>
    %155 = vector.multi_reduction <add>, %154, %cst_27 [2] : vector<2x16x512xf32> to vector<2x16xf32>
    %c0_28 = arith.constant 0 : index
    %c0_29 = arith.constant 0 : index
    %156 = vector.load %arg11[%c0_28, %c0_29] : memref<1x1xf32, #tpu.memory_space<vmem>>, vector<1x1xf32>
    %157 = vector.broadcast %156 : vector<1x1xf32> to vector<2x16xf32>
    %158 = arith.addf %155, %157 : vector<2x16xf32>
    %cst_30 = arith.constant 3.300000e-01 : f32
    %159 = vector.broadcast %cst_30 : f32 to vector<2x16xf32>
    %160 = arith.mulf %159, %158 : vector<2x16xf32>
    %161 = arith.maximumf %158, %160 : vector<2x16xf32>
    %c0_31 = arith.constant 0 : index
    %c0_32 = arith.constant 0 : index
    %162 = vector.load %arg12[%c0_31, %c0_32] : memref<16x32xf32, #tpu.memory_space<vmem>>, vector<16x32xf32>
    %cst_33 = arith.constant dense<0.000000e+00> : vector<2x32xf32>
    %163 = tpu.matmul %161, %162, %cst_33 {dimension_numbers = #tpu.dot_dimension_numbers<[1], [0], [0], [1], [0, 0, 1, 1], [], []>} : vector<2x16xf32>, vector<16x32xf32>, vector<2x32xf32> -> vector<2x32xf32>
    %c0_34 = arith.constant 0 : index
    %c0_35 = arith.constant 0 : index
    %164 = vector.load %arg13[%c0_34, %c0_35] : memref<1x32xf32, #tpu.memory_space<vmem>>, vector<1x32xf32>
    %165 = vector.broadcast %164 : vector<1x32xf32> to vector<2x32xf32>
    %166 = arith.addf %163, %165 : vector<2x32xf32>
    %cst_36 = arith.constant 3.300000e-01 : f32
    %167 = vector.broadcast %cst_36 : f32 to vector<2x32xf32>
    %168 = arith.mulf %167, %166 : vector<2x32xf32>
    %169 = arith.maximumf %166, %168 : vector<2x32xf32>
    %c0_37 = arith.constant 0 : index
    %c0_38 = arith.constant 0 : index
    %170 = vector.load %arg14[%c0_37, %c0_38] : memref<32x128xf32, #tpu.memory_space<vmem>>, vector<32x128xf32>
    %cst_39 = arith.constant dense<0.000000e+00> : vector<2x128xf32>
    %171 = tpu.matmul %169, %170, %cst_39 {dimension_numbers = #tpu.dot_dimension_numbers<[1], [0], [0], [1], [0, 0, 1, 1], [], []>} : vector<2x32xf32>, vector<32x128xf32>, vector<2x128xf32> -> vector<2x128xf32>
    %c0_40 = arith.constant 0 : index
    %c0_41 = arith.constant 0 : index
    %172 = vector.load %arg15[%c0_40, %c0_41] : memref<1x128xf32, #tpu.memory_space<vmem>>, vector<1x128xf32>
    %173 = vector.broadcast %172 : vector<1x128xf32> to vector<2x128xf32>
    %174 = arith.addf %171, %173 : vector<2x128xf32>
    %cst_42 = arith.constant 3.300000e-01 : f32
    %175 = vector.broadcast %cst_42 : f32 to vector<2x128xf32>
    %176 = arith.mulf %175, %174 : vector<2x128xf32>
    %177 = arith.maximumf %174, %176 : vector<2x128xf32>
    %c0_43 = arith.constant 0 : index
    %c0_44 = arith.constant 0 : index
    %178 = vector.load %arg16[%c0_43, %c0_44] : memref<128x30xf32, #tpu.memory_space<vmem>>, vector<128x30xf32>
    %cst_45 = arith.constant dense<0.000000e+00> : vector<2x30xf32>
    %179 = tpu.matmul %177, %178, %cst_45 {dimension_numbers = #tpu.dot_dimension_numbers<[1], [0], [0], [1], [0, 0, 1, 1], [], []>} : vector<2x128xf32>, vector<128x30xf32>, vector<2x30xf32> -> vector<2x30xf32>
    %c0_46 = arith.constant 0 : index
    %c0_47 = arith.constant 0 : index
    %180 = vector.load %arg17[%c0_46, %c0_47] : memref<1x30xf32, #tpu.memory_space<vmem>>, vector<1x30xf32>
    %181 = vector.broadcast %180 : vector<1x30xf32> to vector<2x30xf32>
    %182 = arith.addf %179, %181 : vector<2x30xf32>
    %cst_48 = arith.constant 3.300000e-01 : f32
    %183 = vector.broadcast %cst_48 : f32 to vector<2x30xf32>
    %184 = arith.mulf %183, %182 : vector<2x30xf32>
    %185 = arith.maximumf %182, %184 : vector<2x30xf32>
    %c0_49 = arith.constant 0 : index
    %c0_50 = arith.constant 0 : index
    %186 = vector.load %arg18[%c0_49, %c0_50] : memref<30x4xf32, #tpu.memory_space<vmem>>, vector<30x4xf32>
    %cst_51 = arith.constant dense<0.000000e+00> : vector<2x4xf32>
    %187 = tpu.matmul %185, %186, %cst_51 {dimension_numbers = #tpu.dot_dimension_numbers<[1], [0], [0], [1], [0, 0, 1, 1], [], []>} : vector<2x30xf32>, vector<30x4xf32>, vector<2x4xf32> -> vector<2x4xf32>
    %c0_52 = arith.constant 0 : index
    %c0_53 = arith.constant 0 : index
    %188 = vector.load %arg19[%c0_52, %c0_53] : memref<1x4xf32, #tpu.memory_space<vmem>>, vector<1x4xf32>
    %189 = vector.broadcast %188 : vector<1x4xf32> to vector<2x4xf32>
    %190 = arith.addf %187, %189 : vector<2x4xf32>
    %cst_54 = arith.constant 3.300000e-01 : f32
    %191 = vector.broadcast %cst_54 : f32 to vector<2x4xf32>
    %192 = arith.mulf %191, %190 : vector<2x4xf32>
    %193 = arith.maximumf %190, %192 : vector<2x4xf32>
    %c0_55 = arith.constant 0 : index
    %c0_56 = arith.constant 0 : index
    %194 = vector.load %arg20[%c0_55, %c0_56] : memref<2x4xf32, #tpu.memory_space<vmem>>, vector<2x4xf32>
    tpu.vector_store %arg20[%c0_55, %c0_56], %193 {strides = array<i32>} : memref<2x4xf32, #tpu.memory_space<vmem>>, vector<2x4xf32>,
    return
  }
  func.func @transform_0(%arg0: i32) -> (i32, i32, i32) {
    %c0_i32 = arith.constant 0 : i32
    %c0_i32_0 = arith.constant 0 : i32
    %c0_i32_1 = arith.constant 0 : i32
    return %arg0, %c0_i32, %c0_i32_0 : i32, i32, i32
  }
  func.func @transform_1(%arg0: i32) -> (i32, i32, i32) {
    %c0_i32 = arith.constant 0 : i32
    %c0_i32_0 = arith.constant 0 : i32
    %c0_i32_1 = arith.constant 0 : i32
    return %arg0, %c0_i32, %c0_i32_0 : i32, i32, i32
  }
  func.func @transform_2(%arg0: i32) -> (i32, i32) {
    %c0_i32 = arith.constant 0 : i32
    %c0_i32_0 = arith.constant 0 : i32
    %c0_i32_1 = arith.constant 0 : i32
    return %c0_i32, %c0_i32_0 : i32, i32
  }
  func.func @transform_3(%arg0: i32) -> (i32, i32) {
    %c0_i32 = arith.constant 0 : i32
    %c0_i32_0 = arith.constant 0 : i32
    %c0_i32_1 = arith.constant 0 : i32
    return %c0_i32, %c0_i32_0 : i32, i32
  }
  func.func @transform_4(%arg0: i32) -> (i32, i32) {
    %c0_i32 = arith.constant 0 : i32
    %c0_i32_0 = arith.constant 0 : i32
    %c0_i32_1 = arith.constant 0 : i32
    return %c0_i32, %c0_i32_0 : i32, i32
  }
  func.func @transform_5(%arg0: i32) -> (i32, i32) {
    %c0_i32 = arith.constant 0 : i32
    %c0_i32_0 = arith.constant 0 : i32
    %c0_i32_1 = arith.constant 0 : i32
    return %c0_i32, %c0_i32_0 : i32, i32
  }
  func.func @transform_6(%arg0: i32) -> (i32, i32) {
    %c0_i32 = arith.constant 0 : i32
    %c0_i32_0 = arith.constant 0 : i32
    %c0_i32_1 = arith.constant 0 : i32
    return %c0_i32, %c0_i32_0 : i32, i32
  }
  func.func @transform_7(%arg0: i32) -> (i32, i32) {
    %c0_i32 = arith.constant 0 : i32
    %c0_i32_0 = arith.constant 0 : i32
    %c0_i32_1 = arith.constant 0 : i32
    return %c0_i32, %c0_i32_0 : i32, i32
  }
  func.func @transform_8(%arg0: i32) -> (i32, i32) {
    %c0_i32 = arith.constant 0 : i32
    %c0_i32_0 = arith.constant 0 : i32
    %c0_i32_1 = arith.constant 0 : i32
    return %c0_i32, %c0_i32_0 : i32, i32
  }
  func.func @transform_9(%arg0: i32) -> (i32, i32) {
    %c0_i32 = arith.constant 0 : i32
    %c0_i32_0 = arith.constant 0 : i32
    %c0_i32_1 = arith.constant 0 : i32
    return %c0_i32, %c0_i32_0 : i32, i32
  }
  func.func @transform_10(%arg0: i32) -> (i32, i32) {
    %c0_i32 = arith.constant 0 : i32
    %c0_i32_0 = arith.constant 0 : i32
    %c0_i32_1 = arith.constant 0 : i32
    return %c0_i32, %c0_i32_0 : i32, i32
  }
  func.func @transform_11(%arg0: i32) -> (i32, i32) {
    %c0_i32 = arith.constant 0 : i32
    %c0_i32_0 = arith.constant 0 : i32
    %c0_i32_1 = arith.constant 0 : i32
    return %c0_i32, %c0_i32_0 : i32, i32
  }
  func.func @transform_12(%arg0: i32) -> (i32, i32) {
    %c0_i32 = arith.constant 0 : i32
    %c0_i32_0 = arith.constant 0 : i32
    %c0_i32_1 = arith.constant 0 : i32
    return %c0_i32, %c0_i32_0 : i32, i32
  }
  func.func @transform_13(%arg0: i32) -> (i32, i32) {
    %c0_i32 = arith.constant 0 : i32
    %c0_i32_0 = arith.constant 0 : i32
    %c0_i32_1 = arith.constant 0 : i32
    return %c0_i32, %c0_i32_0 : i32, i32
  }
  func.func @transform_14(%arg0: i32) -> (i32, i32) {
    %c0_i32 = arith.constant 0 : i32
    %c0_i32_0 = arith.constant 0 : i32
    %c0_i32_1 = arith.constant 0 : i32
    return %c0_i32, %c0_i32_0 : i32, i32
  }
  func.func @transform_15(%arg0: i32) -> (i32, i32) {
    %c0_i32 = arith.constant 0 : i32
    %c0_i32_0 = arith.constant 0 : i32
    %c0_i32_1 = arith.constant 0 : i32
    return %c0_i32, %c0_i32_0 : i32, i32
  }
  func.func @transform_16(%arg0: i32) -> (i32, i32) {
    %c0_i32 = arith.constant 0 : i32
    %c0_i32_0 = arith.constant 0 : i32
    %c0_i32_1 = arith.constant 0 : i32
    return %c0_i32, %c0_i32_0 : i32, i32
  }
  func.func @transform_17(%arg0: i32) -> (i32, i32) {
    %c0_i32 = arith.constant 0 : i32
    %c0_i32_0 = arith.constant 0 : i32
    %c0_i32_1 = arith.constant 0 : i32
    return %c0_i32, %c0_i32_0 : i32, i32
  }
  func.func @transform_18(%arg0: i32) -> (i32, i32) {
    %c0_i32 = arith.constant 0 : i32
    %c0_i32_0 = arith.constant 0 : i32
    %c0_i32_1 = arith.constant 0 : i32
    return %c0_i32, %c0_i32_0 : i32, i32
  }
  func.func @transform_19(%arg0: i32) -> (i32, i32) {
    %c0_i32 = arith.constant 0 : i32
    %c0_i32_0 = arith.constant 0 : i32
    return %arg0, %c0_i32 : i32, i32
  }
}

</mosaic_0001>

<bundles_post_ra>
// kernel: _lambda_.1
= control target key start
LH: loop header
LB: loop body
LE: loop exit
PB: predicated region body
PF: predicated region fallthrough
CT: control target
= control target key end

     0   :  { %s4851_s0 = inlined_call_operand.vmem [shape: bf16[2,16,16], index: 0, kind: input, shape index: {}]   ;;  %s4852_s1 = inlined_call_operand.vmem [shape: bf16[2,16,16], index: 1, kind: input, shape index: {}]   ;;  %s4853_s2 = inlined_call_operand.vmem [shape: bf16[16,512], index: 2, kind: input, shape index: {}]   ;;  %s4854_s3 = inlined_call_operand.vmem [shape: bf16[16,512], index: 3, kind: input, shape index: {}]   ;;  %s4855_s4 = inlined_call_operand.vmem [shape: f32[1,512], index: 4, kind: input, shape index: {}]   ;;  %s4856_s5 = inlined_call_operand.vmem [shape: f32[1,512], index: 5, kind: input, shape index: {}]   ;;  %s4857_s6 = inlined_call_operand.hbm [shape: bf16[512,512], index: 6, kind: input, shape index: {}]   ;;  %s4858_s7 = inlined_call_operand.vmem [shape: bf16[512,32], index: 7, kind: input, shape index: {}]   ;;  %s4859_s8 = inlined_call_operand.vmem [shape: f32[1,512], index: 8, kind: input, shape index: {}]   ;;  %s4860_s9 = inlined_call_operand.vmem [shape: f32[1,512], index: 9, kind: input, shape index: {}]   ;;  %s4861_s10 = inlined_call_operand.<no memory space> [shape: f32[1,1], index: 10, kind: input, shape index: {}]   ;;  %s4862_s11 = inlined_call_operand.vmem [shape: f32[16,32], index: 11, kind: input, shape index: {}]   ;;  %s4863_s12 = inlined_call_operand.vmem [shape: f32[1,32], index: 12, kind: input, shape index: {}]   ;;  %s4864_s13 = inlined_call_operand.vmem [shape: f32[32,128], index: 13, kind: input, shape index: {}]   ;;  %s4865_s14 = inlined_call_operand.vmem [shape: f32[1,128], index: 14, kind: input, shape index: {}]   ;;  %s4866_s15 = inlined_call_operand.vmem [shape: f32[128,30], index: 15, kind: input, shape index: {}]   ;;  %s4867_s16 = inlined_call_operand.vmem [shape: f32[1,30], index: 16, kind: input, shape index: {}]   ;;  %s4868_s17 = inlined_call_operand.vmem [shape: f32[30,4], index: 17, kind: input, shape index: {}]   ;;  %s4869_s18 = inlined_call_operand.vmem [shape: f32[1,4], index: 18, kind: input, shape index: {}]   ;;  %s4870_s19 = inlined_call_operand.hbm [shape: f32[2,4], index: 19, kind: output, shape index: {}]  }
   0x1   :  { %4875 = sst [smem:[#allocation21_spill]] %s4851_s0  ;;  %v24_v0 = vstv %s4861_s10 }
   0x2   :  { %4876 = sst [smem:[#allocation22_spill]] %s4852_s1  ;;  %25 = vst [vmem:[#allocation2] sm:$0x1] %v24_v0 }
   0x3   :  { %4877 = sst [smem:[#allocation23_spill]] %s4853_s2 }
   0x4   :  { %4878 = sst [smem:[#allocation24_spill]] %s4854_s3 }
   0x5   :  { %26 = vsyncpa [#allocation4], 0 }
   0x6   :  { %27 = vsyncpa [#allocation5], 0  ;;  %s44_s1 = sshll.u32 %s4857_s6, 4  ;;  %s3536_s22 = smov [#allocation3]   ;;  %s45_s1 = int_to_ptr.hbm [resolvable:$true] %s44_s1 }
   0x7   :  { %s46_s2 = sshll.u32 %s3536_s22, 4  ;;  %s3537_s23 = smov 256   ;;  %s47_s2 = int_to_ptr.vmem [resolvable:$true] %s46_s2 }
   0x8   :  { %s3538_s24 = smov 16  }
   0x9   :  { %52 = dma.hbm_to_vmem [thread:$0]  %s45_s1, 16384, %s47_s2, [#allocation4], %s3537_s23, %s3537_s23, %s3538_s24  }
   0xa   :  { %3532 = dma.done.wait [#allocation4], 16384  }
   0xb   :  { %3533 = vsyncadd [#allocation4], 4294950912  ;;  %s4879_s26 = sld [smem:[#allocation23_spill]]  ;;  %vm124_vm0 = vcmask 130048   ;;  %vm326_vm1 = vcmask 1041409   ;;  %s3540_s22 = smov 64  }
   0xc   :  { %s4880_s29 = sld [smem:[#allocation24_spill]]  ;;  %s3541_s2 = smov 96   ;;  %vm412_vm2 = vcmask 261120   ;;  %vm414_vm3 = vcmask 523264   ;;  %vm416_vm4 = vcmask 785408   ;;  %vm436_vm5 = vcmask 1042434  }
   0xd   :  { %s4881_s1 = sld [smem:[#allocation21_spill]]  ;;  %vm441_vm6 = vcmask 1043459   ;;  %vm434_vm7 = vcmask 1040384   ;;  %vm438_vm8 = vcmask 1041408   ;;  %vm443_vm9 = vcmask 1042433  }
   0xe   :  { %s4882_s28 = sld [smem:[#allocation22_spill]]  ;;  %vm2428_vm10 = vcmask 130112   ;;  %vm2545_vm11 = vcmask 1045504   ;;  %vm2541_vm12 = vcmask 244736   ;;  %vm2571_vm13 = vcmask 25600  }
  0x11   :  { %v2600_v1 = vld [vmem:[%s4879_s26] sm:$0xf]  ;;  %v3304_v2 = vld [vmem:[%s4879_s26 + $0xc] sm:$0xf0]  ;;  %v2608_v9 = vld [vmem:[%s4879_s26 + $0x8] sm:$0xf] }
  0x12   :  { %v2601_v3 = vor.u32 %v3304_v2, %v2600_v1  ;;  %v2632_v4 = vld [vmem:[%s4880_s29] sm:$0xf]  ;;  %v3308_v5 = vld [vmem:[%s4880_s29 + $0xc] sm:$0xf0]  ;;  %v3305_v10 = vld [vmem:[%s4879_s26 + $0x14] sm:$0xf0] }
  0x13   :  { %v3298_v6 = vld [vmem:[%s4881_s1] sm:$0xff]  ;;  %v2633_v7 = vor.u32 %v3308_v5, %v2632_v4  ;;  %v3299_v8 = vld [vmem:[%s4881_s1 + $0x8] sm:$0xff]  ;;  %v2609_v12 = vor.u32 %v3305_v10, %v2608_v9  ;;  %v2610_v13 = vld [vmem:[%s4879_s26 + $0x18] sm:$0xf0] }
  0x14   :  { %138 = vmatpush.bf16.msra.mxu0 %v2601_v3  ;;  %v3303_v11 = vld [vmem:[%s4879_s26 + $0xc] sm:$0xf]  ;;  %v3302_v14 = vld [vmem:[%s4879_s26 + $0x4] sm:$0xf]  ;;  %v2602_v15 = vld [vmem:[%s4879_s26 + $0x10] sm:$0xf0] }
  0x15   :  { %v2613_v16 = vor.u32 %v3303_v11, %v2610_v13  ;;  %v2605_v17 = vor.u32 %v3302_v14, %v2602_v15  ;;  %v2640_v18 = vld [vmem:[%s4880_s29 + $0x8] sm:$0xf]  ;;  %v3309_v19 = vld [vmem:[%s4880_s29 + $0x14] sm:$0xf0]  ;;  %v3307_v20 = vld [vmem:[%s4880_s29 + $0xc] sm:$0xf]  ;;  %176 = vmatpush.bf16.msra.mxu2 %v2609_v12 }
  0x16   :  { %v2641_v21 = vor.u32 %v3309_v19, %v2640_v18  ;;  %v2642_v22 = vld [vmem:[%s4880_s29 + $0x18] sm:$0xf0]  ;;  %v3300_v24 = vld [vmem:[%s4882_s28] sm:$0xff]  ;;  %v3301_v25 = vld [vmem:[%s4882_s28 + $0x8] sm:$0xff] }
  0x17   :  { %2614 = vmatmul.msk.bf16.vlgmr.msra.gmra.mxu0 %vm124_vm0, %v3298_v6  ;;  %195 = vmatpush.bf16.msra.mxu3 %v2613_v16  ;;  %v2645_v23 = vor.u32 %v3307_v20, %v2642_v22  ;;  %v3306_v26 = vld [vmem:[%s4880_s29 + $0x4] sm:$0xf]  ;;  %v2634_v27 = vld [vmem:[%s4880_s29 + $0x10] sm:$0xf0]  ;;  %s3539_s29 = smov 32  }
  0x18   :  { %254 = vmatpush.bf16.msrb.mxu0 %v2633_v7  ;;  %157 = vmatpush.bf16.msra.mxu1 %v2605_v17  ;;  %v2637_v28 = vor.u32 %v3306_v26, %v2634_v27 }
  0x19   :  { %292 = vmatpush.bf16.msrb.mxu2 %v2641_v21 }
  0x1a   :  { %2618 = vmatmul.msk.bf16.vlgmr.msra.gmra.mxu2 %vm124_vm0, %v3298_v6  ;;  %2620 = vmatmul.msk.bf16.vlgmr.msra.gmra.mxu3 %vm124_vm0, %v3298_v6 }
  0x1b   :  { %311 = vmatpush.bf16.msrb.mxu3 %v2645_v23  ;;  %2616 = vmatmul.msk.bf16.vlgmr.msra.gmra.mxu1 %vm124_vm0, %v3298_v6 }
  0x1c   :  { %273 = vmatpush.bf16.msrb.mxu1 %v2637_v28 }
  0x27   :  { %2615 = vmatmul.msk.bf16.gmra.mxu0 %vm124_vm0, %v3299_v8 }
  0x2a   :  { %2619 = vmatmul.msk.bf16.gmra.mxu2 %vm124_vm0, %v3299_v8  ;;  %2621 = vmatmul.msk.bf16.gmra.mxu3 %vm124_vm0, %v3299_v8 }
  0x2b   :  { %2617 = vmatmul.msk.bf16.gmra.mxu1 %vm124_vm0, %v3299_v8 }
  0x37   :  { %2646 = vmatmul.msk.bf16.vlgmr.msrb.gmra.mxu0 %vm124_vm0, %v3300_v24 }
  0x3a   :  { %2650 = vmatmul.msk.bf16.vlgmr.msrb.gmra.mxu2 %vm124_vm0, %v3300_v24  ;;  %2652 = vmatmul.msk.bf16.vlgmr.msrb.gmra.mxu3 %vm124_vm0, %v3300_v24 }
  0x3b   :  { %2648 = vmatmul.msk.bf16.vlgmr.msrb.gmra.mxu1 %vm124_vm0, %v3300_v24 }
  0x47   :  { %2647 = vmatmul.msk.bf16.gmra.mxu0 %vm124_vm0, %v3301_v25 }
  0x4a   :  { %2651 = vmatmul.msk.bf16.gmra.mxu2 %vm124_vm0, %v3301_v25  ;;  %2653 = vmatmul.msk.bf16.gmra.mxu3 %vm124_vm0, %v3301_v25 }
  0x4b   :  { %2649 = vmatmul.msk.bf16.gmra.mxu1 %vm124_vm0, %v3301_v25 }
  0x94   :  { %v3726_v29 = vpop.f32.mrf.mxu0 }
  0x95   :  { %v549_v31 = vrot.slane %v3726_v29, 1  ;;  %v576_v34 = vrot.slane %v3726_v29, 6  ;;  %v570_v38 = vrot.slane %v3726_v29, 5  ;;  %v582_v42 = vrot.slane %v3726_v29, 7 }
  0x96   :  { %v554_v62 = vrot.slane %v3726_v29, 2  ;;  %v560_v7 = vrot.slane %v3726_v29, 3 }
  0x9c   :  { %v3728_v30 = vpop.f32.mrf.mxu0 }
  0x9d   :  { %v598_v43 = vrot.slane %v3728_v30, 2  ;;  %v593_v47 = vrot.slane %v3728_v30, 1  ;;  %v614_v52 = vrot.slane %v3728_v30, 5  ;;  %v620_v53 = vrot.slane %v3728_v30, 6 }
  0x9e   :  { %v626_v57 = vrot.slane %v3728_v30, 7  ;;  %v604_v63 = vrot.slane %v3728_v30, 3 }
  0xa4   :  { %v3731_v32 = vpop.f32.mrf.mxu0 }
  0xa5   :  { %v550_v33 = vsel %vm326_vm1, %v3731_v32, %v549_v31  ;;  %v577_v35 = vrot.slane %v3731_v32, 5  ;;  %v571_v37 = vrot.slane %v3731_v32, 4  ;;  %v583_v39 = vrot.slane %v3731_v32, 6 }
  0xa6   :  { %551 = vrot.lane.b32.xlu0 %v550_v33, %s3539_s29  ;;  %v555_v58 = vrot.slane %v3731_v32, 1  ;;  %v561_v3 = vrot.slane %v3731_v32, 2 }
  0xa7   :  { %v578_v36 = vsel %vm326_vm1, %v577_v35, %v576_v34  ;;  %v572_v41 = vsel %vm326_vm1, %v571_v37, %v570_v38  ;;  %v584_v45 = vsel %vm326_vm1, %v583_v39, %v582_v42 }
  0xa8   :  { %579 = vrot.lane.b32.xlu1 %v578_v36, %s3540_s22  ;;  %v556_v0 = vsel %vm326_vm1, %v555_v58, %v554_v62  ;;  %v562_v9 = vsel %vm326_vm1, %v561_v3, %v560_v7  ;;  %v3332_v58 = vld [vmem:[%s4858_s7 + $0xb0] sm:$0xff]  ;;  %v3323_v3 = vld [vmem:[%s4858_s7 + $0x68] sm:$0xff]  ;;  %v3314_v7 = vld [vmem:[%s4858_s7 + $0x20] sm:$0xff] }
  0xa9   :  { %v3340_v62 = vld [vmem:[%s4858_s7 + $0xf0] sm:$0xff] }
  0xac   :  { %v3743_v40 = vpop.f32.mrf.mxu0 }
  0xad   :  { %v599_v44 = vrot.slane %v3743_v40, 1  ;;  %v615_v48 = vrot.slane %v3743_v40, 4  ;;  %v621_v49 = vrot.slane %v3743_v40, 5  ;;  %v594_v51 = vsel %vm326_vm1, %v3743_v40, %v593_v47  ;;  %v3842_v47 = vpop.f32.mrf.mxu3 }
  0xae   :  { %573 = vrot.lane.b32.xlu0 %v572_v41, %s3539_s29  ;;  %v627_v56 = vrot.slane %v3743_v40, 6  ;;  %v605_v59 = vrot.slane %v3743_v40, 2 }
  0xaf   :  { %v600_v46 = vsel %vm326_vm1, %v599_v44, %v598_v43  ;;  %v616_v54 = vsel %vm326_vm1, %v615_v48, %v614_v52  ;;  %v622_v55 = vsel %vm326_vm1, %v621_v49, %v620_v53  ;;  %v3333_v52 = vld [vmem:[%s4858_s7 + $0xb8] sm:$0xff] }
  0xb0   :  { %585 = vrot.lane.b32.xlu1 %v584_v45, %s3541_s2  ;;  %601 = vrot.lane.b32.xlu2 %v600_v46, %s3540_s22  ;;  %v628_v61 = vsel %vm326_vm1, %v627_v56, %v626_v57  ;;  %v606_v1 = vsel %vm326_vm1, %v605_v59, %v604_v63  ;;  %v3838_v45 = vpop.f32.mrf.mxu1  ;;  %v3840_v46 = vpop.f32.mrf.mxu2  ;;  %v3317_v53 = vld [vmem:[%s4858_s7 + $0x38] sm:$0xff]  ;;  %v3316_v59 = vld [vmem:[%s4858_s7 + $0x30] sm:$0xff] }
  0xb1   :  { %1050 = vmatpush.bf16.msra.mxu2 %v3333_v52  ;;  %1012 = vmatpush.bf16.msra.mxu0 %v3317_v53 }
  0xb4   :  { %v3757_v50 = vpop.f32.mrf.mxu0 }
  0xb5   :  { %v329_v2 = vrot.slane %v3757_v50, 1  ;;  %v362_v4 = vrot.slane %v3757_v50, 7  ;;  %v350_v11 = vrot.slane %v3757_v50, 5  ;;  %v356_v20 = vrot.slane %v3757_v50, 6  ;;  %1051 = vmatpush.bf16.msra.mxu2 %v3332_v58  ;;  %1013 = vmatpush.bf16.msra.mxu0 %v3316_v59 }
  0xb6   :  { %595 = vrot.lane.b32.xlu0 %v594_v51, %s3539_s29  ;;  %v334_v36 = vrot.slane %v3757_v50, 2  ;;  %v340_v42 = vrot.slane %v3757_v50, 3  ;;  %v3848_v51 = vpop.f32.mrf.mxu3 }
  0xb8   :  { %617 = vrot.lane.b32.xlu1 %v616_v54, %s3539_s29  ;;  %623 = vrot.lane.b32.xlu2 %v622_v55, %s3540_s22  ;;  %v3844_v48 = vpop.f32.mrf.mxu1  ;;  %v3846_v49 = vpop.f32.mrf.mxu2  ;;  %v3325_v54 = vld [vmem:[%s4858_s7 + $0x78] sm:$0xff] }
  0xb9   :  { %v3341_v55 = vld [vmem:[%s4858_s7 + $0xf8] sm:$0xff]  ;;  %1031 = vmatpush.bf16.msra.mxu1 %v3325_v54 }
  0xba   :  { %1069 = vmatpush.bf16.msra.mxu3 %v3341_v55  ;;  %v590_v55 = vrot.slane %v3743_v40, 7 }
  0xbc   :  { %v3772_v60 = vpop.f32.mrf.mxu0 }
  0xbd   :  { %v373_v13 = vrot.slane %v3772_v60, 1  ;;  %v394_v15 = vrot.slane %v3772_v60, 5  ;;  %v400_v22 = vrot.slane %v3772_v60, 6  ;;  %v378_v24 = vrot.slane %v3772_v60, 2 }
  0xbe   :  { %629 = vrot.lane.b32.xlu0 %v628_v61, %s3541_s2  ;;  %v406_v31 = vrot.slane %v3772_v60, 7  ;;  %v384_v34 = vrot.slane %v3772_v60, 3  ;;  %v3324_v61 = vld [vmem:[%s4858_s7 + $0x70] sm:$0xff]  ;;  %v3878_v63 = vpop.f32.mrf.mxu3  ;;  %1070 = vmatpush.bf16.msra.mxu3 %v3340_v62  ;;  %v546_v62 = vrot.slane %v3731_v32, 7 }
  0xbf   :  { %1032 = vmatpush.bf16.msra.mxu1 %v3324_v61 }
  0xc0   :  { %557 = vrot.lane.b32.xlu1 %v556_v0, %s3540_s22  ;;  %607 = vrot.lane.b32.xlu2 %v606_v1, %s3541_s2  ;;  %v3862_v56 = vpop.f32.mrf.mxu1  ;;  %v3864_v57 = vpop.f32.mrf.mxu2  ;;  %v3331_v1 = vld [vmem:[%s4858_s7 + $0xa8] sm:$0xff] }
  0xc1   :  { %1052 = vmatpush.bf16.msra.mxu2 %v3331_v1 }
  0xc3   :  { %1033 = vmatpush.bf16.msra.mxu1 %v3323_v3  ;;  %v591_v3 = vsel %vm326_vm1, %v590_v55, %v3728_v30 }
  0xc4   :  { %v3785_v5 = vpop.f32.mrf.mxu0 }
  0xc5   :  { %v330_v6 = vsel %vm326_vm1, %v3785_v5, %v329_v2  ;;  %v363_v8 = vrot.slane %v3785_v5, 6  ;;  %v351_v12 = vrot.slane %v3785_v5, 4  ;;  %v357_v21 = vrot.slane %v3785_v5, 5  ;;  %v3315_v2 = vld [vmem:[%s4858_s7 + $0x28] sm:$0xff] }
  0xc6   :  { %331 = vrot.lane.b32.xlu0 %v330_v6, %s3539_s29  ;;  %v335_v37 = vrot.slane %v3785_v5, 1  ;;  %v341_v43 = vrot.slane %v3785_v5, 2  ;;  %1014 = vmatpush.bf16.msra.mxu0 %v3315_v2  ;;  %v3330_v6 = vld [vmem:[%s4858_s7 + $0xa0] sm:$0xff]  ;;  %v610_v2 = vrot.slane %v3728_v30, 4 }
  0xc7   :  { %v364_v10 = vsel %vm326_vm1, %v363_v8, %v362_v4  ;;  %v352_v14 = vsel %vm326_vm1, %v351_v12, %v350_v11  ;;  %v358_v26 = vsel %vm326_vm1, %v357_v21, %v356_v20  ;;  %v3339_v4 = vld [vmem:[%s4858_s7 + $0xe8] sm:$0xff]  ;;  %v3338_v11 = vld [vmem:[%s4858_s7 + $0xe0] sm:$0xff]  ;;  %v3910_v12 = vpop.f32.mrf.mxu3  ;;  %1053 = vmatpush.bf16.msra.mxu2 %v3330_v6  ;;  %v3328_v20 = vld [vmem:[%s4858_s7 + $0x90] sm:$0xff]  ;;  %v390_v6 = vrot.slane %v3772_v60, 4 }
  0xc8   :  { %563 = vrot.lane.b32.xlu2 %v562_v9, %s3541_s2  ;;  %365 = vrot.lane.b32.xlu1 %v364_v10, %s3541_s2  ;;  %v336_v41 = vsel %vm326_vm1, %v335_v37, %v334_v36  ;;  %v342_v44 = vsel %vm326_vm1, %v341_v43, %v340_v42  ;;  %v3900_v8 = vpop.f32.mrf.mxu1  ;;  %v3902_v9 = vpop.f32.mrf.mxu2  ;;  %v3322_v10 = vld [vmem:[%s4858_s7 + $0x60] sm:$0xff]  ;;  %v3312_v21 = vld [vmem:[%s4858_s7 + $0x10] sm:$0xff]  ;;  %v567_v36 = vrot.slane %v3731_v32, 3  ;;  %v566_v37 = vrot.slane %v3726_v29, 4 }
  0xc9   :  { %1071 = vmatpush.bf16.msra.mxu3 %v3339_v4  ;;  %1034 = vmatpush.bf16.msra.mxu1 %v3322_v10  ;;  %v3318_v42 = vld [vmem:[%s4858_s7 + $0x40] sm:$0xff]  ;;  %v611_v4 = vrot.slane %v3743_v40, 3 }
  0xca   :  { %1015 = vmatpush.bf16.msra.mxu0 %v3314_v7  ;;  %v3334_v43 = vld [vmem:[%s4858_s7 + $0xc0] sm:$0xff]  ;;  %v346_v7 = vrot.slane %v3757_v50, 4 }
  0xcc   :  { %v3801_v16 = vpop.f32.mrf.mxu0 }
  0xcd   :  { %v395_v17 = vrot.slane %v3801_v16, 4  ;;  %v374_v18 = vsel %vm326_vm1, %v3801_v16, %v373_v13  ;;  %v401_v23 = vrot.slane %v3801_v16, 5  ;;  %v379_v25 = vrot.slane %v3801_v16, 1  ;;  %1072 = vmatpush.bf16.msra.mxu3 %v3338_v11 }
  0xce   :  { %353 = vrot.lane.b32.xlu0 %v352_v14, %s3539_s29  ;;  %v407_v33 = vrot.slane %v3801_v16, 6  ;;  %v385_v35 = vrot.slane %v3801_v16, 2  ;;  %v3329_v14 = vld [vmem:[%s4858_s7 + $0x98] sm:$0xff]  ;;  %v391_v11 = vrot.slane %v3801_v16, 3 }
  0xcf   :  { %v396_v19 = vsel %vm326_vm1, %v395_v17, %v394_v15  ;;  %v402_v27 = vsel %vm326_vm1, %v401_v23, %v400_v22  ;;  %v380_v28 = vsel %vm326_vm1, %v379_v25, %v378_v24  ;;  %v3313_v15 = vld [vmem:[%s4858_s7 + $0x18] sm:$0xff]  ;;  %1054 = vmatpush.bf16.msra.mxu2 %v3329_v14  ;;  %v3320_v22 = vld [vmem:[%s4858_s7 + $0x50] sm:$0xff]  ;;  %v325_v14 = vrot.slane %v3785_v5, 7 }
  0xd0   :  { %397 = vrot.lane.b32.xlu2 %v396_v19, %s3539_s29  ;;  %375 = vrot.lane.b32.xlu1 %v374_v18, %s3539_s29  ;;  %v408_v38 = vsel %vm326_vm1, %v407_v33, %v406_v31  ;;  %v386_v39 = vsel %vm326_vm1, %v385_v35, %v384_v34  ;;  %v3321_v17 = vld [vmem:[%s4858_s7 + $0x58] sm:$0xff]  ;;  %v3937_v23 = vpop.f32.mrf.mxu1  ;;  %v3939_v24 = vpop.f32.mrf.mxu2  ;;  %v3336_v25 = vld [vmem:[%s4858_s7 + $0xd0] sm:$0xff] }
  0xd1   :  { %v3337_v18 = vld [vmem:[%s4858_s7 + $0xd8] sm:$0xff]  ;;  %1016 = vmatpush.bf16.msra.mxu0 %v3313_v15  ;;  %1035 = vmatpush.bf16.msra.mxu1 %v3321_v17  ;;  %v3327_v31 = vld [vmem:[%s4858_s7 + $0x88] sm:$0xff]  ;;  %v347_v15 = vrot.slane %v3785_v5, 3  ;;  %v370_v17 = vrot.slane %v3801_v16, 7 }
  0xd2   :  { %1073 = vmatpush.bf16.msra.mxu3 %v3337_v18  ;;  %v3311_v33 = vld [vmem:[%s4858_s7 + $0x8] sm:$0xff] }
  0xd3   :  { %1055 = vmatpush.bf16.msra.mxu2 %v3328_v20  ;;  %v3319_v34 = vld [vmem:[%s4858_s7 + $0x48] sm:$0xff] }
  0xd4   :  { %v3335_v35 = vld [vmem:[%s4858_s7 + $0xc8] sm:$0xff] }
  0xd5   :  { %1017 = vmatpush.bf16.msra.mxu0 %v3312_v21  ;;  %1036 = vmatpush.bf16.msra.mxu1 %v3320_v22  ;;  %v2896_v22 = vld [vmem:[#allocation3 + $0xe0] sm:$0xf] }
  0xd6   :  { %359 = vrot.lane.b32.xlu0 %v358_v26, %s3540_s22  ;;  %1074 = vmatpush.bf16.msra.mxu3 %v3336_v25  ;;  %v3372_v25 = vld [vmem:[#allocation3 + $0xec] sm:$0xf0] }
  0xd7   :  { %1056 = vmatpush.bf16.msra.mxu2 %v3327_v31  ;;  %v612_v31 = vsel %vm326_vm1, %v611_v4, %v610_v2  ;;  %v3368_v2 = vld [vmem:[#allocation3 + $0xcc] sm:$0xf0] }
  0xd8   :  { %403 = vrot.lane.b32.xlu2 %v402_v27, %s3540_s22  ;;  %381 = vrot.lane.b32.xlu1 %v380_v28, %s3540_s22  ;;  %v3946_v28 = vpop.f32.mrf.mxu3  ;;  %v3979_v58 = vpop.f32.mrf.mxu1 }
  0xd9   :  { %1018 = vmatpush.bf16.msra.mxu0 %v3311_v33  ;;  %1037 = vmatpush.bf16.msra.mxu1 %v3319_v34  ;;  %v3981_v59 = vpop.f32.mrf.mxu2  ;;  %v2897_v34 = vor.u32 %v3372_v25, %v2896_v22  ;;  %v3400_v22 = vld [vmem:[#allocation3 + $0x1cc] sm:$0xf0] }
  0xda   :  { %1075 = vmatpush.bf16.msra.mxu3 %v3335_v35  ;;  %v3404_v35 = vld [vmem:[#allocation3 + $0x1ec] sm:$0xf0] }
  0xdd   :  { %1038 = vmatpush.bf16.msra.mxu1 %v3318_v42 }
  0xde   :  { %409 = vrot.lane.b32.xlu0 %v408_v38, %s3541_s2  ;;  %1076 = vmatpush.bf16.msra.mxu3 %v3334_v43  ;;  %v3280_v43 = vld [vmem:[#allocation3 + $0x3e0] sm:$0xf] }
  0xe0   :  { %387 = vrot.lane.b32.xlu2 %v386_v39, %s3541_s2  ;;  %337 = vrot.lane.b32.xlu1 %v336_v41, %s3540_s22  ;;  %v3326_v39 = vld [vmem:[%s4858_s7 + $0x80] sm:$0xff]  ;;  %v3983_v61 = vpop.f32.mrf.mxu3 }
  0xe1   :  { %v3310_v41 = vld [vmem:[%s4858_s7] sm:$0xff]  ;;  %1057 = vmatpush.bf16.msra.mxu2 %v3326_v39  ;;  %v4010_v4 = vpop.f32.mrf.mxu2 }
  0xe2   :  { %1019 = vmatpush.bf16.msra.mxu0 %v3310_v41 }
  0xe6   :  { %1986 = vmatpush.bf16.msrb.mxu0 %v2897_v34 }
  0xe8   :  { %343 = vrot.lane.b32.xlu2 %v342_v44, %s3541_s2  ;;  %v568_v44 = vsel %vm326_vm1, %v567_v36, %v566_v37  ;;  %v3152_v36 = vld [vmem:[#allocation3 + $0x2e0] sm:$0xf]  ;;  %v3436_v37 = vld [vmem:[#allocation3 + $0x2ec] sm:$0xf0] }
  0xe9   :  { %v3153_v42 = vor.u32 %v3436_v37, %v3152_v36  ;;  %v3464_v36 = vld [vmem:[#allocation3 + $0x3cc] sm:$0xf0]  ;;  %v2864_v37 = vld [vmem:[#allocation3 + $0xa0] sm:$0xf] }
  0xeb   :  { %2024 = vmatpush.bf16.msrb.mxu2 %v3153_v42 }
 0x10a   :  { %v3880_v0 = vpop.permute.xlu2 %601 }
 0x112   :  { %v3912_v13 = vpop.permute.xlu2 %623 }
 0x118   :  { %v3926_v19 = vpop.permute.xlu0 %551 }
 0x11a   :  { %v580_v26 = vpop.permute.xlu1 %579  ;;  %v3944_v27 = vpop.permute.xlu2 %607 }
 0x120   :  { %v574_v38 = vpop.permute.xlu0 %573 }
 0x121   :  { %v635_v54 = vsel %vm412_vm2, %v568_v44, %v574_v38  ;;  %v3468_v44 = vld [vmem:[#allocation3 + $0x3ec] sm:$0xf0] }
 0x122   :  { %v586_v52 = vpop.permute.xlu1 %585  ;;  %v3975_v53 = vpop.permute.xlu2 %563  ;;  %v636_v1 = vsel %vm414_vm3, %v635_v54, %v580_v26  ;;  %v3024_v26 = vld [vmem:[#allocation3 + $0x1e0] sm:$0xf]  ;;  %v3281_v55 = vor.u32 %v3468_v44, %v3280_v43  ;;  %v3364_v44 = vld [vmem:[#allocation3 + $0xac] sm:$0xf0] }
 0x123   :  { %v3998_v18 = vsel %vm416_vm4, %v636_v1, %v586_v52  ;;  %v3025_v41 = vor.u32 %v3404_v35, %v3024_v26  ;;  %v4008_v54 = vpop.f32.mrf.mxu1  ;;  %v2880_v1 = vld [vmem:[#allocation3 + $0xc0] sm:$0xf]  ;;  %v4014_v26 = vpop.f32.mrf.mxu3 }
 0x124   :  { %2043 = vmatpush.bf16.msrb.mxu3 %v3281_v55  ;;  %v3264_v35 = vld [vmem:[#allocation3 + $0x3c0] sm:$0xf]  ;;  %v3396_v55 = vld [vmem:[#allocation3 + $0x1ac] sm:$0xf0] }
 0x125   :  { %2005 = vmatpush.bf16.msrb.mxu1 %v3025_v41  ;;  %v547_v41 = vsel %vm326_vm1, %v546_v62, %v3726_v29  ;;  %v3265_v43 = vor.u32 %v3464_v36, %v3264_v35  ;;  %v4035_v62 = vsel %vm326_vm1, %v347_v15, %v346_v7  ;;  %v392_v7 = vsel %vm326_vm1, %v391_v11, %v390_v6 }
 0x128   :  { %v596_v10 = vpop.permute.xlu0 %595  ;;  %2044 = vmatpush.bf16.msrb.mxu3 %v3265_v43  ;;  %v4883_v43 = vrot.slane %v3998_v18, 7 }
 0x129   :  { %v638_v20 = vsel %vm412_vm2, %v591_v3, %v596_v10  ;;  %v3008_v3 = vld [vmem:[#allocation3 + $0x1c0] sm:$0xf]  ;;  %v2881_v10 = vor.u32 %v3368_v2, %v2880_v1  ;;  %v632_v2 = vsel %vm412_vm2, %v547_v41, %v3926_v19  ;;  %v3460_v19 = vld [vmem:[#allocation3 + $0x3ac] sm:$0xf0] }
 0x12a   :  { %v618_v21 = vpop.permute.xlu1 %617  ;;  %v4002_v33 = vpop.permute.xlu2 %397  ;;  %v639_v39 = vsel %vm414_vm3, %v638_v20, %v3880_v0  ;;  %v3136_v0 = vld [vmem:[#allocation3 + $0x2c0] sm:$0xf]  ;;  %v3432_v20 = vld [vmem:[#allocation3 + $0x2cc] sm:$0xf0] }
 0x12b   :  { %v641_v52 = vsel %vm412_vm2, %v612_v31, %v618_v21  ;;  %v640_v25 = vsel %vm416_vm4, %v639_v39, %v3944_v27  ;;  %v4019_v21 = vld [vmem:[%s4856_s5] sm:$0xf]  ;;  %v3009_v31 = vor.u32 %v3400_v22, %v3008_v3  ;;  %v3137_v34 = vor.u32 %v3432_v20, %v3136_v0  ;;  %1987 = vmatpush.bf16.msrb.mxu0 %v2881_v10  ;;  %v3428_v22 = vld [vmem:[#allocation3 + $0x2ac] sm:$0xf0] }
 0x12c   :  { %v642_v42 = vsel %vm414_vm3, %v641_v52, %v3912_v13  ;;  %v4027_v39 = vsel %vm326_vm1, %v325_v14, %v3757_v50  ;;  %v2992_v1 = vld [vmem:[#allocation3 + $0x1a0] sm:$0xf]  ;;  %v2865_v13 = vor.u32 %v3364_v44, %v2864_v37  ;;  %v649_v0 = vrot.slane %v640_v25, 6  ;;  %v3392_v37 = vld [vmem:[#allocation3 + $0x18c] sm:$0xf0] }
 0x12d   :  { %v3120_v52 = vld [vmem:[#allocation3 + $0x2a0] sm:$0xf]  ;;  %2006 = vmatpush.bf16.msrb.mxu1 %v3009_v31  ;;  %2025 = vmatpush.bf16.msrb.mxu2 %v3137_v34  ;;  %v2993_v36 = vor.u32 %v3396_v55, %v2992_v1  ;;  %v4047_v10 = vsel %vm326_vm1, %v370_v17, %v3772_v60  ;;  %v3360_v31 = vld [vmem:[#allocation3 + $0x8c] sm:$0xf0]  ;;  %v4054_v11 = vperm.slane %v4019_v21, 0  ;;  %v424_v17 = vsel %vm412_vm2, %v392_v7, %v4002_v33 }
 0x12e   :  { %v3248_v14 = vld [vmem:[#allocation3 + $0x3a0] sm:$0xf]  ;;  %v3121_v38 = vor.u32 %v3428_v22, %v3120_v52  ;;  %v3424_v1 = vld [vmem:[#allocation3 + $0x28c] sm:$0xf0]  ;;  %v4069_v33 = vperm.slane %v4019_v21, 1 }
 0x12f   :  { %v2848_v41 = vld [vmem:[#allocation3 + $0x80] sm:$0xf]  ;;  %v3249_v25 = vor.u32 %v3460_v19, %v3248_v14  ;;  %1988 = vmatpush.bf16.msrb.mxu0 %v2865_v13  ;;  %v3456_v14 = vld [vmem:[#allocation3 + $0x38c] sm:$0xf0] }
 0x130   :  { %v630_v27 = vpop.permute.xlu0 %629  ;;  %v2976_v34 = vld [vmem:[#allocation3 + $0x180] sm:$0xf]  ;;  %v2849_v22 = vor.u32 %v3360_v31, %v2848_v41  ;;  %v282_v41 = vpop.f32.mrf.mxu1 }
 0x131   :  { %v643_v3 = vsel %vm416_vm4, %v642_v42, %v630_v27  ;;  %v3104_v44 = vld [vmem:[#allocation3 + $0x280] sm:$0xf]  ;;  %2007 = vmatpush.bf16.msrb.mxu1 %v2993_v36  ;;  %2026 = vmatpush.bf16.msrb.mxu2 %v3121_v38  ;;  %v4082_v38 = vperm.slane %v4019_v21, 3 }
 0x132   :  { %v650_v20 = vrot.slane %v643_v3, 5  ;;  %v558_v35 = vpop.permute.xlu1 %557  ;;  %v404_v52 = vpop.permute.xlu2 %403  ;;  %2045 = vmatpush.bf16.msrb.mxu3 %v3249_v25  ;;  %v3105_v7 = vor.u32 %v3424_v1, %v3104_v44 }
 0x133   :  { %v633_v15 = vsel %vm414_vm3, %v632_v2, %v558_v35  ;;  %v4884_v2 = vmov %v4883_v43  ;;  %v2977_v35 = vor.u32 %v3392_v37, %v2976_v34  ;;  %v320_v25 = vpop.f32.mrf.mxu3  ;;  %1989 = vmatpush.bf16.msrb.mxu0 %v2849_v22 }
 0x134   :  { %v652_v42 = vsel %vm436_vm5, %v649_v0, %v650_v20  ;;  %v655_v27 = vsel %vm441_vm6, %v649_v0, %v650_v20  ;;  %v634_v6 = vsel %vm416_vm4, %v633_v15, %v3975_v53  ;;  %v3232_v53 = vld [vmem:[#allocation3 + $0x380] sm:$0xf]  ;;  %v4076_v15 = vsel %vm414_vm3, %v424_v17, %v404_v52 }
 0x135   :  { %v651_v55 = vsel %vm434_vm7, %v634_v6, %v4883_v43  ;;  %v654_v3 = vsel %vm326_vm1, %v634_v6, %v4884_v2  ;;  %v3233_v36 = vor.u32 %v3456_v14, %v3232_v53  ;;  %2008 = vmatpush.bf16.msrb.mxu1 %v2977_v35  ;;  %2027 = vmatpush.bf16.msrb.mxu2 %v3105_v7 }
 0x136   :  { %v4065_v0 = vsel %vm438_vm8, %v651_v55, %v652_v42  ;;  %v656_v20 = vsel %vm443_vm9, %v654_v3, %v655_v27  ;;  %v301_v42 = vpop.f32.mrf.mxu2  ;;  %v4079_v27 = vperm.slane %v4019_v21, 2 }
 0x137   :  { %v4071_v19 = vrot.slane %v656_v20, 1  ;;  %v658_v18 = vperm.slane %v4065_v0, 0  ;;  %v659_v13 = vperm.slane %v4065_v0, 1  ;;  %v660_v34 = vperm.slane %v4065_v0, 2  ;;  %2046 = vmatpush.bf16.msrb.mxu3 %v3233_v36 }
 0x138   :  { %v332_v31 = vpop.permute.xlu0 %331  ;;  %v661_v2 = vperm.slane %v4065_v0, 3 }
 0x139   :  { %v663_v37 = vperm.slane %v4071_v19, 1  ;;  %v664_v6 = vperm.slane %v4071_v19, 2  ;;  %v665_v44 = vperm.slane %v4071_v19, 3  ;;  %v674_v17 = vadd.f32 %v658_v18, %v3757_v50 }
 0x13a   :  { %v4088_v1 = vpop.permute.xlu1 %365  ;;  %v678_v43 = vadd.f32 %v658_v18, %v3772_v60  ;;  %v675_v21 = vadd.f32 %v659_v13, %v3937_v23  ;;  %v679_v55 = vadd.f32 %v659_v13, %v3979_v58  ;;  %v4097_v3 = vsel %vm412_vm2, %v4027_v39, %v332_v31 }
 0x13b   :  { %v687_v52 = vadd.f32 %v663_v37, %v282_v41  ;;  %v688_v53 = vadd.f32 %v664_v6, %v301_v42  ;;  %v683_v22 = vadd.f32 %v663_v37, %v4008_v54  ;;  %v689_v14 = vadd.f32 %v665_v44, %v320_v25 }
 0x13c   :  { %v700_v50 = vadd.f32 %v4054_v11, %v674_v17  ;;  %v704_v60 = vadd.f32 %v4054_v11, %v678_v43  ;;  %v701_v39 = vadd.f32 %v4069_v33, %v675_v21  ;;  %v705_v0 = vadd.f32 %v4069_v33, %v679_v55 }
 0x13d   :  { %v4103_v23 = vadd.f32 %v4069_v33, %v687_v52  ;;  %v4106_v58 = vadd.f32 %v4079_v27, %v688_v53  ;;  %v4111_v20 = vadd.f32 %v4082_v38, %v689_v14  ;;  %v676_v18 = vadd.f32 %v660_v34, %v3939_v24 }
 0x13e   :  { %v716_v54 = vmul.f32 0.33, %v700_v50  ;;  %v720_v35 = vmul.f32 0.33, %v704_v60  ;;  %v684_v41 = vadd.f32 %v664_v6, %v4010_v4  ;;  %v717_v7 = vmul.f32 0.33, %v701_v39 }
 0x13f   :  { %v4115_v13 = vmul.f32 0.33, %v4103_v23  ;;  %v680_v31 = vadd.f32 %v660_v34, %v3981_v59  ;;  %v4120_v42 = vmul.f32 0.33, %v4106_v58  ;;  %v721_v17 = vmul.f32 0.33, %v705_v0 }
 0x140   :  { %v354_v36 = vpop.permute.xlu0 %353  ;;  %v732_v37 = vmax.f32 %v700_v50, %v716_v54  ;;  %v736_v25 = vmax.f32 %v704_v60, %v720_v35  ;;  %v4123_v43 = vmul.f32 0.33, %v4111_v20  ;;  %v733_v21 = vmax.f32 %v701_v39, %v717_v7 }
 0x141   :  { %v702_v24 = vadd.f32 %v4079_v27, %v676_v18  ;;  %v706_v55 = vadd.f32 %v4079_v27, %v680_v31  ;;  %v737_v6 = vmax.f32 %v705_v0, %v721_v17  ;;  %v677_v59 = vadd.f32 %v661_v2, %v3946_v28 }
 0x142   :  { %v376_v52 = vpop.permute.xlu1 %375  ;;  %v748_v4 = vpack.c.bf16 %v736_v25, %v732_v37  ;;  %v681_v34 = vadd.f32 %v661_v2, %v3983_v61  ;;  %v685_v53 = vadd.f32 %v665_v44, %v4014_v26  ;;  %v662_v60 = vperm.slane %v4071_v19, 0 }
 0x143   :  { %v718_v14 = vmul.f32 0.33, %v702_v24  ;;  %v722_v50 = vmul.f32 0.33, %v706_v55  ;;  %v749_v54 = vpack.c.bf16 %v737_v6, %v733_v21  ;;  %v703_v39 = vadd.f32 %v4082_v38, %v677_v59  ;;  %v3356_v21 = vld [vmem:[#allocation3 + $0x6c] sm:$0xf0] }
 0x144   :  { %1020 = vmatmul.bf16.vlgmr.msra.gmra.mxu0 %v748_v4  ;;  %v707_v35 = vadd.f32 %v4082_v38, %v681_v34  ;;  %v4134_v18 = vadd.f32 %v4069_v33, %v683_v22  ;;  %v682_v28 = vadd.f32 %v662_v60, %v3785_v5  ;;  %v686_v61 = vadd.f32 %v662_v60, %v3801_v16  ;;  %v388_v4 = vpop.permute.xlu2 %387  ;;  %v3420_v34 = vld [vmem:[#allocation3 + $0x26c] sm:$0xf0] }
 0x145   :  { %v734_v0 = vmax.f32 %v702_v24, %v718_v14  ;;  %v738_v7 = vmax.f32 %v706_v55, %v722_v50  ;;  %v418_v26 = vsel %vm412_vm2, %v4035_v62, %v354_v36  ;;  %1039 = vmatmul.bf16.vlgmr.msra.gmra.mxu1 %v749_v54  ;;  %v719_v19 = vmul.f32 0.33, %v703_v39  ;;  %v2832_v36 = vld [vmem:[#allocation3 + $0x60] sm:$0xf]  ;;  %v3388_v55 = vld [vmem:[#allocation3 + $0x16c] sm:$0xf0] }
 0x146   :  { %v723_v44 = vmul.f32 0.33, %v707_v35  ;;  %v725_v2 = vmul.f32 0.33, %v4134_v18  ;;  %v708_v37 = vadd.f32 %v4054_v11, %v682_v28  ;;  %v712_v33 = vadd.f32 %v4054_v11, %v686_v61  ;;  %v2960_v24 = vld [vmem:[#allocation3 + $0x160] sm:$0xf] }
 0x147   :  { %v750_v31 = vpack.c.bf16 %v738_v7, %v734_v0  ;;  %v4144_v22 = vadd.f32 %v4079_v27, %v684_v41  ;;  %v735_v25 = vmax.f32 %v703_v39, %v719_v19  ;;  %v745_v62 = vmax.f32 %v4103_v23, %v4115_v13  ;;  %v3088_v41 = vld [vmem:[#allocation3 + $0x260] sm:$0xf]  ;;  %v3452_v50 = vld [vmem:[#allocation3 + $0x36c] sm:$0xf0] }
 0x148   :  { %v739_v5 = vmax.f32 %v707_v35, %v723_v44  ;;  %v360_v17 = vpop.permute.xlu0 %359  ;;  %v741_v16 = vmax.f32 %v4134_v18, %v725_v2  ;;  %v724_v11 = vmul.f32 0.33, %v708_v37  ;;  %v728_v59 = vmul.f32 0.33, %v712_v33  ;;  %v3216_v14 = vld [vmem:[#allocation3 + $0x360] sm:$0xf] }
 0x149   :  { %1058 = vmatmul.bf16.vlgmr.msra.gmra.mxu2 %v750_v31  ;;  %v419_v6 = vsel %vm414_vm3, %v418_v26, %v360_v17  ;;  %v726_v27 = vmul.f32 0.33, %v4144_v22  ;;  %v421_v60 = vsel %vm412_vm2, %v4047_v10, %v376_v52  ;;  %v711_v39 = vadd.f32 %v4082_v38, %v685_v53  ;;  %v4158_v35 = vld [vmem:[#allocation3 + $0x40] sm:$0xf]  ;;  %v4160_v18 = vld [vmem:[#allocation3 + $0x4c] sm:$0xf0] }
 0x14a   :  { %v751_v23 = vpack.c.bf16 %v739_v5, %v735_v25  ;;  %v4155_v13 = vsel %vm416_vm4, %v419_v6, %v4088_v1  ;;  %v382_v54 = vpop.permute.xlu1 %381  ;;  %v4162_v0 = vld [vmem:[#allocation3 + $0x140] sm:$0xf]  ;;  %v4164_v7 = vld [vmem:[#allocation3 + $0x14c] sm:$0xf0]  ;;  %v740_v61 = vmax.f32 %v708_v37, %v724_v11  ;;  %v744_v10 = vmax.f32 %v712_v33, %v728_v59 }
 0x14b   :  { %v422_v28 = vsel %vm414_vm3, %v421_v60, %v382_v54  ;;  %v746_v52 = vmax.f32 %v4106_v58, %v4120_v42  ;;  %v4169_v1 = vld [vmem:[#allocation3 + $0x240] sm:$0xf]  ;;  %v4171_v26 = vld [vmem:[#allocation3 + $0x24c] sm:$0xf0]  ;;  %v742_v44 = vmax.f32 %v4144_v22, %v726_v27  ;;  %v727_v2 = vmul.f32 0.33, %v711_v39 }
 0x14c   :  { %v4173_v38 = vld [vmem:[#allocation3 + $0x340] sm:$0xf]  ;;  %v4175_v53 = vld [vmem:[#allocation3 + $0x34c] sm:$0xf0]  ;;  %1077 = vmatmul.bf16.vlgmr.msra.gmra.mxu3 %v751_v23  ;;  %v4178_v19 = vsel %vm416_vm4, %v422_v28, %v388_v4  ;;  %v747_v31 = vmax.f32 %v4111_v20, %v4123_v43  ;;  %v4196_v4 = vpack.c.bf16 %v745_v62, %v741_v16  ;;  %v2833_v22 = vor.u32 %v3356_v21, %v2832_v36 }
 0x14d   :  { %v4183_v37 = vld [vmem:[#allocation3 + $0x20] sm:$0xf]  ;;  %v4185_v58 = vld [vmem:[#allocation3 + $0x2c] sm:$0xf0]  ;;  %v2961_v6 = vor.u32 %v3388_v55, %v2960_v24  ;;  %v752_v23 = vpack.c.bf16 %v744_v10, %v740_v61  ;;  %v743_v16 = vmax.f32 %v711_v39, %v727_v2  ;;  %v3089_v62 = vor.u32 %v3420_v34, %v3088_v41 }
 0x14e   :  { %v4187_v42 = vld [vmem:[#allocation3 + $0x120] sm:$0xf]  ;;  %v4189_v33 = vld [vmem:[#allocation3 + $0x12c] sm:$0xf0]  ;;  %v3217_v36 = vor.u32 %v3452_v50, %v3216_v14  ;;  %v432_v54 = vrot.slane %v4178_v19, 6  ;;  %v4220_v28 = vpack.c.bf16 %v746_v52, %v742_v44  ;;  %1990 = vmatpush.bf16.msrb.mxu0 %v2833_v22  ;;  %v2817_v17 = vor.u32 %v4160_v18, %v4158_v35 }
 0x14f   :  { %v4191_v25 = vld [vmem:[#allocation3 + $0x220] sm:$0xf]  ;;  %v4193_v5 = vld [vmem:[#allocation3 + $0x22c] sm:$0xf0]  ;;  %2009 = vmatpush.bf16.msrb.mxu1 %v2961_v6  ;;  %v2945_v39 = vor.u32 %v4164_v7, %v4162_v0  ;;  %v4230_v50 = vpack.c.bf16 %v747_v31, %v743_v16  ;;  %2028 = vmatpush.bf16.msrb.mxu2 %v3089_v62  ;;  %v3073_v61 = vor.u32 %v4171_v26, %v4169_v1  ;;  %v4239_v18 = vld [vmem:[#allocation3 + $0xe4] sm:$0xf] }
 0x150   :  { %v4198_v11 = vld [vmem:[#allocation3 + $0x320] sm:$0xf]  ;;  %v4200_v20 = vld [vmem:[#allocation3 + $0x32c] sm:$0xf0]  ;;  %v410_v14 = vpop.permute.xlu0 %409  ;;  %2047 = vmatpush.bf16.msrb.mxu3 %v3217_v36  ;;  %v3201_v10 = vor.u32 %v4175_v53, %v4173_v38  ;;  %v4241_v0 = vld [vmem:[#allocation3 + $0xf0] sm:$0xf0]  ;;  %v2801_v52 = vor.u32 %v4185_v58, %v4183_v37  ;;  %v2929_v19 = vor.u32 %v4189_v33, %v4187_v42  ;;  %v3057_v1 = vor.u32 %v4193_v5, %v4191_v25  ;;  %v344_v33 = vpop.permute.xlu2 %343 }
 0x151   :  { %v4202_v43 = vld [vmem:[#allocation3] sm:$0xf]  ;;  %v4204_v59 = vld [vmem:[#allocation3 + $0xc] sm:$0xf0]  ;;  %v426_v7 = vsel %vm416_vm4, %v4076_v15, %v410_v14  ;;  %v4251_v26 = vld [vmem:[#allocation3 + $0x1e4] sm:$0xf]  ;;  %v3185_v15 = vor.u32 %v4200_v20, %v4198_v11 }
 0x152   :  { %v4206_v27 = vld [vmem:[#allocation3 + $0x100] sm:$0xf]  ;;  %v4213_v21 = vld [vmem:[#allocation3 + $0x10c] sm:$0xf0]  ;;  %v4253_v38 = vld [vmem:[#allocation3 + $0x1f0] sm:$0xf0]  ;;  %v338_v2 = vpop.permute.xlu1 %337  ;;  %v2785_v31 = vor.u32 %v4204_v59, %v4202_v43  ;;  %1991 = vmatpush.bf16.msrb.mxu0 %v2817_v17 }
 0x153   :  { %v4211_v60 = vld [vmem:[%s4855_s4] sm:$0xf]  ;;  %v4217_v55 = vld [vmem:[#allocation3 + $0x20c] sm:$0xf0]  ;;  %v4255_v53 = vld [vmem:[#allocation3 + $0x2e4] sm:$0xf]  ;;  %v2913_v37 = vor.u32 %v4213_v21, %v4206_v27  ;;  %v415_v25 = vsel %vm414_vm3, %v4097_v3, %v338_v2  ;;  %2010 = vmatpush.bf16.msrb.mxu1 %v2945_v39  ;;  %2029 = vmatpush.bf16.msrb.mxu2 %v3073_v61 }
 0x154   :  { %v4215_v24 = vld [vmem:[#allocation3 + $0x200] sm:$0xf]  ;;  %v4228_v34 = vld [vmem:[#allocation3 + $0x30c] sm:$0xf0]  ;;  %v4237_v35 = vperm.slane %v4211_v60, 0  ;;  %v433_v44 = vrot.slane %v426_v7, 5  ;;  %v417_v3 = vsel %vm416_vm4, %v415_v25, %v344_v33  ;;  %1025 = vmatmul.bf16.gmra.mxu0 %v752_v23  ;;  %2048 = vmatpush.bf16.msrb.mxu3 %v3201_v10  ;;  %v2901_v23 = vor.u32 %v4239_v18, %v4241_v0 }
 0x155   :  { %v4226_v41 = vld [vmem:[#allocation3 + $0x300] sm:$0xf]  ;;  %v4263_v58 = vld [vmem:[#allocation3 + $0x2f0] sm:$0xf0]  ;;  %v4265_v42 = vld [vmem:[#allocation3 + $0x3e4] sm:$0xf]  ;;  %v3041_v5 = vor.u32 %v4217_v55, %v4215_v24  ;;  %v3029_v55 = vor.u32 %v4251_v26, %v4253_v38  ;;  %1044 = vmatmul.bf16.gmra.mxu1 %v4196_v4 }
 0x156   :  { %v3169_v22 = vor.u32 %v4228_v34, %v4226_v41  ;;  %v4274_v6 = vperm.slane %v4211_v60, 1  ;;  %v4276_v11 = vld [vmem:[#allocation3 + $0x3f0] sm:$0xf0]  ;;  %v4278_v20 = vld [vmem:[#allocation3 + $0xc4] sm:$0xf]  ;;  %v437_v43 = vsel %vm436_vm5, %v432_v54, %v433_v44  ;;  %v442_v59 = vsel %vm441_vm6, %v432_v54, %v433_v44  ;;  %1992 = vmatpush.bf16.msrb.mxu0 %v2801_v52 }
 0x157   :  { %v4284_v17 = vperm.slane %v4211_v60, 2  ;;  %v4286_v27 = vld [vmem:[#allocation3 + $0xd0] sm:$0xf0]  ;;  %v4288_v16 = vld [vmem:[#allocation3 + $0x1c4] sm:$0xf]  ;;  %v4885_v62 = vrot.slane %v4155_v13, 7  ;;  %v3157_v13 = vor.u32 %v4255_v53, %v4263_v58  ;;  %v3285_v61 = vor.u32 %v4265_v42, %v4276_v11  ;;  %2011 = vmatpush.bf16.msrb.mxu1 %v2929_v19  ;;  %2030 = vmatpush.bf16.msrb.mxu2 %v3057_v1 }
 0x158   :  { %v4300_v54 = vld [vmem:[#allocation3 + $0x1d0] sm:$0xf0]  ;;  %v4302_v39 = vld [vmem:[#allocation3 + $0x2c4] sm:$0xf]  ;;  %v2885_v38 = vor.u32 %v4278_v20, %v4286_v27  ;;  %2049 = vmatpush.bf16.msrb.mxu3 %v3185_v15  ;;  %v4326_v19 = vperm.slane %v4211_v60, 3 }
 0x159   :  { %v435_v36 = vsel %vm434_vm7, %v417_v3, %v4885_v62  ;;  %v4886_v21 = vmov %v4885_v62  ;;  %v4304_v41 = vld [vmem:[#allocation3 + $0x2d0] sm:$0xf0]  ;;  %v3013_v4 = vor.u32 %v4288_v16, %v4300_v54  ;;  %1063 = vmatmul.bf16.gmra.mxu2 %v4220_v28  ;;  %v3362_v15 = vld [vmem:[#allocation3 + $0xa4] sm:$0xf] }
 0x15a   :  { %v440_v24 = vsel %vm326_vm1, %v417_v3, %v4886_v21  ;;  %v439_v34 = vsel %vm438_vm8, %v435_v36, %v437_v43  ;;  %v3141_v53 = vor.u32 %v4302_v39, %v4304_v41  ;;  %1993 = vmatpush.bf16.msrb.mxu0 %v2785_v31  ;;  %v3266_v60 = vld [vmem:[#allocation3 + $0x3d0] sm:$0xf0]  ;;  %v3394_v27 = vld [vmem:[#allocation3 + $0x1a4] sm:$0xf] }
 0x15b   :  { %v444_v14 = vsel %vm443_vm9, %v440_v24, %v442_v59  ;;  %v446_v18 = vperm.slane %v439_v34, 0  ;;  %v447_v0 = vperm.slane %v439_v34, 1  ;;  %v448_v7 = vperm.slane %v439_v34, 2  ;;  %2012 = vmatpush.bf16.msrb.mxu1 %v2913_v37  ;;  %2031 = vmatpush.bf16.msrb.mxu2 %v3041_v5  ;;  %v2866_v31 = vld [vmem:[#allocation3 + $0xb0] sm:$0xf0] }
 0x15c   :  { %v4313_v10 = vrot.slane %v444_v14, 1  ;;  %v449_v26 = vperm.slane %v439_v34, 3  ;;  %1082 = vmatmul.bf16.gmra.mxu3 %v4230_v50  ;;  %v2994_v62 = vld [vmem:[#allocation3 + $0x1b0] sm:$0xf0]  ;;  %v3426_v36 = vld [vmem:[#allocation3 + $0x2a4] sm:$0xf] }
 0x15d   :  { %v462_v44 = vadd.f32 %v446_v18, %v3726_v29  ;;  %v466_v2 = vadd.f32 %v446_v18, %v3728_v30  ;;  %v463_v52 = vadd.f32 %v447_v0, %v3838_v45  ;;  %v467_v1 = vadd.f32 %v447_v0, %v3844_v48  ;;  %2050 = vmatpush.bf16.msrb.mxu3 %v3169_v22  ;;  %v3122_v14 = vld [vmem:[#allocation3 + $0x2b0] sm:$0xf0]  ;;  %v3458_v18 = vld [vmem:[#allocation3 + $0x3a4] sm:$0xf] }
 0x15e   :  { %v464_v58 = vadd.f32 %v448_v7, %v3840_v46  ;;  %v468_v42 = vadd.f32 %v448_v7, %v3846_v49  ;;  %v465_v33 = vadd.f32 %v449_v26, %v3842_v47  ;;  %v450_v45 = vperm.slane %v4313_v10, 0  ;;  %v3462_v47 = vld [vmem:[#allocation3 + $0x3c4] sm:$0xf]  ;;  %2062 = vmatpush.bf16.msra.mxu0 %v2901_v23 }
 0x15f   :  { %v488_v28 = vadd.f32 %v4237_v35, %v462_v44  ;;  %v492_v29 = vadd.f32 %v4237_v35, %v466_v2  ;;  %v489_v30 = vadd.f32 %v4274_v6, %v463_v52  ;;  %v493_v48 = vadd.f32 %v4274_v6, %v467_v1  ;;  %2081 = vmatpush.bf16.msra.mxu1 %v3029_v55  ;;  %v3358_v44 = vld [vmem:[#allocation3 + $0x84] sm:$0xf]  ;;  %v2850_v2 = vld [vmem:[#allocation3 + $0x90] sm:$0xf0] }
 0x160   :  { %v490_v46 = vadd.f32 %v4284_v17, %v464_v58  ;;  %v494_v49 = vadd.f32 %v4284_v17, %v468_v42  ;;  %v451_v37 = vperm.slane %v4313_v10, 1  ;;  %v469_v43 = vadd.f32 %v449_v26, %v3848_v51  ;;  %2100 = vmatpush.bf16.msra.mxu2 %v3157_v13  ;;  %v3250_v51 = vld [vmem:[#allocation3 + $0x3b0] sm:$0xf0]  ;;  %v3390_v58 = vld [vmem:[#allocation3 + $0x184] sm:$0xf] }
 0x161   :  { %v504_v25 = vmul.f32 0.33, %v488_v28  ;;  %v508_v11 = vmul.f32 0.33, %v492_v29  ;;  %v505_v20 = vmul.f32 0.33, %v489_v30  ;;  %v491_v3 = vadd.f32 %v4326_v19, %v465_v33  ;;  %2119 = vmatpush.bf16.msra.mxu3 %v3285_v61 }
 0x162   :  { %v509_v50 = vmul.f32 0.33, %v493_v48  ;;  %v506_v5 = vmul.f32 0.33, %v490_v46  ;;  %v510_v59 = vmul.f32 0.33, %v494_v49  ;;  %v495_v22 = vadd.f32 %v4326_v19, %v469_v43  ;;  %2063 = vmatpush.bf16.msra.mxu0 %v2885_v38 }
 0x163   :  { %v520_v21 = vmax.f32 %v488_v28, %v504_v25  ;;  %v524_v24 = vmax.f32 %v492_v29, %v508_v11  ;;  %v521_v34 = vmax.f32 %v489_v30, %v505_v20  ;;  %v507_v26 = vmul.f32 0.33, %v491_v3  ;;  %v2978_v42 = vld [vmem:[#allocation3 + $0x190] sm:$0xf0]  ;;  %2082 = vmatpush.bf16.msra.mxu1 %v3013_v4  ;;  %v3422_v61 = vld [vmem:[#allocation3 + $0x284] sm:$0xf] }
 0x164   :  { %v525_v23 = vmax.f32 %v493_v48, %v509_v50  ;;  %v522_v0 = vmax.f32 %v490_v46, %v506_v5  ;;  %v526_v7 = vmax.f32 %v494_v49, %v510_v59  ;;  %v511_v13 = vmul.f32 0.33, %v495_v22  ;;  %2101 = vmatpush.bf16.msra.mxu2 %v3141_v53  ;;  %v3106_v28 = vld [vmem:[#allocation3 + $0x290] sm:$0xf0]  ;;  %v3454_v49 = vld [vmem:[#allocation3 + $0x384] sm:$0xf] }
 0x165   :  { %v4344_v55 = vpack.c.bf16 %v524_v24, %v520_v21  ;;  %v3269_v52 = vor.u32 %v3462_v47, %v3266_v60  ;;  %v2869_v1 = vor.u32 %v3362_v15, %v2866_v31  ;;  %v452_v29 = vperm.slane %v4313_v10, 2  ;;  %v3234_v47 = vld [vmem:[#allocation3 + $0x390] sm:$0xf0]  ;;  %v3418_v5 = vld [vmem:[#allocation3 + $0x264] sm:$0xf] }
 0x166   :  { %v4346_v33 = vpack.c.bf16 %v525_v23, %v521_v34  ;;  %v4355_v30 = vpack.c.bf16 %v526_v7, %v522_v0  ;;  %v2997_v38 = vor.u32 %v3394_v27, %v2994_v62  ;;  %v3125_v48 = vor.u32 %v3426_v36, %v3122_v14  ;;  %v3090_v59 = vld [vmem:[#allocation3 + $0x270] sm:$0xf0]  ;;  %v3450_v62 = vld [vmem:[#allocation3 + $0x364] sm:$0xf] }
 0x167   :  { %2120 = vmatpush.bf16.msra.mxu3 %v3269_v52  ;;  %v3253_v46 = vor.u32 %v3458_v18, %v3250_v51  ;;  %1994 = vmatmul.bf16.vlgmr.msrb.gmra.mxu0 %v4344_v55  ;;  %v523_v16 = vmax.f32 %v491_v3, %v507_v26  ;;  %v527_v54 = vmax.f32 %v495_v22, %v511_v13  ;;  %v3218_v36 = vld [vmem:[#allocation3 + $0x370] sm:$0xf0]  ;;  %v3350_v24 = vld [vmem:[#allocation3 + $0x44] sm:$0xf] }
 0x168   :  { %v2853_v4 = vor.u32 %v3358_v44, %v2850_v2  ;;  %v2981_v60 = vor.u32 %v3390_v58, %v2978_v42  ;;  %2064 = vmatpush.bf16.msra.mxu0 %v2869_v1  ;;  %v3109_v39 = vor.u32 %v3422_v61, %v3106_v28  ;;  %v470_v41 = vadd.f32 %v450_v45, %v3731_v32  ;;  %v2818_v34 = vld [vmem:[#allocation3 + $0x50] sm:$0xf0]  ;;  %v3414_v7 = vld [vmem:[#allocation3 + $0x244] sm:$0xf] }
 0x169   :  { %v474_v53 = vadd.f32 %v450_v45, %v3743_v40  ;;  %v471_v15 = vadd.f32 %v451_v37, %v3862_v56  ;;  %2013 = vmatmul.bf16.vlgmr.msrb.gmra.mxu1 %v4346_v33  ;;  %2102 = vmatpush.bf16.msra.mxu2 %v3125_v48  ;;  %v3237_v31 = vor.u32 %v3454_v49, %v3234_v47  ;;  %v453_v32 = vperm.slane %v4313_v10, 3  ;;  %v2834_v10 = vld [vmem:[#allocation3 + $0x70] sm:$0xf0]  ;;  %v3446_v52 = vld [vmem:[#allocation3 + $0x344] sm:$0xf] }
 0x16a   :  { %v475_v25 = vadd.f32 %v451_v37, %v3900_v8  ;;  %v472_v11 = vadd.f32 %v452_v29, %v3864_v57  ;;  %2083 = vmatpush.bf16.msra.mxu1 %v2997_v38  ;;  %v4374_v40 = vadd.f32 %v4237_v35, %v470_v41  ;;  %v476_v56 = vadd.f32 %v452_v29, %v3902_v9  ;;  %v3354_v57 = vld [vmem:[#allocation3 + $0x64] sm:$0xf]  ;;  %v2962_v9 = vld [vmem:[#allocation3 + $0x170] sm:$0xf0] }
 0x16b   :  { %2121 = vmatpush.bf16.msra.mxu3 %v3253_v46  ;;  %v4377_v45 = vadd.f32 %v4237_v35, %v474_v53  ;;  %v4380_v20 = vpack.c.bf16 %v527_v54, %v523_v16  ;;  %v4383_v43 = vadd.f32 %v4274_v6, %v471_v15  ;;  %v3386_v37 = vld [vmem:[#allocation3 + $0x164] sm:$0xf]  ;;  %2032 = vmatmul.bf16.vlgmr.msrb.gmra.mxu2 %v4355_v30  ;;  %v2946_v18 = vld [vmem:[#allocation3 + $0x150] sm:$0xf0] }
 0x16c   :  { %v4386_v8 = vadd.f32 %v4274_v6, %v475_v25  ;;  %2065 = vmatpush.bf16.msra.mxu0 %v2853_v4  ;;  %v4390_v50 = vadd.f32 %v4284_v17, %v472_v11  ;;  %v473_v35 = vadd.f32 %v453_v32, %v3878_v63  ;;  %v512_v3 = vmul.f32 0.33, %v4374_v40  ;;  %v3382_v63 = vld [vmem:[#allocation3 + $0x144] sm:$0xf]  ;;  %v3202_v1 = vld [vmem:[#allocation3 + $0x350] sm:$0xf0] }
 0x16d   :  { %2103 = vmatpush.bf16.msra.mxu2 %v3109_v39  ;;  %v516_v6 = vmul.f32 0.33, %v4377_v45  ;;  %v477_v27 = vadd.f32 %v453_v32, %v3910_v12  ;;  %v4397_v21 = vadd.f32 %v4284_v17, %v476_v56  ;;  %2051 = vmatmul.bf16.vlgmr.msrb.gmra.mxu3 %v4380_v20  ;;  %v513_v22 = vmul.f32 0.33, %v4383_v43  ;;  %v3074_v17 = vld [vmem:[#allocation3 + $0x250] sm:$0xf0] }
 0x16e   :  { %2084 = vmatpush.bf16.msra.mxu1 %v2981_v60  ;;  %v517_v14 = vmul.f32 0.33, %v4386_v8  ;;  %v514_v51 = vmul.f32 0.33, %v4390_v50  ;;  %v4404_v12 = vadd.f32 %v4326_v19, %v473_v35  ;;  %v2837_v23 = vor.u32 %v3354_v57, %v2834_v10  ;;  %v3346_v28 = vld [vmem:[#allocation3 + $0x24] sm:$0xf] }
 0x16f   :  { %2122 = vmatpush.bf16.msra.mxu3 %v3237_v31  ;;  %v2965_v0 = vor.u32 %v3386_v37, %v2962_v9  ;;  %v528_v26 = vmax.f32 %v4374_v40, %v512_v3  ;;  %v532_v44 = vmax.f32 %v4377_v45, %v516_v6  ;;  %v4409_v2 = vadd.f32 %v4326_v19, %v477_v27  ;;  %v2802_v49 = vld [vmem:[#allocation3 + $0x30] sm:$0xf0]  ;;  %v3378_v19 = vld [vmem:[#allocation3 + $0x124] sm:$0xf]  ;;  %v2904_v3 = vld [vmem:[#allocation3 + $0xe8] sm:$0xf] }
 0x170   :  { %v3093_v13 = vor.u32 %v3418_v5, %v3090_v59  ;;  %v518_v58 = vmul.f32 0.33, %v4397_v21  ;;  %2066 = vmatpush.bf16.msra.mxu0 %v2837_v23  ;;  %v3221_v42 = vor.u32 %v3450_v62, %v3218_v36  ;;  %v2821_v61 = vor.u32 %v3350_v24, %v2818_v34  ;;  %v2930_v47 = vld [vmem:[#allocation3 + $0x130] sm:$0xf0]  ;;  %v3410_v54 = vld [vmem:[#allocation3 + $0x224] sm:$0xf] }
 0x171   :  { %v529_v29 = vmax.f32 %v4383_v43, %v513_v22  ;;  %v533_v38 = vmax.f32 %v4386_v8, %v517_v14  ;;  %v2949_v48 = vor.u32 %v3382_v63, %v2946_v18  ;;  %v3077_v46 = vor.u32 %v3414_v7, %v3074_v17  ;;  %v3058_v4 = vld [vmem:[#allocation3 + $0x230] sm:$0xf0]  ;;  %v3442_v60 = vld [vmem:[#allocation3 + $0x324] sm:$0xf]  ;;  %v3373_v6 = vld [vmem:[#allocation3 + $0xf4] sm:$0xf0] }
 0x172   :  { %2085 = vmatpush.bf16.msra.mxu1 %v2965_v0  ;;  %2104 = vmatpush.bf16.msra.mxu2 %v3093_v13  ;;  %v3205_v16 = vor.u32 %v3446_v52, %v3202_v1  ;;  %v4414_v39 = vpack.c.bf16 %v532_v44, %v528_v26  ;;  %v530_v41 = vmax.f32 %v4390_v50, %v514_v51  ;;  %v515_v53 = vmul.f32 0.33, %v4404_v12  ;;  %v3186_v31 = vld [vmem:[#allocation3 + $0x330] sm:$0xf0]  ;;  %v3342_v40 = vld [vmem:[#allocation3 + $0x4] sm:$0xf] }
 0x173   :  { %2123 = vmatpush.bf16.msra.mxu3 %v3221_v42  ;;  %v519_v15 = vmul.f32 0.33, %v4409_v2  ;;  %v534_v25 = vmax.f32 %v4397_v21, %v518_v58  ;;  %v2805_v11 = vor.u32 %v3346_v28, %v2802_v49  ;;  %v2933_v32 = vor.u32 %v3378_v19, %v2930_v47  ;;  %v2786_v45 = vld [vmem:[#allocation3 + $0x10] sm:$0xf0]  ;;  %v3374_v8 = vld [vmem:[#allocation3 + $0x104] sm:$0xf] }
 0x174   :  { %2067 = vmatpush.bf16.msra.mxu0 %v2821_v61  ;;  %v4421_v56 = vpack.c.bf16 %v533_v38, %v529_v29  ;;  %v3061_v43 = vor.u32 %v3410_v54, %v3058_v4  ;;  %v2914_v57 = vld [vmem:[#allocation3 + $0x110] sm:$0xf0]  ;;  %v3406_v10 = vld [vmem:[#allocation3 + $0x204] sm:$0xf]  ;;  %v3189_v37 = vor.u32 %v3442_v60, %v3186_v31  ;;  %v531_v5 = vmax.f32 %v4404_v12, %v515_v53  ;;  %v3032_v27 = vld [vmem:[#allocation3 + $0x1e8] sm:$0xf] }
 0x175   :  { %v3042_v50 = vld [vmem:[#allocation3 + $0x210] sm:$0xf0]  ;;  %v3438_v35 = vld [vmem:[#allocation3 + $0x304] sm:$0xf]  ;;  %v535_v59 = vmax.f32 %v4409_v2, %v519_v15  ;;  %v4426_v62 = vpack.c.bf16 %v534_v25, %v530_v41  ;;  %v2789_v36 = vor.u32 %v3342_v40, %v2786_v45  ;;  %v2917_v21 = vor.u32 %v3374_v8, %v2914_v57  ;;  %v3405_v24 = vld [vmem:[#allocation3 + $0x1f4] sm:$0xf0] }
 0x176   :  { %2086 = vmatpush.bf16.msra.mxu1 %v2949_v48  ;;  %2105 = vmatpush.bf16.msra.mxu2 %v3077_v46  ;;  %v3170_v9 = vld [vmem:[#allocation3 + $0x310] sm:$0xf0]  ;;  %v3160_v34 = vld [vmem:[#allocation3 + $0x2e8] sm:$0xf]  ;;  %v3437_v63 = vld [vmem:[#allocation3 + $0x2f4] sm:$0xf0]  ;;  %v3045_v22 = vor.u32 %v3406_v10, %v3042_v50  ;;  %v2905_v12 = vor.u32 %v3373_v6, %v2904_v3  ;;  %v3033_v0 = vor.u32 %v3405_v24, %v3032_v27 }
 0x177   :  { %1999 = vmatmul.bf16.gmra.mxu0 %v4414_v39  ;;  %2124 = vmatpush.bf16.msra.mxu3 %v3205_v16  ;;  %v3288_v14 = vld [vmem:[#allocation3 + $0x3e8] sm:$0xf]  ;;  %v3469_v18 = vld [vmem:[#allocation3 + $0x3f4] sm:$0xf0]  ;;  %v3173_v51 = vor.u32 %v3438_v35, %v3170_v9  ;;  %v4429_v23 = vpack.c.bf16 %v535_v59, %v531_v5  ;;  %v3161_v7 = vor.u32 %v3437_v63, %v3160_v34 }
 0x178   :  { %2068 = vmatpush.bf16.msra.mxu0 %v2805_v11  ;;  %v2888_v17 = vld [vmem:[#allocation3 + $0xc8] sm:$0xf]  ;;  %v3369_v26 = vld [vmem:[#allocation3 + $0xd4] sm:$0xf0]  ;;  %v3289_v2 = vor.u32 %v3469_v18, %v3288_v14 }
 0x179   :  { %2018 = vmatmul.bf16.gmra.mxu1 %v4421_v56  ;;  %v3016_v44 = vld [vmem:[#allocation3 + $0x1c8] sm:$0xf]  ;;  %v3401_v13 = vld [vmem:[#allocation3 + $0x1d4] sm:$0xf0]  ;;  %v2889_v61 = vor.u32 %v3369_v26, %v2888_v17 }
 0x17a   :  { %2087 = vmatpush.bf16.msra.mxu1 %v2933_v32  ;;  %2106 = vmatpush.bf16.msra.mxu2 %v3061_v43  ;;  %v3144_v52 = vld [vmem:[#allocation3 + $0x2c8] sm:$0xf]  ;;  %v3433_v1 = vld [vmem:[#allocation3 + $0x2d4] sm:$0xf0]  ;;  %v3017_v28 = vor.u32 %v3401_v13, %v3016_v44 }
 0x17b   :  { %2037 = vmatmul.bf16.gmra.mxu2 %v4426_v62  ;;  %2125 = vmatpush.bf16.msra.mxu3 %v3189_v37  ;;  %v3272_v58 = vld [vmem:[#allocation3 + $0x3c8] sm:$0xf]  ;;  %v3465_v42 = vld [vmem:[#allocation3 + $0x3d4] sm:$0xf0]  ;;  %v3145_v29 = vor.u32 %v3433_v1, %v3144_v52 }
 0x17c   :  { %2069 = vmatpush.bf16.msra.mxu0 %v2789_v36  ;;  %v2872_v38 = vld [vmem:[#allocation3 + $0xa8] sm:$0xf]  ;;  %v3365_v48 = vld [vmem:[#allocation3 + $0xb4] sm:$0xf0]  ;;  %v3273_v46 = vor.u32 %v3465_v42, %v3272_v58 }
 0x17d   :  { %2056 = vmatmul.bf16.gmra.mxu3 %v4429_v23  ;;  %v3000_v49 = vld [vmem:[#allocation3 + $0x1a8] sm:$0xf]  ;;  %v3429_v47 = vld [vmem:[#allocation3 + $0x2b4] sm:$0xf0]  ;;  %v2873_v60 = vor.u32 %v3365_v48, %v2872_v38 }
 0x17e   :  { %2088 = vmatpush.bf16.msra.mxu1 %v2917_v21  ;;  %2107 = vmatpush.bf16.msra.mxu2 %v3045_v22  ;;  %v3128_v19 = vld [vmem:[#allocation3 + $0x2a8] sm:$0xf]  ;;  %v3397_v16 = vld [vmem:[#allocation3 + $0x1b4] sm:$0xf0] }
 0x17f   :  { %2126 = vmatpush.bf16.msra.mxu3 %v3173_v51  ;;  %v3256_v54 = vld [vmem:[#allocation3 + $0x3a8] sm:$0xf]  ;;  %v3461_v4 = vld [vmem:[#allocation3 + $0x3b4] sm:$0xf0]  ;;  %v3129_v41 = vor.u32 %v3429_v47, %v3128_v19  ;;  %v3001_v31 = vor.u32 %v3397_v16, %v3000_v49 }
 0x180   :  { %2138 = vmatpush.bf16.msrb.mxu0 %v2905_v12  ;;  %v2856_v53 = vld [vmem:[#allocation3 + $0x88] sm:$0xf]  ;;  %v3361_v15 = vld [vmem:[#allocation3 + $0x94] sm:$0xf0]  ;;  %v3257_v25 = vor.u32 %v3461_v4, %v3256_v54 }
 0x181   :  { %v2984_v11 = vld [vmem:[#allocation3 + $0x188] sm:$0xf]  ;;  %v3425_v40 = vld [vmem:[#allocation3 + $0x294] sm:$0xf0]  ;;  %v2857_v57 = vor.u32 %v3361_v15, %v2856_v53  ;;  %v2906_v53 = vld [vmem:[#allocation3 + $0xf8] sm:$0xf0] }
 0x182   :  { %2157 = vmatpush.bf16.msrb.mxu1 %v3033_v0  ;;  %2176 = vmatpush.bf16.msrb.mxu2 %v3161_v7  ;;  %v3112_v32 = vld [vmem:[#allocation3 + $0x288] sm:$0xf]  ;;  %v3393_v45 = vld [vmem:[#allocation3 + $0x194] sm:$0xf0] }
 0x183   :  { %2195 = vmatpush.bf16.msrb.mxu3 %v3289_v2  ;;  %v3240_v43 = vld [vmem:[#allocation3 + $0x388] sm:$0xf]  ;;  %v3457_v8 = vld [vmem:[#allocation3 + $0x394] sm:$0xf0]  ;;  %v3113_v10 = vor.u32 %v3425_v40, %v3112_v32  ;;  %v2985_v35 = vor.u32 %v3393_v45, %v2984_v11  ;;  %v3403_v32 = vld [vmem:[#allocation3 + $0x1ec] sm:$0xf] }
 0x184   :  { %2139 = vmatpush.bf16.msrb.mxu0 %v2889_v61  ;;  %v2840_v37 = vld [vmem:[#allocation3 + $0x68] sm:$0xf]  ;;  %v3357_v50 = vld [vmem:[#allocation3 + $0x74] sm:$0xf0]  ;;  %v3241_v9 = vor.u32 %v3457_v8, %v3240_v43  ;;  %v3034_v40 = vld [vmem:[#allocation3 + $0x1f8] sm:$0xf0] }
 0x185   :  { %v2968_v5 = vld [vmem:[#allocation3 + $0x168] sm:$0xf]  ;;  %v3421_v3 = vld [vmem:[#allocation3 + $0x274] sm:$0xf0]  ;;  %v2841_v21 = vor.u32 %v3357_v50, %v2840_v37  ;;  %v3435_v45 = vld [vmem:[#allocation3 + $0x2ec] sm:$0xf] }
 0x186   :  { %2158 = vmatpush.bf16.msrb.mxu1 %v3017_v28  ;;  %2177 = vmatpush.bf16.msrb.mxu2 %v3145_v29  ;;  %v3096_v59 = vld [vmem:[#allocation3 + $0x268] sm:$0xf]  ;;  %v3389_v6 = vld [vmem:[#allocation3 + $0x174] sm:$0xf0]  ;;  %v3290_v37 = vld [vmem:[#allocation3 + $0x3f8] sm:$0xf0] }
 0x187   :  { %2196 = vmatpush.bf16.msrb.mxu3 %v3273_v46  ;;  %2070 = vmatmul.bf16.vlgmr.msra.gmra.mxu0 %v4344_v55  ;;  %v3224_v27 = vld [vmem:[#allocation3 + $0x368] sm:$0xf]  ;;  %v3453_v36 = vld [vmem:[#allocation3 + $0x374] sm:$0xf0]  ;;  %v3097_v24 = vor.u32 %v3421_v3, %v3096_v59  ;;  %v2969_v22 = vor.u32 %v3389_v6, %v2968_v5  ;;  %v2890_v5 = vld [vmem:[#allocation3 + $0xd8] sm:$0xf0]  ;;  %v3037_v59 = vor.u32 %v3403_v32, %v3034_v40 }
 0x188   :  { %2140 = vmatpush.bf16.msrb.mxu0 %v2873_v60  ;;  %v2824_v34 = vld [vmem:[#allocation3 + $0x48] sm:$0xf]  ;;  %v3353_v63 = vld [vmem:[#allocation3 + $0x54] sm:$0xf0]  ;;  %v3225_v14 = vor.u32 %v3453_v36, %v3224_v27  ;;  %v3399_v27 = vld [vmem:[#allocation3 + $0x1cc] sm:$0xf] }
 0x189   :  { %2089 = vmatmul.bf16.vlgmr.msra.gmra.mxu1 %v4346_v33  ;;  %v2952_v18 = vld [vmem:[#allocation3 + $0x148] sm:$0xf]  ;;  %v3417_v12 = vld [vmem:[#allocation3 + $0x254] sm:$0xf0]  ;;  %v2825_v26 = vor.u32 %v3353_v63, %v2824_v34  ;;  %v3018_v36 = vld [vmem:[#allocation3 + $0x1d8] sm:$0xf0] }
 0x18a   :  { %2178 = vmatpush.bf16.msrb.mxu2 %v3129_v41  ;;  %2159 = vmatpush.bf16.msrb.mxu1 %v3001_v31  ;;  %v3080_v51 = vld [vmem:[#allocation3 + $0x248] sm:$0xf]  ;;  %v3385_v0 = vld [vmem:[#allocation3 + $0x154] sm:$0xf0]  ;;  %v3371_v41 = vld [vmem:[#allocation3 + $0xec] sm:$0xf] }
 0x18b   :  { %2197 = vmatpush.bf16.msrb.mxu3 %v3257_v25  ;;  %2108 = vmatmul.bf16.vlgmr.msra.gmra.mxu2 %v4355_v30  ;;  %v3208_v7 = vld [vmem:[#allocation3 + $0x348] sm:$0xf]  ;;  %v3449_v17 = vld [vmem:[#allocation3 + $0x354] sm:$0xf0]  ;;  %v3081_v44 = vor.u32 %v3417_v12, %v3080_v51  ;;  %v2953_v52 = vor.u32 %v3385_v0, %v2952_v18  ;;  %v2909_v8 = vor.u32 %v3371_v41, %v2906_v53  ;;  %v3146_v34 = vld [vmem:[#allocation3 + $0x2d8] sm:$0xf0] }
 0x18c   :  { %2141 = vmatpush.bf16.msrb.mxu0 %v2857_v57  ;;  %v2808_v2 = vld [vmem:[#allocation3 + $0x28] sm:$0xf]  ;;  %v3349_v13 = vld [vmem:[#allocation3 + $0x34] sm:$0xf0]  ;;  %v3209_v1 = vor.u32 %v3449_v17, %v3208_v7  ;;  %v3162_v57 = vld [vmem:[#allocation3 + $0x2f8] sm:$0xf0]  ;;  %v3021_v51 = vor.u32 %v3399_v27, %v3018_v36 }
 0x18d   :  { %2127 = vmatmul.bf16.vlgmr.msra.gmra.mxu3 %v4380_v20  ;;  %v2936_v58 = vld [vmem:[#allocation3 + $0x128] sm:$0xf]  ;;  %v3413_v61 = vld [vmem:[#allocation3 + $0x234] sm:$0xf0]  ;;  %v2809_v48 = vor.u32 %v3349_v13, %v2808_v2  ;;  %v3165_v3 = vor.u32 %v3435_v45, %v3162_v57  ;;  %v3463_v63 = vld [vmem:[#allocation3 + $0x3cc] sm:$0xf] }
 0x18e   :  { %2179 = vmatpush.bf16.msrb.mxu2 %v3113_v10  ;;  %2160 = vmatpush.bf16.msrb.mxu1 %v2985_v35  ;;  %v3064_v42 = vld [vmem:[#allocation3 + $0x228] sm:$0xf]  ;;  %v3381_v28 = vld [vmem:[#allocation3 + $0x134] sm:$0xf0]  ;;  %v3467_v10 = vld [vmem:[#allocation3 + $0x3ec] sm:$0xf] }
 0x18f   :  { %2198 = vmatpush.bf16.msrb.mxu3 %v3241_v9  ;;  %v3192_v29 = vld [vmem:[#allocation3 + $0x328] sm:$0xf]  ;;  %v3445_v38 = vld [vmem:[#allocation3 + $0x334] sm:$0xf0]  ;;  %v3065_v49 = vor.u32 %v3413_v61, %v3064_v42  ;;  %v2937_v54 = vor.u32 %v3381_v28, %v2936_v58  ;;  %v3367_v9 = vld [vmem:[#allocation3 + $0xcc] sm:$0xf]  ;;  %v3293_v6 = vor.u32 %v3467_v10, %v3290_v37 }
 0x190   :  { %2142 = vmatpush.bf16.msrb.mxu0 %v2841_v21  ;;  %v2792_v46 = vld [vmem:[#allocation3 + $0x8] sm:$0xf]  ;;  %v3345_v19 = vld [vmem:[#allocation3 + $0x14] sm:$0xf0]  ;;  %v3193_v4 = vor.u32 %v3445_v38, %v3192_v29  ;;  %v3431_v21 = vld [vmem:[#allocation3 + $0x2cc] sm:$0xf] }
 0x191   :  { %v2920_v47 = vld [vmem:[#allocation3 + $0x108] sm:$0xf]  ;;  %v3409_v60 = vld [vmem:[#allocation3 + $0x214] sm:$0xf0]  ;;  %v2793_v11 = vor.u32 %v3345_v19, %v2792_v46  ;;  %v2874_v18 = vld [vmem:[#allocation3 + $0xb8] sm:$0xf0]  ;;  %v3149_v12 = vor.u32 %v3431_v21, %v3146_v34 }
 0x192   :  { %2180 = vmatpush.bf16.msrb.mxu2 %v3097_v24  ;;  %2161 = vmatpush.bf16.msrb.mxu1 %v2969_v22  ;;  %v3048_v16 = vld [vmem:[#allocation3 + $0x208] sm:$0xf]  ;;  %v3377_v15 = vld [vmem:[#allocation3 + $0x114] sm:$0xf0]  ;;  %v2893_v24 = vor.u32 %v3367_v9, %v2890_v5  ;;  %v3274_v22 = vld [vmem:[#allocation3 + $0x3d8] sm:$0xf0] }
 0x193   :  { %2199 = vmatpush.bf16.msrb.mxu3 %v3225_v14  ;;  %v3176_v31 = vld [vmem:[#allocation3 + $0x308] sm:$0xf]  ;;  %v3441_v25 = vld [vmem:[#allocation3 + $0x314] sm:$0xf0]  ;;  %v3049_v43 = vor.u32 %v3409_v60, %v3048_v16  ;;  %v2921_v50 = vor.u32 %v3377_v15, %v2920_v47  ;;  %v3363_v14 = vld [vmem:[#allocation3 + $0xac] sm:$0xf]  ;;  %v3277_v0 = vor.u32 %v3463_v63, %v3274_v22 }
 0x194   :  { %2143 = vmatpush.bf16.msrb.mxu0 %v2825_v26  ;;  %v3177_v35 = vor.u32 %v3441_v25, %v3176_v31  ;;  %v3395_v7 = vld [vmem:[#allocation3 + $0x1ac] sm:$0xf]  ;;  %v3002_v17 = vld [vmem:[#allocation3 + $0x1b8] sm:$0xf0] }
 0x195   :  { %v3427_v26 = vld [vmem:[#allocation3 + $0x2ac] sm:$0xf]  ;;  %v3130_v2 = vld [vmem:[#allocation3 + $0x2b8] sm:$0xf0]  ;;  %v3005_v42 = vor.u32 %v3395_v7, %v3002_v17 }
 0x196   :  { %2181 = vmatpush.bf16.msrb.mxu2 %v3081_v44  ;;  %2162 = vmatpush.bf16.msrb.mxu1 %v2953_v52  ;;  %v2877_v44 = vor.u32 %v3363_v14, %v2874_v18  ;;  %v3459_v13 = vld [vmem:[#allocation3 + $0x3ac] sm:$0xf]  ;;  %v3258_v52 = vld [vmem:[#allocation3 + $0x3b8] sm:$0xf0]  ;;  %v3133_v61 = vor.u32 %v3427_v26, %v3130_v2 }
 0x197   :  { %2200 = vmatpush.bf16.msrb.mxu3 %v3209_v1  ;;  %2075 = vmatmul.bf16.gmra.mxu0 %v4414_v39  ;;  %v3359_v1 = vld [vmem:[#allocation3 + $0x8c] sm:$0xf]  ;;  %v2858_v58 = vld [vmem:[#allocation3 + $0x98] sm:$0xf0]  ;;  %v3261_v28 = vor.u32 %v3459_v13, %v3258_v52 }
 0x198   :  { %2144 = vmatpush.bf16.msrb.mxu0 %v2809_v48  ;;  %v3391_v29 = vld [vmem:[#allocation3 + $0x18c] sm:$0xf]  ;;  %v2986_v38 = vld [vmem:[#allocation3 + $0x198] sm:$0xf0]  ;;  %v2861_v48 = vor.u32 %v3359_v1, %v2858_v58 }
 0x199   :  { %2094 = vmatmul.bf16.gmra.mxu1 %v4421_v56  ;;  %v3423_v46 = vld [vmem:[#allocation3 + $0x28c] sm:$0xf]  ;;  %v3242_v19 = vld [vmem:[#allocation3 + $0x398] sm:$0xf0] }
 0x19a   :  { %2182 = vmatpush.bf16.msrb.mxu2 %v3065_v49  ;;  %2163 = vmatpush.bf16.msrb.mxu1 %v2937_v54  ;;  %v3455_v49 = vld [vmem:[#allocation3 + $0x38c] sm:$0xf]  ;;  %v3114_v47 = vld [vmem:[#allocation3 + $0x298] sm:$0xf0] }
 0x19b   :  { %2201 = vmatpush.bf16.msrb.mxu3 %v3193_v4  ;;  %2113 = vmatmul.bf16.gmra.mxu2 %v4426_v62  ;;  %v3355_v16 = vld [vmem:[#allocation3 + $0x6c] sm:$0xf]  ;;  %v2842_v54 = vld [vmem:[#allocation3 + $0x78] sm:$0xf0]  ;;  %v2989_v4 = vor.u32 %v3391_v29, %v2986_v38  ;;  %v3245_v60 = vor.u32 %v3455_v49, %v3242_v19  ;;  %v3117_v15 = vor.u32 %v3423_v46, %v3114_v47 }
 0x19c   :  { %2145 = vmatpush.bf16.msrb.mxu0 %v2793_v11  ;;  %v3387_v41 = vld [vmem:[#allocation3 + $0x16c] sm:$0xf]  ;;  %v2970_v53 = vld [vmem:[#allocation3 + $0x178] sm:$0xf0]  ;;  %v2845_v31 = vor.u32 %v3355_v16, %v2842_v54 }
 0x19d   :  { %2132 = vmatmul.bf16.gmra.mxu3 %v4429_v23  ;;  %v3419_v25 = vld [vmem:[#allocation3 + $0x26c] sm:$0xf]  ;;  %v3226_v32 = vld [vmem:[#allocation3 + $0x378] sm:$0xf0] }
 0x19e   :  { %2183 = vmatpush.bf16.msrb.mxu2 %v3049_v43  ;;  %2164 = vmatpush.bf16.msrb.mxu1 %v2921_v50  ;;  %v3451_v11 = vld [vmem:[#allocation3 + $0x36c] sm:$0xf]  ;;  %v3098_v40 = vld [vmem:[#allocation3 + $0x278] sm:$0xf0] }
 0x19f   :  { %2202 = vmatpush.bf16.msrb.mxu3 %v3177_v35  ;;  %v3351_v45 = vld [vmem:[#allocation3 + $0x4c] sm:$0xf]  ;;  %v2826_v43 = vld [vmem:[#allocation3 + $0x58] sm:$0xf0]  ;;  %v3229_v57 = vor.u32 %v3451_v11, %v3226_v32  ;;  %v3101_v50 = vor.u32 %v3419_v25, %v3098_v40 }
 0x1a0   :  { %2214 = vmatpush.bf16.msra.mxu0 %v2909_v8  ;;  %v2973_v8 = vor.u32 %v3387_v41, %v2970_v53  ;;  %v3383_v10 = vld [vmem:[#allocation3 + $0x14c] sm:$0xf]  ;;  %v2954_v37 = vld [vmem:[#allocation3 + $0x158] sm:$0xf0]  ;;  %v2829_v35 = vor.u32 %v3351_v45, %v2826_v43 }
 0x1a1   :  { %v3415_v9 = vld [vmem:[#allocation3 + $0x24c] sm:$0xf]  ;;  %v2810_v27 = vld [vmem:[#allocation3 + $0x38] sm:$0xf0]  ;;  %v2957_v36 = vor.u32 %v3383_v10, %v2954_v37 }
 0x1a2   :  { %2233 = vmatpush.bf16.msra.mxu1 %v3037_v59  ;;  %2252 = vmatpush.bf16.msra.mxu2 %v3165_v3  ;;  %v3447_v5 = vld [vmem:[#allocation3 + $0x34c] sm:$0xf]  ;;  %v3210_v59 = vld [vmem:[#allocation3 + $0x358] sm:$0xf0] }
 0x1a3   :  { %2271 = vmatpush.bf16.msra.mxu3 %v3293_v6  ;;  %v3082_v3 = vld [vmem:[#allocation3 + $0x258] sm:$0xf0]  ;;  %v3347_v6 = vld [vmem:[#allocation3 + $0x2c] sm:$0xf]  ;;  %v3213_v21 = vor.u32 %v3447_v5, %v3210_v59 }
 0x1a4   :  { %2215 = vmatpush.bf16.msra.mxu0 %v2893_v24  ;;  %v3379_v24 = vld [vmem:[#allocation3 + $0x12c] sm:$0xf]  ;;  %v2938_v34 = vld [vmem:[#allocation3 + $0x138] sm:$0xf0]  ;;  %v3085_v63 = vor.u32 %v3415_v9, %v3082_v3  ;;  %v2813_v22 = vor.u32 %v3347_v6, %v2810_v27 }
 0x1a5   :  { %v3443_v14 = vld [vmem:[#allocation3 + $0x32c] sm:$0xf]  ;;  %v3194_v18 = vld [vmem:[#allocation3 + $0x338] sm:$0xf0] }
 0x1a6   :  { %2234 = vmatpush.bf16.msra.mxu1 %v3021_v51  ;;  %2253 = vmatpush.bf16.msra.mxu2 %v3149_v12  ;;  %v3411_v51 = vld [vmem:[#allocation3 + $0x22c] sm:$0xf]  ;;  %v3066_v12 = vld [vmem:[#allocation3 + $0x238] sm:$0xf0]  ;;  %v3197_v26 = vor.u32 %v3443_v14, %v3194_v18 }
 0x1a7   :  { %2272 = vmatpush.bf16.msra.mxu3 %v3277_v0  ;;  %2146 = vmatmul.bf16.vlgmr.msrb.gmra.mxu0 %v4344_v55  ;;  %v2941_v0 = vor.u32 %v3379_v24, %v2938_v34  ;;  %v3343_v7 = vld [vmem:[#allocation3 + $0xc] sm:$0xf]  ;;  %v2794_v17 = vld [vmem:[#allocation3 + $0x18] sm:$0xf0]  ;;  %v3069_v13 = vor.u32 %v3411_v51, %v3066_v12 }
 0x1a8   :  { %2216 = vmatpush.bf16.msra.mxu0 %v2877_v44  ;;  %v3375_v44 = vld [vmem:[#allocation3 + $0x10c] sm:$0xf]  ;;  %v2922_v2 = vld [vmem:[#allocation3 + $0x118] sm:$0xf0]  ;;  %v2797_v58 = vor.u32 %v3343_v7, %v2794_v17 }
 0x1a9   :  { %2165 = vmatmul.bf16.vlgmr.msrb.gmra.mxu1 %v4346_v33  ;;  %v3439_v52 = vld [vmem:[#allocation3 + $0x30c] sm:$0xf]  ;;  %v3178_v1 = vld [vmem:[#allocation3 + $0x318] sm:$0xf0] }
 0x1aa   :  { %2235 = vmatpush.bf16.msra.mxu1 %v3005_v42  ;;  %2254 = vmatpush.bf16.msra.mxu2 %v3133_v61  ;;  %v3407_v42 = vld [vmem:[#allocation3 + $0x20c] sm:$0xf]  ;;  %v3050_v61 = vld [vmem:[#allocation3 + $0x218] sm:$0xf0]  ;;  %v3181_v29 = vor.u32 %v3439_v52, %v3178_v1 }
 0x1ab   :  { %2273 = vmatpush.bf16.msra.mxu3 %v3261_v28  ;;  %2184 = vmatmul.bf16.vlgmr.msrb.gmra.mxu2 %v4355_v30  ;;  %v2925_v28 = vor.u32 %v3375_v44, %v2922_v2  ;;  %v3053_v38 = vor.u32 %v3407_v42, %v3050_v61 }
 0x1ac   :  { %2217 = vmatpush.bf16.msra.mxu0 %v2861_v48 }
 0x1ad   :  { %2203 = vmatmul.bf16.vlgmr.msrb.gmra.mxu3 %v4380_v20 }
 0x1ae   :  { %2236 = vmatpush.bf16.msra.mxu1 %v2989_v4  ;;  %2255 = vmatpush.bf16.msra.mxu2 %v3117_v15 }
 0x1af   :  { %2274 = vmatpush.bf16.msra.mxu3 %v3245_v60 }
 0x1b0   :  { %2218 = vmatpush.bf16.msra.mxu0 %v2845_v31 }
 0x1b2   :  { %2237 = vmatpush.bf16.msra.mxu1 %v2973_v8  ;;  %2256 = vmatpush.bf16.msra.mxu2 %v3101_v50 }
 0x1b3   :  { %2275 = vmatpush.bf16.msra.mxu3 %v3229_v57 }
 0x1b4   :  { %2219 = vmatpush.bf16.msra.mxu0 %v2829_v35 }
 0x1b6   :  { %2238 = vmatpush.bf16.msra.mxu1 %v2957_v36  ;;  %2257 = vmatpush.bf16.msra.mxu2 %v3085_v63 }
 0x1b7   :  { %2276 = vmatpush.bf16.msra.mxu3 %v3213_v21  ;;  %2151 = vmatmul.bf16.gmra.mxu0 %v4414_v39 }
 0x1b8   :  { %2220 = vmatpush.bf16.msra.mxu0 %v2813_v22 }
 0x1b9   :  { %2170 = vmatmul.bf16.gmra.mxu1 %v4421_v56 }
 0x1ba   :  { %2239 = vmatpush.bf16.msra.mxu1 %v2941_v0  ;;  %2258 = vmatpush.bf16.msra.mxu2 %v3069_v13 }
 0x1bb   :  { %2277 = vmatpush.bf16.msra.mxu3 %v3197_v26  ;;  %2189 = vmatmul.bf16.gmra.mxu2 %v4426_v62 }
 0x1bc   :  { %2221 = vmatpush.bf16.msra.mxu0 %v2797_v58 }
 0x1bd   :  { %2208 = vmatmul.bf16.gmra.mxu3 %v4429_v23 }
 0x1be   :  { %2240 = vmatpush.bf16.msra.mxu1 %v2925_v28  ;;  %2259 = vmatpush.bf16.msra.mxu2 %v3053_v38 }
 0x1bf   :  { %2278 = vmatpush.bf16.msra.mxu3 %v3181_v29 }
 0x1c1   :  { %v1021_v48 = vpop.f32.mrf.mxu0 }
 0x1c2   :  { %v1040_v46 = vpop.f32.mrf.mxu1 }
 0x1c3   :  { %v1041_v4 = vadd.f32 %v1040_v46, %v1021_v48 }
 0x1c7   :  { %2222 = vmatmul.bf16.vlgmr.msra.gmra.mxu0 %v4344_v55 }
 0x1c9   :  { %2241 = vmatmul.bf16.vlgmr.msra.gmra.mxu1 %v4346_v33  ;;  %v1023_v49 = vpop.f32.mrf.mxu0 }
 0x1ca   :  { %v1042_v47 = vpop.f32.mrf.mxu1 }
 0x1cb   :  { %2260 = vmatmul.bf16.vlgmr.msra.gmra.mxu2 %v4355_v30  ;;  %v1043_v25 = vadd.f32 %v1042_v47, %v1023_v49 }
 0x1cc   :  { %v1059_v19 = vpop.f32.mrf.mxu2 }
 0x1cd   :  { %2279 = vmatmul.bf16.vlgmr.msra.gmra.mxu3 %v4380_v20  ;;  %v1060_v55 = vadd.f32 %v1059_v19, %v1041_v4 }
 0x1cf   :  { %v1078_v16 = vpop.f32.mrf.mxu3 }
 0x1d0   :  { %v4455_v30 = vadd.f32 %v1078_v16, %v1060_v55 }
 0x1d1   :  { %v1026_v60 = vpop.f32.mrf.mxu0 }
 0x1d2   :  { %v1045_v41 = vpop.f32.mrf.mxu1  ;;  %v1221_v40 = vrot.slane %v4455_v30, 1  ;;  %v1238_v50 = vrot.slane %v4455_v30, 4  ;;  %v1242_v36 = vrot.slane %v4455_v30, 5  ;;  %v1248_v26 = vrot.slane %v4455_v30, 6 }
 0x1d3   :  { %v1046_v33 = vadd.f32 %v1045_v41, %v1026_v60  ;;  %v1226_v47 = vrot.slane %v4455_v30, 2  ;;  %v1232_v55 = vrot.slane %v4455_v30, 3 }
 0x1d4   :  { %v1061_v54 = vpop.f32.mrf.mxu2 }
 0x1d7   :  { %2227 = vmatmul.bf16.gmra.mxu0 %v4414_v39  ;;  %v1080_v53 = vpop.f32.mrf.mxu3 }
 0x1d9   :  { %2246 = vmatmul.bf16.gmra.mxu1 %v4421_v56  ;;  %v1028_v39 = vpop.f32.mrf.mxu0  ;;  %v1062_v56 = vadd.f32 %v1061_v54, %v1043_v25 }
 0x1da   :  { %v1047_v32 = vpop.f32.mrf.mxu1 }
 0x1db   :  { %2265 = vmatmul.bf16.gmra.mxu2 %v4426_v62  ;;  %v1254_v62 = vrot.slane %v4455_v30, 7  ;;  %v1048_v8 = vadd.f32 %v1047_v32, %v1028_v39  ;;  %v1081_v5 = vadd.f32 %v1080_v53, %v1062_v56 }
 0x1dc   :  { %v1064_v20 = vpop.f32.mrf.mxu2 }
 0x1dd   :  { %2284 = vmatmul.bf16.gmra.mxu3 %v4429_v23  ;;  %v1065_v15 = vadd.f32 %v1064_v20, %v1046_v33  ;;  %v1286_v24 = vrot.slane %v1081_v5, 5  ;;  %v1265_v63 = vrot.slane %v1081_v5, 1  ;;  %v1282_v22 = vrot.slane %v1081_v5, 4 }
 0x1de   :  { %v1292_v52 = vrot.slane %v1081_v5, 6  ;;  %v1270_v1 = vrot.slane %v1081_v5, 2  ;;  %v1298_v29 = vrot.slane %v1081_v5, 7  ;;  %v1276_v19 = vrot.slane %v1081_v5, 3 }
 0x1df   :  { %v1083_v31 = vpop.f32.mrf.mxu3 }
 0x1e0   :  { %v4458_v11 = vadd.f32 %v1083_v31, %v1065_v15 }
 0x1e2   :  { %v1222_v45 = vsel %vm326_vm1, %v4458_v11, %v1221_v40  ;;  %v1255_v43 = vrot.slane %v4458_v11, 6  ;;  %v1218_v23 = vrot.slane %v4458_v11, 7  ;;  %v1239_v57 = vrot.slane %v4458_v11, 3 }
 0x1e3   :  { %1223 = vrot.lane.b32.xlu0 %v1222_v45, %s3539_s29  ;;  %v1243_v59 = vrot.slane %v4458_v11, 4  ;;  %v1249_v7 = vrot.slane %v4458_v11, 5  ;;  %v1227_v48 = vrot.slane %v4458_v11, 1  ;;  %v1233_v41 = vrot.slane %v4458_v11, 2 }
 0x1e4   :  { %v1066_v10 = vpop.f32.mrf.mxu2  ;;  %v1256_v37 = vsel %vm326_vm1, %v1255_v43, %v1254_v62  ;;  %v4473_v9 = vsel %vm326_vm1, %v1218_v23, %v4455_v30  ;;  %v4477_v3 = vsel %vm326_vm1, %v1239_v57, %v1238_v50  ;;  %v4500_v28 = vpop.f32.mrf.mxu0 }
 0x1e5   :  { %v1067_v35 = vadd.f32 %v1066_v10, %v1048_v8  ;;  %1257 = vrot.lane.b32.xlu1 %v1256_v37, %s3541_s2  ;;  %v1244_v21 = vsel %vm326_vm1, %v1243_v59, %v1242_v36  ;;  %v1250_v13 = vsel %vm326_vm1, %v1249_v7, %v1248_v26  ;;  %v1228_v4 = vsel %vm326_vm1, %v1227_v48, %v1226_v47 }
 0x1e6   :  { %v4503_v46 = vpop.f32.mrf.mxu1  ;;  %v1234_v20 = vsel %vm326_vm1, %v1233_v41, %v1232_v55 }
 0x1e7   :  { %v1085_v6 = vpop.f32.mrf.mxu3 }
 0x1e8   :  { %v1086_v27 = vadd.f32 %v1085_v6, %v1067_v35 }
 0x1ea   :  { %v1287_v34 = vrot.slane %v1086_v27, 4  ;;  %v1283_v14 = vrot.slane %v1086_v27, 3  ;;  %v1262_v18 = vrot.slane %v1086_v27, 7  ;;  %v1266_v12 = vsel %vm326_vm1, %v1086_v27, %v1265_v63 }
 0x1eb   :  { %1245 = vrot.lane.b32.xlu0 %v1244_v21, %s3539_s29  ;;  %v1293_v44 = vrot.slane %v1086_v27, 5  ;;  %v1271_v2 = vrot.slane %v1086_v27, 1  ;;  %v1299_v61 = vrot.slane %v1086_v27, 6  ;;  %v1277_v38 = vrot.slane %v1086_v27, 2 }
 0x1ec   :  { %v1288_v51 = vsel %vm326_vm1, %v1287_v34, %v1286_v24  ;;  %v4487_v0 = vsel %vm326_vm1, %v1283_v14, %v1282_v22  ;;  %v4491_v17 = vsel %vm326_vm1, %v1262_v18, %v1081_v5  ;;  %v4517_v53 = vpop.f32.mrf.mxu0 }
 0x1ed   :  { %1289 = vrot.lane.b32.xlu2 %v1288_v51, %s3539_s29  ;;  %1267 = vrot.lane.b32.xlu1 %v1266_v12, %s3539_s29  ;;  %v1294_v58 = vsel %vm326_vm1, %v1293_v44, %v1292_v52  ;;  %v1272_v42 = vsel %vm326_vm1, %v1271_v2, %v1270_v1  ;;  %v1300_v49 = vsel %vm326_vm1, %v1299_v61, %v1298_v29 }
 0x1ee   :  { %v4508_v16 = vpop.f32.mrf.mxu2  ;;  %v1278_v54 = vsel %vm326_vm1, %v1277_v38, %v1276_v19  ;;  %v4520_v33 = vpop.f32.mrf.mxu1 }
 0x1f0   :  { %v4514_v60 = vpop.f32.mrf.mxu3 }
 0x1f3   :  { %1251 = vrot.lane.b32.xlu0 %v1250_v13, %s3540_s22 }
 0x1f4   :  { %v4528_v25 = vpop.f32.mrf.mxu0 }
 0x1f5   :  { %1295 = vrot.lane.b32.xlu2 %v1294_v58, %s3540_s22  ;;  %1273 = vrot.lane.b32.xlu1 %v1272_v42, %s3540_s22 }
 0x1f6   :  { %v4524_v15 = vpop.f32.mrf.mxu2  ;;  %v4530_v39 = vpop.f32.mrf.mxu1 }
 0x1f8   :  { %v4526_v31 = vpop.f32.mrf.mxu3 }
 0x1fb   :  { %1301 = vrot.lane.b32.xlu0 %v1300_v49, %s3541_s2 }
 0x1fc   :  { %v4536_v40 = vpop.f32.mrf.mxu0 }
 0x1fd   :  { %1279 = vrot.lane.b32.xlu2 %v1278_v54, %s3541_s2  ;;  %1229 = vrot.lane.b32.xlu1 %v1228_v4, %s3540_s22 }
 0x1fe   :  { %v4532_v32 = vpop.f32.mrf.mxu2  ;;  %v4538_v30 = vpop.f32.mrf.mxu1 }
 0x200   :  { %v4534_v11 = vpop.f32.mrf.mxu3 }
 0x204   :  { %v4544_v62 = vpop.f32.mrf.mxu0 }
 0x205   :  { %1235 = vrot.lane.b32.xlu2 %v1234_v20, %s3541_s2 }
 0x206   :  { %v4540_v56 = vpop.f32.mrf.mxu2  ;;  %v4546_v43 = vpop.f32.mrf.mxu1 }
 0x207   :  { %4887 = vst [vmem:[#allocation9_spill] sm:$0xff] %v4540_v56 }
 0x208   :  { %v4542_v45 = vpop.f32.mrf.mxu3 }
 0x209   :  { %4888 = vst [vmem:[#allocation10_spill] sm:$0xff] %v4542_v45 }
 0x20c   :  { %v4552_v57 = vpop.f32.mrf.mxu0 }
 0x20e   :  { %v4548_v8 = vpop.f32.mrf.mxu2  ;;  %v4554_v10 = vpop.f32.mrf.mxu1 }
 0x210   :  { %v4550_v23 = vpop.f32.mrf.mxu3 }
 0x214   :  { %v4560_v35 = vpop.f32.mrf.mxu0 }
 0x216   :  { %v4556_v37 = vpop.f32.mrf.mxu2  ;;  %v4562_v5 = vpop.f32.mrf.mxu1 }
 0x218   :  { %v4558_v50 = vpop.f32.mrf.mxu3 }
 0x21c   :  { %v4568_v27 = vpop.f32.mrf.mxu0 }
 0x21e   :  { %v4564_v59 = vpop.f32.mrf.mxu2  ;;  %v4570_v36 = vpop.f32.mrf.mxu1 }
 0x21f   :  { %4890 = vst [vmem:[#allocation12_spill] sm:$0xff] %v4570_v36 }
 0x220   :  { %v4566_v6 = vpop.f32.mrf.mxu3 }
 0x221   :  { %4889 = vst [vmem:[#allocation11_spill] sm:$0xff] %v4566_v6 }
 0x224   :  { %v4576_v34 = vpop.f32.mrf.mxu0 }
 0x226   :  { %v4572_v21 = vpop.f32.mrf.mxu2  ;;  %v4578_v63 = vpop.f32.mrf.mxu1 }
 0x227   :  { %4891 = vst [vmem:[#allocation13_spill] sm:$0xff] %v4572_v21 }
 0x228   :  { %v4574_v24 = vpop.f32.mrf.mxu3 }
 0x229   :  { %4892 = vst [vmem:[#allocation14_spill] sm:$0xff] %v4574_v24 }
 0x22c   :  { %v4584_v18 = vpop.f32.mrf.mxu0 }
 0x22e   :  { %v4580_v22 = vpop.f32.mrf.mxu2  ;;  %v4586_v12 = vpop.f32.mrf.mxu1 }
 0x230   :  { %v4582_v14 = vpop.f32.mrf.mxu3 }
 0x234   :  { %v4592_v13 = vpop.f32.mrf.mxu0 }
 0x236   :  { %v4588_v26 = vpop.f32.mrf.mxu2  ;;  %v4594_v58 = vpop.f32.mrf.mxu1 }
 0x238   :  { %v4590_v44 = vpop.f32.mrf.mxu3 }
 0x23c   :  { %v4600_v48 = vpop.f32.mrf.mxu0 }
 0x23d   :  { %4895 = vst [vmem:[#allocation17_spill] sm:$0xff] %v4600_v48 }
 0x23e   :  { %v4596_v42 = vpop.f32.mrf.mxu2  ;;  %v4602_v19 = vpop.f32.mrf.mxu1 }
 0x23f   :  { %4893 = vst [vmem:[#allocation15_spill] sm:$0xff] %v4596_v42 }
 0x240   :  { %v4598_v29 = vpop.f32.mrf.mxu3  ;;  %4896 = vst [vmem:[#allocation18_spill] sm:$0xff] %v4602_v19 }
 0x241   :  { %4894 = vst [vmem:[#allocation16_spill] sm:$0xff] %v4598_v29 }
 0x246   :  { %v4607_v41 = vpop.f32.mrf.mxu2 }
 0x247   :  { %v1290_v51 = vpop.permute.xlu2 %1289  ;;  %4897 = vst [vmem:[#allocation19_spill] sm:$0xff] %v4607_v41 }
 0x248   :  { %v4612_v24 = vpop.f32.mrf.mxu3  ;;  %v1313_v29 = vsel %vm412_vm2, %v4487_v0, %v1290_v51 }
 0x249   :  { %4898 = vst [vmem:[#allocation20_spill] sm:$0xff] %v4612_v24 }
 0x24f   :  { %v1296_v52 = vpop.permute.xlu2 %1295 }
 0x250   :  { %v1314_v48 = vsel %vm414_vm3, %v1313_v29, %v1296_v52 }
 0x255   :  { %v1224_v7 = vpop.permute.xlu0 %1223 }
 0x257   :  { %v1258_v2 = vpop.permute.xlu1 %1257  ;;  %v1280_v49 = vpop.permute.xlu2 %1279 }
 0x25d   :  { %v1246_v1 = vpop.permute.xlu0 %1245 }
 0x25e   :  { %v1307_v55 = vsel %vm412_vm2, %v4477_v3, %v1246_v1  ;;  %v2290_v3 = vld [vmem:[%s4859_s8] sm:$0xf]  ;;  %v2223_v1 = vpop.f32.mrf.mxu0 }
 0x25f   :  { %v1268_v61 = vpop.permute.xlu1 %1267  ;;  %v1236_v51 = vpop.permute.xlu2 %1235 }
 0x260   :  { %v1310_v47 = vsel %vm412_vm2, %v4491_v17, %v1268_v61 }
 0x265   :  { %v1252_v38 = vpop.permute.xlu0 %1251 }
 0x266   :  { %v1308_v20 = vsel %vm414_vm3, %v1307_v55, %v1252_v38  ;;  %v1304_v38 = vsel %vm412_vm2, %v4473_v9, %v1224_v7  ;;  %v4632_v55 = vperm.slane %v2290_v3, 0 }
 0x267   :  { %v1274_v54 = vpop.permute.xlu1 %1273  ;;  %v1309_v61 = vsel %vm416_vm4, %v1308_v20, %v1258_v2  ;;  %v4636_v20 = vperm.slane %v2290_v3, 1 }
 0x268   :  { %v1311_v4 = vsel %vm414_vm3, %v1310_v47, %v1274_v54 }
 0x269   :  { %v1312_v19 = vsel %vm416_vm4, %v1311_v4, %v1280_v49  ;;  %v1320_v49 = vrot.slane %v1309_v61, 7 }
 0x26a   :  { %v1321_v54 = vrot.slane %v1312_v19, 6  ;;  %v2242_v19 = vpop.f32.mrf.mxu1 }
 0x26d   :  { %v1302_v17 = vpop.permute.xlu0 %1301 }
 0x26e   :  { %v1315_v47 = vsel %vm416_vm4, %v1314_v48, %v1302_v17  ;;  %v2348_v48 = vld [vmem:[%s4860_s9] sm:$0xf]  ;;  %v4638_v17 = vperm.slane %v2290_v3, 2 }
 0x26f   :  { %v1322_v41 = vrot.slane %v1315_v47, 5  ;;  %v1230_v0 = vpop.permute.xlu1 %1229  ;;  %v4648_v24 = vperm.slane %v2348_v48, 1  ;;  %v4650_v21 = vperm.slane %v2348_v48, 2  ;;  %v4652_v42 = vperm.slane %v2348_v48, 3 }
 0x270   :  { %v1305_v2 = vsel %vm414_vm3, %v1304_v38, %v1230_v0  ;;  %v4644_v38 = vperm.slane %v2348_v48, 0 }
 0x271   :  { %v1324_v52 = vsel %vm436_vm5, %v1321_v54, %v1322_v41  ;;  %v1327_v29 = vsel %vm441_vm6, %v1321_v54, %v1322_v41  ;;  %v1306_v4 = vsel %vm416_vm4, %v1305_v2, %v1236_v51  ;;  %v2261_v41 = vpop.f32.mrf.mxu2  ;;  %v4642_v54 = vperm.slane %v2290_v3, 3 }
 0x272   :  { %v1323_v9 = vsel %vm434_vm7, %v1306_v4, %v1320_v49  ;;  %v1326_v7 = vsel %vm326_vm1, %v1306_v4, %v1320_v49  ;;  %v2280_v49 = vpop.f32.mrf.mxu3 }
 0x273   :  { %v1325_v61 = vsel %vm438_vm8, %v1323_v9, %v1324_v52  ;;  %v1328_v47 = vsel %vm443_vm9, %v1326_v7, %v1327_v29  ;;  %v2225_v9 = vpop.f32.mrf.mxu0 }
 0x274   :  { %v4646_v0 = vrot.slane %v1328_v47, 1  ;;  %v1330_v51 = vperm.slane %v1325_v61, 0  ;;  %v1331_v2 = vperm.slane %v1325_v61, 1  ;;  %v1332_v4 = vperm.slane %v1325_v61, 2 }
 0x275   :  { %v1333_v45 = vperm.slane %v1325_v61, 3 }
 0x276   :  { %v1334_v52 = vperm.slane %v4646_v0, 0  ;;  %v1335_v3 = vperm.slane %v4646_v0, 1  ;;  %v1996_v7 = vadd.f32 %v4500_v28, %v1330_v51  ;;  %v1998_v47 = vadd.f32 %v4517_v53, %v1330_v51 }
 0x277   :  { %v2072_v56 = vadd.f32 %v4544_v62, %v1331_v2  ;;  %v2074_v61 = vadd.f32 %v4552_v57, %v1331_v2  ;;  %v2224_v51 = vadd.f32 %v2223_v1, %v1333_v45  ;;  %v2226_v2 = vadd.f32 %v2225_v9, %v1333_v45 }
 0x278   :  { %v2001_v6 = vadd.f32 %v4528_v25, %v1334_v52  ;;  %v4664_v48 = vadd.f32 %v4536_v40, %v1334_v52  ;;  %v4667_v36 = vadd.f32 %v4560_v35, %v1335_v3  ;;  %v4670_v29 = vadd.f32 %v4568_v27, %v1335_v3  ;;  %v2244_v35 = vpop.f32.mrf.mxu1 }
 0x279   :  { %v2015_v28 = vadd.f32 %v4503_v46, %v1996_v7  ;;  %v2017_v53 = vadd.f32 %v4520_v33, %v1998_v47  ;;  %v2091_v62 = vadd.f32 %v4546_v43, %v2072_v56  ;;  %v2093_v57 = vadd.f32 %v4554_v10, %v2074_v61 }
 0x27a   :  { %v2148_v25 = vadd.f32 %v4576_v34, %v1332_v4  ;;  %v2150_v40 = vadd.f32 %v4584_v18, %v1332_v4  ;;  %v2245_v56 = vadd.f32 %v2244_v35, %v2226_v2  ;;  %v2243_v10 = vadd.f32 %v2242_v19, %v2224_v51  ;;  %v2263_v34 = vpop.f32.mrf.mxu2 }
 0x27b   :  { %v2036_v52 = vadd.f32 %v4524_v15, %v2017_v53  ;;  %v2112_v27 = vadd.f32 %v4556_v37, %v2093_v57  ;;  %v2034_v3 = vadd.f32 %v4508_v16, %v2015_v28  ;;  %v2110_v46 = vadd.f32 %v4548_v8, %v2091_v62  ;;  %v2228_v51 = vpop.f32.mrf.mxu0 }
 0x27c   :  { %v2169_v33 = vadd.f32 %v4586_v12, %v2150_v40  ;;  %v2167_v43 = vadd.f32 %v4578_v63, %v2148_v25  ;;  %v2264_v16 = vadd.f32 %v2263_v34, %v2245_v56  ;;  %v2262_v4 = vadd.f32 %v2261_v41, %v2243_v10  ;;  %v2282_v12 = vpop.f32.mrf.mxu3 }
 0x27d   :  { %v2055_v18 = vadd.f32 %v4526_v31, %v2036_v52  ;;  %v2131_v45 = vadd.f32 %v4558_v50, %v2112_v27  ;;  %v2053_v1 = vadd.f32 %v4514_v60, %v2034_v3  ;;  %v2129_v15 = vadd.f32 %v4550_v23, %v2110_v46  ;;  %v2414_v3 = vld [vmem:[%s4862_s11 + $0x8] sm:$0xff] }
 0x27e   :  { %v2188_v37 = vadd.f32 %v4588_v26, %v2169_v33  ;;  %v2186_v8 = vadd.f32 %v4580_v22, %v2167_v43  ;;  %v2283_v60 = vadd.f32 %v2282_v12, %v2264_v16  ;;  %v2281_v7 = vadd.f32 %v2280_v49, %v2262_v4  ;;  %2450 = vmatpush.msrb.mxu0 %v2414_v3 }
 0x27f   :  { %v2304_v9 = vadd.f32 %v4632_v55, %v2055_v18  ;;  %v2305_v63 = vadd.f32 %v4636_v20, %v2131_v45  ;;  %v2300_v19 = vadd.f32 %v4632_v55, %v2053_v1  ;;  %v2301_v31 = vadd.f32 %v4636_v20, %v2129_v15 }
 0x280   :  { %v2207_v50 = vadd.f32 %v4590_v44, %v2188_v37  ;;  %v2205_v23 = vadd.f32 %v4582_v14, %v2186_v8  ;;  %v2020_v22 = vadd.f32 %v4530_v39, %v2001_v6  ;;  %v2307_v28 = vadd.f32 %v4642_v54, %v2283_v60  ;;  %v2247_v46 = vpop.f32.mrf.mxu1 }
 0x281   :  { %v2320_v26 = vmul.f32 0.33, %v2304_v9  ;;  %v2321_v47 = vmul.f32 0.33, %v2305_v63  ;;  %v2316_v61 = vmul.f32 0.33, %v2300_v19  ;;  %v2303_v62 = vadd.f32 %v4642_v54, %v2281_v7 }
 0x282   :  { %v2306_v41 = vadd.f32 %v4638_v17, %v2207_v50  ;;  %v2302_v53 = vadd.f32 %v4638_v17, %v2205_v23  ;;  %v2317_v44 = vmul.f32 0.33, %v2301_v31  ;;  %v2323_v49 = vmul.f32 0.33, %v2307_v28  ;;  %v2266_v1 = vpop.f32.mrf.mxu2 }
 0x283   :  { %v2336_v57 = vmax.f32 %v2304_v9, %v2320_v26  ;;  %v2337_v25 = vmax.f32 %v2305_v63, %v2321_v47  ;;  %v2332_v40 = vmax.f32 %v2300_v19, %v2316_v61  ;;  %v2039_v35 = vadd.f32 %v4532_v32, %v2020_v22  ;;  %v4901_v47 = vld [vmem:[#allocation12_spill] sm:$0xff]  ;;  %v4902_v22 = vld [vmem:[#allocation11_spill] sm:$0xff] }
 0x284   :  { %v2322_v14 = vmul.f32 0.33, %v2306_v41  ;;  %v2318_v2 = vmul.f32 0.33, %v2302_v53  ;;  %v2319_v52 = vmul.f32 0.33, %v2303_v62  ;;  %v2333_v27 = vmax.f32 %v2301_v31, %v2317_v44  ;;  %v2285_v31 = vpop.f32.mrf.mxu3 }
 0x285   :  { %v2362_v39 = vmul.f32 %v4644_v38, %v2336_v57  ;;  %v2363_v6 = vmul.f32 %v4648_v24, %v2337_v25  ;;  %v2339_v56 = vmax.f32 %v2307_v28, %v2323_v49  ;;  %v2358_v10 = vmul.f32 %v4644_v38, %v2332_v40  ;;  %v4905_v40 = vld [vmem:[#allocation13_spill] sm:$0xff] }
 0x286   :  { %v2338_v33 = vmax.f32 %v2306_v41, %v2322_v14  ;;  %v2334_v43 = vmax.f32 %v2302_v53, %v2318_v2  ;;  %v2335_v18 = vmax.f32 %v2303_v62, %v2319_v52  ;;  %v2359_v32 = vmul.f32 %v4648_v24, %v2333_v27  ;;  %v4903_v53 = vld [vmem:[#allocation9_spill] sm:$0xff]  ;;  %v4906_v14 = vld [vmem:[#allocation10_spill] sm:$0xff] }
 0x287   :  { %v2379_v34 = vadd.f32 %v2363_v6, %v2362_v39  ;;  %v2058_v45 = vadd.f32 %v4534_v11, %v2039_v35  ;;  %v2365_v37 = vmul.f32 %v4652_v42, %v2339_v56  ;;  %v2096_v8 = vadd.f32 %v4562_v5, %v4667_v36  ;;  %v4908_v2 = vld [vmem:[#allocation17_spill] sm:$0xff]  ;;  %v4909_v39 = vld [vmem:[#allocation16_spill] sm:$0xff]  ;;  %v4910_v27 = vld [vmem:[#allocation14_spill] sm:$0xff] }
 0x288   :  { %v2364_v15 = vmul.f32 %v4650_v21, %v2338_v33  ;;  %v2360_v16 = vmul.f32 %v4650_v21, %v2334_v43  ;;  %v2361_v4 = vmul.f32 %v4652_v42, %v2335_v18  ;;  %v2374_v12 = vadd.f32 %v2359_v32, %v2358_v10  ;;  %v2249_v56 = vpop.f32.mrf.mxu1 }
 0x289   :  { %v4899_v9 = vperm.slane %v4646_v0, 2  ;;  %v4900_v19 = vperm.slane %v4646_v0, 3  ;;  %v2115_v60 = vadd.f32 %v4564_v59, %v2096_v8  ;;  %v2308_v23 = vadd.f32 %v4632_v55, %v2058_v45  ;;  %v4904_v59 = vld [vmem:[#allocation15_spill] sm:$0xff] }
 0x28a   :  { %v2380_v50 = vadd.f32 %v2379_v34, %v2364_v15  ;;  %v2022_v7 = vadd.f32 %v4538_v30, %v4664_v48  ;;  %v2375_v5 = vadd.f32 %v2374_v12, %v2360_v16  ;;  %v2098_v61 = vadd.f32 %v4901_v47, %v4670_v29  ;;  %v2230_v30 = vpop.f32.mrf.mxu0  ;;  %v4912_v34 = vld [vmem:[#allocation18_spill] sm:$0xff]  ;;  %v2268_v16 = vpop.f32.mrf.mxu2 }
 0x28b   :  { %v2153_v63 = vadd.f32 %v4592_v13, %v4899_v9  ;;  %v2229_v11 = vadd.f32 %v2228_v51, %v4900_v19  ;;  %v2134_v41 = vadd.f32 %v4902_v22, %v2115_v60  ;;  %v2324_v28 = vmul.f32 0.33, %v2308_v23  ;;  %v4914_v60 = vld [vmem:[#allocation20_spill] sm:$0xff] }
 0x28c   :  { %v2381_v13 = vadd.f32 %v2380_v50, %v2365_v37  ;;  %v2041_v62 = vadd.f32 %v4903_v53, %v2022_v7  ;;  %v2376_v57 = vadd.f32 %v2375_v5, %v2361_v4  ;;  %v2117_v51 = vadd.f32 %v4905_v40, %v2098_v61  ;;  %v4913_v4 = vld [vmem:[#allocation19_spill] sm:$0xff]  ;;  %v2287_v50 = vpop.f32.mrf.mxu3 }
 0x28d   :  { %v2172_v36 = vadd.f32 %v4594_v58, %v2153_v63  ;;  %v2248_v26 = vadd.f32 %v2247_v46, %v2229_v11  ;;  %v2309_v58 = vadd.f32 %v4636_v20, %v2134_v41  ;;  %v2340_v48 = vmax.f32 %v2308_v23, %v2324_v28 }
 0x28e   :  { %2382 = vadd.xlane.f32.xlu1 %v2381_v13  ;;  %v2060_v49 = vadd.f32 %v4906_v14, %v2041_v62  ;;  %v4907_v29 = vmov %v4899_v9  ;;  %2377 = vadd.xlane.f32.xlu0 %v2376_v57  ;;  %v2136_v3 = vadd.f32 %v4910_v27, %v2117_v51  ;;  %v4911_v46 = vmov %v4900_v19  ;;  %v2458_v14 = vld [vmem:[%s4864_s13] sm:$0xff] }
 0x28f   :  { %v2191_v25 = vadd.f32 %v4904_v59, %v2172_v36  ;;  %v2267_v44 = vadd.f32 %v2266_v1, %v2248_v26  ;;  %v2155_v35 = vadd.f32 %v4908_v2, %v4907_v29  ;;  %v2231_v33 = vadd.f32 %v2230_v30, %v4911_v46 }
 0x290   :  { %v2325_v43 = vmul.f32 0.33, %v2309_v58  ;;  %v2366_v10 = vmul.f32 %v4644_v38, %v2340_v48  ;;  %v2312_v32 = vadd.f32 %v4632_v55, %v2060_v49  ;;  %v2313_v37 = vadd.f32 %v4636_v20, %v2136_v3 }
 0x291   :  { %v2210_v6 = vadd.f32 %v4909_v39, %v2191_v25  ;;  %v2286_v52 = vadd.f32 %v2285_v31, %v2267_v44  ;;  %v2174_v18 = vadd.f32 %v4912_v34, %v2155_v35  ;;  %v2250_v15 = vadd.f32 %v2249_v56, %v2231_v33 }
 0x292   :  { %v2341_v8 = vmax.f32 %v2309_v58, %v2325_v43  ;;  %v2328_v12 = vmul.f32 0.33, %v2312_v32  ;;  %v2329_v11 = vmul.f32 0.33, %v2313_v37  ;;  %v3542_v31 = vmov 0  }
 0x293   :  { %v2310_v45 = vadd.f32 %v4638_v17, %v2210_v6  ;;  %v2311_v1 = vadd.f32 %v4642_v54, %v2286_v52  ;;  %v2193_v0 = vadd.f32 %v4913_v4, %v2174_v18  ;;  %v2269_v19 = vadd.f32 %v2268_v16, %v2250_v15  ;;  %3478 = vset.pattern.permute.xlu0 %v3542_v31  ;;  %v3479_v58 = vld [vmem:[#allocation2] ss:$0 sm:$0xff] }
 0x294   :  { %v2367_v55 = vmul.f32 %v4648_v24, %v2341_v8  ;;  %v2344_v7 = vmax.f32 %v2312_v32, %v2328_v12  ;;  %v2345_v26 = vmax.f32 %v2313_v37, %v2329_v11  ;;  %v2423_v29 = vlaneseq  ;;  %v2504_v11 = vld [vmem:[%s4866_s15 + $0x68] sm:$0xff]  ;;  %v2503_v31 = vld [vmem:[%s4866_s15 + $0x60] sm:$0xff] }
 0x295   :  { %v2326_v9 = vmul.f32 0.33, %v2310_v45  ;;  %v2327_v63 = vmul.f32 0.33, %v2311_v1  ;;  %v2212_v23 = vadd.f32 %v4914_v60, %v2193_v0  ;;  %v2288_v20 = vadd.f32 %v2287_v50, %v2269_v19  ;;  %v2505_v19 = vld [vmem:[%s4866_s15 + $0x70] sm:$0xff]  ;;  %v2502_v50 = vld [vmem:[%s4866_s15 + $0x58] sm:$0xff] }
 0x296   :  { %v2384_v47 = vadd.f32 %v2367_v55, %v2366_v10  ;;  %v2370_v13 = vmul.f32 %v4644_v38, %v2344_v7  ;;  %v2371_v28 = vmul.f32 %v4648_v24, %v2345_v26  ;;  %v2413_v24 = vld [vmem:[%s4862_s11] sm:$0xff]  ;;  %v2424_v35 = vand.u32 127, %v2423_v29  ;;  %v2501_v55 = vld [vmem:[%s4866_s15 + $0x50] sm:$0xff]  ;;  %v2500_v60 = vld [vmem:[%s4866_s15 + $0x48] sm:$0xff]  ;;  %s2580_s11 = sshll.u32 %s4870_s19, 4  ;;  %s2581_s11 = int_to_ptr.hbm [resolvable:$true] %s2580_s11 }
 0x297   :  { %v2342_v5 = vmax.f32 %v2310_v45, %v2326_v9  ;;  %v2343_v36 = vmax.f32 %v2311_v1, %v2327_v63  ;;  %v2314_v61 = vadd.f32 %v4638_v17, %v2212_v23  ;;  %v2315_v41 = vadd.f32 %v4642_v54, %v2288_v20  ;;  %2451 = vmatpush.msrb.mxu0 %v2413_v24  ;;  %v2461_v54 = vld [vmem:[%s4864_s13 + $0x18] sm:$0xff]  ;;  %v2499_v23 = vld [vmem:[%s4866_s15 + $0x40] sm:$0xff] }
 0x298   :  { %v2389_v25 = vadd.f32 %v2371_v28, %v2370_v13  ;;  %2481 = vmatpush.msrb.mxu1 %v2461_v54  ;;  %v2426_v46 = vadd.s32 4294967288, %v2424_v35  ;;  %v2506_v63 = vld [vmem:[%s4866_s15 + $0x78] sm:$0xff]  ;;  %v2495_v20 = vld [vmem:[%s4866_s15 + $0x20] sm:$0xff]  ;;  %v2493_v28 = vld [vmem:[%s4866_s15 + $0x10] sm:$0xff] }
 0x299   :  { %v2368_v22 = vmul.f32 %v4650_v21, %v2342_v5  ;;  %v2330_v53 = vmul.f32 0.33, %v2314_v61  ;;  %v2369_v62 = vmul.f32 %v4652_v42, %v2343_v36  ;;  %v2331_v59 = vmul.f32 0.33, %v2315_v41  ;;  %2511 = vmatpush.msrb.mxu2 %v2506_v63  ;;  %v2498_v7 = vld [vmem:[%s4866_s15 + $0x38] sm:$0xff]  ;;  %v2497_v5 = vld [vmem:[%s4866_s15 + $0x30] sm:$0xff] }
 0x29a   :  { %v2496_v36 = vld [vmem:[%s4866_s15 + $0x28] sm:$0xff]  ;;  %v3480_v26 = vld [vmem:[%s4863_s12] ss:$0 sm:$0xff] }
 0x29b   :  { %v2385_v57 = vadd.f32 %v2384_v47, %v2368_v22  ;;  %v2346_v44 = vmax.f32 %v2314_v61, %v2330_v53  ;;  %v2347_v51 = vmax.f32 %v2315_v41, %v2331_v59  ;;  %2512 = vmatpush.msrb.mxu2 %v2505_v19  ;;  %v2494_v47 = vld [vmem:[%s4866_s15 + $0x18] sm:$0xff]  ;;  %v2492_v53 = vld [vmem:[%s4866_s15 + $0x8] sm:$0xff]  ;;  %v2535_v59 = vld [vmem:[%s4868_s17 + $0x10] sm:$0xff] }
 0x29d   :  { %v2386_v40 = vadd.f32 %v2385_v57, %v2369_v62  ;;  %v2372_v30 = vmul.f32 %v4650_v21, %v2346_v44  ;;  %v2373_v17 = vmul.f32 %v4652_v42, %v2347_v51  ;;  %v2460_v21 = vld [vmem:[%s4864_s13 + $0x10] sm:$0xff]  ;;  %v2459_v42 = vld [vmem:[%s4864_s13 + $0x8] sm:$0xff]  ;;  %2513 = vmatpush.msrb.mxu2 %v2504_v11  ;;  %v2491_v62 = vld [vmem:[%s4866_s15] sm:$0xff] }
 0x29e   :  { %2482 = vmatpush.msrb.mxu1 %v2460_v21  ;;  %v2536_v57 = vld [vmem:[%s4868_s17 + $0x18] sm:$0x3f]  ;;  %v2533_v44 = vld [vmem:[%s4868_s17] sm:$0xff] }
 0x29f   :  { %2387 = vadd.xlane.f32.xlu2 %v2386_v40  ;;  %v2390_v38 = vadd.f32 %v2389_v25, %v2372_v30  ;;  %2514 = vmatpush.msrb.mxu2 %v2503_v31  ;;  %v2534_v25 = vld [vmem:[%s4868_s17 + $0x8] sm:$0xff]  ;;  %v3481_v40 = vld [vmem:[%s4865_s14] ss:$0 sm:$0xff]  ;;  %s3543_s14 = smov [#allocation6]  }
 0x2a0   :  { %2483 = vmatpush.msrb.mxu1 %v2459_v42  ;;  %3296 = vmatpush.msk.msrb.mxu3 %vm2545_vm11, %v2536_v57  ;;  %v3483_v42 = vld [vmem:[%s4869_s18] ss:$0 sm:$0xff]  ;;  %s2578_s3 = sshll.u32 %s3543_s14, 4  ;;  %s2579_s3 = int_to_ptr.vmem [resolvable:$true] %s2578_s3 }
 0x2a1   :  { %v2391_v48 = vadd.f32 %v2390_v38, %v2373_v17  ;;  %2515 = vmatpush.msrb.mxu2 %v2502_v50 }
 0x2a2   :  { %2398 = vperm.xlu0 %3478, %v3479_v58   ;;  %2484 = vmatpush.msrb.mxu1 %v2458_v14  ;;  %v3482_v58 = vld [vmem:[%s4867_s16] ss:$0 sm:$0xff] }
 0x2a3   :  { %2516 = vmatpush.msrb.mxu2 %v2501_v55  ;;  %2562 = vmatpush.msrb.mxu3 %v2535_v59 }
 0x2a5   :  { %2517 = vmatpush.msrb.mxu2 %v2500_v60  ;;  %2563 = vmatpush.msrb.mxu3 %v2534_v25 }
 0x2a7   :  { %2392 = vadd.xlane.f32.xlu2 %v2391_v48  ;;  %2518 = vmatpush.msrb.mxu2 %v2499_v23 }
 0x2a8   :  { %2564 = vmatpush.msrb.mxu3 %v2533_v44 }
 0x2a9   :  { %2519 = vmatpush.msrb.mxu2 %v2498_v7 }
 0x2ab   :  { %2520 = vmatpush.msrb.mxu2 %v2497_v5 }
 0x2ad   :  { %2521 = vmatpush.msrb.mxu2 %v2496_v36 }
 0x2af   :  { %2522 = vmatpush.msrb.mxu2 %v2495_v20 }
 0x2b1   :  { %2523 = vmatpush.msrb.mxu2 %v2494_v47 }
 0x2b3   :  { %2524 = vmatpush.msrb.mxu2 %v2493_v28 }
 0x2b5   :  { %2525 = vmatpush.msrb.mxu2 %v2492_v53 }
 0x2b7   :  { %2526 = vmatpush.msrb.mxu2 %v2491_v62 }
 0x301   :  { %v2378_v49 = vpop.xlane.xlu0 %2377  ;;  %v2383_v39 = vpop.xlane.xlu1 %2382 }
 0x312   :  { %v2388_v2 = vpop.xlane.xlu2 %2387 }
 0x314   :  { %v2399_v6 = vpop.permute.xlu0 %2398 }
 0x315   :  { %v2401_v52 = vadd.f32 %v2399_v6, %v2378_v49  ;;  %v2402_v27 = vadd.f32 %v2399_v6, %v2383_v39  ;;  %v2403_v3 = vadd.f32 %v2399_v6, %v2388_v2 }
 0x317   :  { %v2405_v56 = vmul.f32 0.33, %v2401_v52  ;;  %v2406_v43 = vmul.f32 0.33, %v2402_v27  ;;  %v2407_v10 = vmul.f32 0.33, %v2403_v3 }
 0x319   :  { %v2409_v18 = vmax.f32 %v2401_v52, %v2405_v56  ;;  %v2410_v32 = vmax.f32 %v2402_v27, %v2406_v43  ;;  %v2411_v45 = vmax.f32 %v2403_v3, %v2407_v10 }
 0x31a   :  { %v2393_v33 = vpop.xlane.xlu2 %2392 }
 0x31b   :  { %v2404_v34 = vadd.f32 %v2399_v6, %v2393_v33  ;;  %v2425_v15 = vperm.slane %v2409_v18, %v2424_v35  ;;  %v2427_v37 = vperm.slane %v2410_v32, %v2426_v46  ;;  %v2430_v8 = vperm.slane %v2411_v45, %v2424_v35 }
 0x31d   :  { %v2408_v1 = vmul.f32 0.33, %v2404_v34  ;;  %v2429_v0 = vsel %vm2428_vm10, %v2427_v37, %v2425_v15 }
 0x31f   :  { %v2412_v16 = vmax.f32 %v2404_v34, %v2408_v1 }
 0x321   :  { %v2431_v4 = vperm.slane %v2412_v16, %v2426_v46 }
 0x323   :  { %v2432_v12 = vsel %vm2428_vm10, %v2431_v4, %v2430_v8 }
 0x324   :  { %v2433_v9 = vsel %vm326_vm1, %v2432_v12, %v2429_v0 }
 0x325   :  { %3294 = vmatmul.msk.f32.vlgmr.msrb.gmra.mxu0 %vm124_vm0, %v2433_v9 }
 0x3a2   :  { %v2453_v61 = vpop.f32.mrf.mxu0 }
 0x3a3   :  { %v2454_v13 = vadd.f32 %v3480_v26, %v2453_v61 }
 0x3a5   :  { %v2456_v22 = vmul.f32 0.33, %v2454_v13 }
 0x3a7   :  { %v2457_v41 = vmax.f32 %v2454_v13, %v2456_v22 }
 0x3a9   :  { %3295 = vmatmul.msk.f32.vlgmr.msrb.gmra.mxu1 %vm412_vm2, %v2457_v41 }
 0x426   :  { %v2486_v51 = vpop.f32.mrf.mxu1 }
 0x427   :  { %v2487_v30 = vadd.f32 %v3481_v40, %v2486_v51 }
 0x429   :  { %v2489_v17 = vmul.f32 0.33, %v2487_v30 }
 0x42b   :  { %v2490_v38 = vmax.f32 %v2487_v30, %v2489_v17 }
 0x42d   :  { %2527 = vmatmul.f32.vlgmr.msrb.gmra.mxu2 %v2490_v38 }
 0x4b0   :  { %v2528_v48 = vpop.f32.mrf.mxu2 }
 0x4b1   :  { %v2529_v24 = vadd.f32 %v3482_v58, %v2528_v48 }
 0x4b3   :  { %v2531_v54 = vmul.f32 0.33, %v2529_v24 }
 0x4b5   :  { %v2532_v21 = vmax.f32 %v2529_v24, %v2531_v54 }
 0x4b7   :  { %3297 = vmatmul.msk.f32.vlgmr.msrb.gmra.mxu3 %vm2541_vm12, %v2532_v21 }
 0x53a   :  { %v2566_v14 = vpop.f32.mrf.mxu3 }
 0x53b   :  { %v2567_v49 = vadd.f32 %v3483_v42, %v2566_v14 }
 0x53d   :  { %v2569_v29 = vmul.f32 0.33, %v2567_v49 }
 0x53f   :  { %v2570_v2 = vmax.f32 %v2567_v49, %v2569_v29 }
 0x541   :  { %2572 = vst.msk [vmem:[#allocation6] sm:$0x3] %vm2571_vm13, %v2570_v2 }
 0x542   :  { %2583 = dma.vmem_to_hbm [thread:$0]  %s2579_s3, 32, %s2581_s11, [#allocation5]  }
 0x543   :  { %3534 = dma.done.wait [#allocation5], 32  }
 0x544   :  { %3535 = vsyncadd [#allocation5], 4294967264 }
 0x545   :  { %2588 = vsyncpa [#allocation4], 1 }
 0x546   :  { %2589 = vsyncpa [#allocation5], 1 }

</bundles_post_ra>
